<compile_context>
chip_gen: v7x
topology: tpu7x:2x2x1
jax: 0.10.0
libtpu: 0.0.40
codegen_flags: <defaults>
</compile_context>

<pallas_src>
import functools
import math

import jax
import jax.numpy as jnp
from jax import lax
from jax.experimental import pallas as pl
from jax.experimental.pallas import tpu as pltpu

NEG_INF = -1e9
LN_EPS = 1e-5                     # torch.nn.LayerNorm default
MXU_DTYPE = jnp.bfloat16          # MXU operand dtype (accumulation stays f32)
WEIGHT_DTYPE = jnp.bfloat16       # weights stored in HBM as bf16
ACT_DTYPE = jnp.bfloat16          # inter-kernel residual-stream dtype
VMEM_LIMIT = 48 * 1024 * 1024     # raised scoped-VMEM limit (safe on v5e/v6e/v7x)


# ------------------------------ kernel helpers -------------------------------

def _mxu(a, b, contract):
    """MXU matmul with bf16 operands and f32 accumulation."""
    return lax.dot_general(
        a.astype(MXU_DTYPE), b.astype(MXU_DTYPE),
        dimension_numbers=(((contract[0],), (contract[1],)), ((), ())),
        preferred_element_type=jnp.float32)


def _ln(x, g, b, eps):
    mu = jnp.mean(x, axis=-1, keepdims=True)
    var = jnp.mean(jnp.square(x - mu), axis=-1, keepdims=True)
    return (x - mu) * lax.rsqrt(var + eps) * g + b


def _pick_tile(n, pref):
    """Largest power-of-two-ish tile <= pref that divides n (else full n)."""
    if n <= pref:
        return n
    t = pref
    while t >= 8:
        if n % t == 0:
            return t
        t //= 2
    return n


def _cparams(dims):
    return pltpu.CompilerParams(dimension_semantics=dims,
                                vmem_limit_bytes=VMEM_LIMIT)


# ----------------------------- Pallas kernels --------------------------------

def _attn_block_kernel(*refs, n_head, d, scale, causal, self_attn, eps):
    """Fused: pre-LN -> per-head QKV -> attention -> single Wo matmul -> +res.

    One batch element per grid step.  All intermediates live in VMEM/vregs.
    """
    if self_attn:
        (xq_ref, kvb_ref, lng_ref, lnb_ref,
         wq_ref, bq_ref, wk_ref, bk_ref, wv_ref, bv_ref,
         wo_ref, bo_ref, o_ref, ctx_ref) = refs
        xkv_ref = None
    else:
        (xq_ref, xkv_ref, kvb_ref, lng_ref, lnb_ref,
         wq_ref, bq_ref, wk_ref, bk_ref, wv_ref, bv_ref,
         wo_ref, bo_ref, o_ref, ctx_ref) = refs

    x = xq_ref[0].astype(jnp.float32)                       # [Tq, H] residual in
    h = _ln(x, lng_ref[...], lnb_ref[...], eps)             # pre-LN (f32)
    kv_in = h if self_attn else xkv_ref[0].astype(jnp.float32)   # [Tk, H]

    Tq = x.shape[0]
    Tk = kv_in.shape[0]

    bias = kvb_ref[0]                                        # [1, Tk] pad bias
    if causal:
        row = lax.broadcasted_iota(jnp.int32, (Tq, Tk), 0)
        col = lax.broadcasted_iota(jnp.int32, (Tq, Tk), 1)
        bias = bias + jnp.where(col > row, NEG_INF, 0.0).astype(jnp.float32)

    # Head-major weights [n_head, H, d]: heads picked by (free) leading-axis
    # indexing, so there is no sub-128-lane activation/weight slicing.  Each
    # head's context is stored to a [Tq, H] VMEM scratch (static lane offset
    # => static Python loop), ending the life of the [Tq,Tk] temporaries per
    # iteration, and a single full-K (K=H) Wo matmul runs after the loop.
    for hd in range(n_head):
        q_h = _mxu(h, wq_ref[hd], (1, 0)) + bq_ref[hd]       # [Tq, d]
        k_h = _mxu(kv_in, wk_ref[hd], (1, 0)) + bk_ref[hd]   # [Tk, d]
        v_h = _mxu(kv_in, wv_ref[hd], (1, 0)) + bv_ref[hd]   # [Tk, d]
        s = _mxu(q_h, k_h, (1, 1)) * scale + bias            # [Tq, Tk]
        s = s - jnp.max(s, axis=-1, keepdims=True)
        e = jnp.exp(s)
        p = e * pl.reciprocal(jnp.sum(e, axis=-1, keepdims=True), approx=True)
        ctx_ref[:, hd * d:(hd + 1) * d] = _mxu(p, v_h, (1, 0))   # [Tq, d]

    out = x + _mxu(ctx_ref[...], wo_ref[...], (1, 0)) + bo_ref[...]
    o_ref[0] = out.astype(o_ref.dtype)


def _ffn_block_kernel(x_ref, lng_ref, lnb_ref, w1_ref, b1_ref, w2_ref, b2_ref,
                      o_ref, h_scr, acc_scr, *, eps):
    """Fused: pre-LN -> Linear -> ReLU -> Linear -> +residual.

    Grid axis 1 tiles the FFN hidden dim F (reduction; 'arbitrary').  The
    pre-LN of the row tile is computed once (j == 0) into a VMEM scratch.
    """
    j = pl.program_id(1)

    @pl.when(j == 0)
    def _():
        h_scr[...] = _ln(x_ref[...].astype(jnp.float32),
                         lng_ref[...], lnb_ref[...], eps)
        acc_scr[...] = jnp.zeros_like(acc_scr)

    f = jnp.maximum(_mxu(h_scr[...], w1_ref[...], (1, 0)) + b1_ref[...], 0.0)
    acc_scr[...] += _mxu(f, w2_ref[...], (1, 0))

    @pl.when(j == pl.num_programs(1) - 1)
    def _():
        out = x_ref[...].astype(jnp.float32) + acc_scr[...] + b2_ref[...]
        o_ref[...] = out.astype(o_ref.dtype)


def _layernorm_kernel(x_ref, g_ref, b_ref, o_ref, *, eps):
    o_ref[...] = _ln(x_ref[...].astype(jnp.float32),
                     g_ref[...], b_ref[...], eps).astype(o_ref.dtype)


def _logits_kernel(y_ref, g_ref, b_ref, emb_ref, o_ref, h_scr, *, eps):
    """Final LN (hoisted out of the vocab-tile loop) + tied projection."""
    @pl.when(pl.program_id(1) == 0)
    def _():
        h_scr[...] = _ln(y_ref[...].astype(jnp.float32),
                         g_ref[...], b_ref[...], eps)
    o_ref[...] = _mxu(h_scr[...], emb_ref[...], (1, 1))   # contract H dims


# ----------------------------- kernel wrappers --------------------------------

def attention_block(x_q, x_kv, kv_bias, lnp, ap, n_head, *, causal, self_attn):
    """x_q: [B,Tq,H]; x_kv: [B,Tk,H] (None for self-attn, no DMA issued);
    kv_bias: [B,1,Tk] additive pad bias."""
    B, Tq, H = x_q.shape
    Tk = Tq if self_attn else x_kv.shape[1]
    d = H // n_head
    scale = 1.0 / math.sqrt(d)
    kern = functools.partial(_attn_block_kernel, n_head=n_head, d=d, scale=scale,
                             causal=causal, self_attn=self_attn, eps=LN_EPS)

    def const(shape):
        return pl.BlockSpec(shape, lambda b: (0,) * len(shape))

    in_specs = [pl.BlockSpec((1, Tq, H), lambda b: (b, 0, 0))]     # x_q
    operands = [x_q]
    if not self_attn:
        # Only the cross-attention variant carries the x_kv (enc_out) operand;
        # the self-attention variant drops it to avoid a wasted [Tk,H] DMA.
        in_specs.append(pl.BlockSpec((1, Tk, H), lambda b: (b, 0, 0)))
        operands.append(x_kv)
    in_specs += [
        pl.BlockSpec((1, 1, Tk), lambda b: (b, 0, 0)),             # key pad bias
        const((1, H)), const((1, H)),                              # LN g / b
        const((n_head, H, d)), const((n_head, 1, d)),              # Wq, bq
        const((n_head, H, d)), const((n_head, 1, d)),              # Wk, bk
        const((n_head, H, d)), const((n_head, 1, d)),              # Wv, bv
        const((H, H)), const((1, H)),                              # Wo, bo
    ]
    operands += [kv_bias, lnp["g"], lnp["b"],
                 ap["wq"], ap["bq"], ap["wk"], ap["bk"], ap["wv"], ap["bv"],
                 ap["wo"], ap["bo"]]

    return pl.pallas_call(
        kern,
        out_shape=jax.ShapeDtypeStruct((B, Tq, H), ACT_DTYPE),
        grid=(B,),
        in_specs=in_specs,
        out_specs=pl.BlockSpec((1, Tq, H), lambda b: (b, 0, 0)),
        scratch_shapes=[pltpu.VMEM((Tq, H), jnp.float32)],          # head ctx
        compiler_params=_cparams(("parallel",)),
    )(*operands)


def ffn_block(x3d, lnp, fp):
    B, S, H = x3d.shape
    M = B * S
    F = fp["w1"].shape[1]
    bm = _pick_tile(M, 512)       # bigger row tiles -> closer to HBM roofline
    bf = _pick_tile(F, 2048)      # F-tile bounds W1/W2 VMEM at real sizes
    out = pl.pallas_call(
        functools.partial(_ffn_block_kernel, eps=LN_EPS),
        out_shape=jax.ShapeDtypeStruct((M, H), ACT_DTYPE),
        grid=(M // bm, F // bf),
        in_specs=[pl.BlockSpec((bm, H), lambda i, j: (i, 0)),
                  pl.BlockSpec((1, H), lambda i, j: (0, 0)),
                  pl.BlockSpec((1, H), lambda i, j: (0, 0)),
                  pl.BlockSpec((H, bf), lambda i, j: (0, j)),
                  pl.BlockSpec((1, bf), lambda i, j: (0, j)),
                  pl.BlockSpec((bf, H), lambda i, j: (j, 0)),
                  pl.BlockSpec((1, H), lambda i, j: (0, 0))],
        out_specs=pl.BlockSpec((bm, H), lambda i, j: (i, 0)),
        scratch_shapes=[pltpu.VMEM((bm, H), jnp.float32),   # pre-LN(x) tile
                        pltpu.VMEM((bm, H), jnp.float32)],  # F-reduction acc
        compiler_params=_cparams(("parallel", "arbitrary")),
    )(x3d.reshape(M, H), lnp["g"], lnp["b"],
      fp["w1"], fp["b1"], fp["w2"], fp["b2"])
    return out.reshape(B, S, H)


def layer_norm(x3d, lnp):
    B, S, H = x3d.shape
    M = B * S
    bm = _pick_tile(M, 512)
    out = pl.pallas_call(
        functools.partial(_layernorm_kernel, eps=LN_EPS),
        out_shape=jax.ShapeDtypeStruct((M, H), ACT_DTYPE),
        grid=(M // bm,),
        in_specs=[pl.BlockSpec((bm, H), lambda i: (i, 0)),
                  pl.BlockSpec((1, H), lambda i: (0, 0)),
                  pl.BlockSpec((1, H), lambda i: (0, 0))],
        out_specs=pl.BlockSpec((bm, H), lambda i: (i, 0)),
        compiler_params=_cparams(("parallel",)),
    )(x3d.reshape(M, H), lnp["g"], lnp["b"])
    return out.reshape(B, S, H)


def logits_proj(y3d, lnp, emb_bf16):
    """Final LN + weight-tied projection: LN(y) @ emb^T (no bias)."""
    B, S, H = y3d.shape
    M = B * S
    V = emb_bf16.shape[0]
    bm = _pick_tile(M, 256)
    bn = _pick_tile(V, 1024)      # v5e-safe vocab tile; emb block is bf16
    out = pl.pallas_call(
        functools.partial(_logits_kernel, eps=LN_EPS),
        out_shape=jax.ShapeDtypeStruct((M, V), jnp.float32),
        grid=(M // bm, V // bn),
        in_specs=[pl.BlockSpec((bm, H), lambda i, j: (i, 0)),
                  pl.BlockSpec((1, H), lambda i, j: (0, 0)),
                  pl.BlockSpec((1, H), lambda i, j: (0, 0)),
                  pl.BlockSpec((bn, H), lambda i, j: (j, 0))],
        out_specs=pl.BlockSpec((bm, bn), lambda i, j: (i, j)),
        scratch_shapes=[pltpu.VMEM((bm, H), jnp.float32)],   # hoisted LN(y)
        compiler_params=_cparams(("parallel", "arbitrary")),
    )(y3d.reshape(M, H), lnp["g"], lnp["b"], emb_bf16)
    return out.reshape(B, S, V)


# ----------------------------- model (glue in JAX) ----------------------------

def sinusoidal_table(max_len, hidden):
    pos = jnp.arange(max_len + 1, dtype=jnp.float32)[:, None]
    i = jnp.arange(hidden, dtype=jnp.float32)[None, :]
    angle = pos / jnp.power(10000.0, (2.0 * jnp.floor(i / 2.0)) / hidden)
    table = jnp.where((jnp.arange(hidden) % 2 == 0)[None, :],
                      jnp.sin(angle), jnp.cos(angle))
    return table.at[0].set(0.0)       # pad position -> zero vector


def embed(tokens, emb_table, pos_table, pad_idx, scale):
    # TODO(synk): gather + positional add stays in XLA (jnp.take); a
    # PrefetchScalarGridSpec row-gather kernel would fuse it at large H.
    B, S = tokens.shape
    x = jnp.take(emb_table, tokens, axis=0) * scale
    pos = jnp.where(tokens == pad_idx, 0,
                    jnp.arange(1, S + 1, dtype=jnp.int32)[None, :])
    return (x + jnp.take(pos_table, pos, axis=0)).astype(ACT_DTYPE)


def transformer_forward(params, source, target, cfg):
    H = cfg["hidden_dim"]
    n_head = cfg["n_head"]
    pad = cfg["pad_idx"]
    emb_scale = math.sqrt(H)
    pos_table = sinusoidal_table(cfg["max_len"], H)

    # Per-key additive pad biases ([B,1,T]); full [B,1,Tq,Tk] masks are built
    # inside the attention kernels (pad bias + in-kernel causal iota).
    src_bias = jnp.where(source == pad, NEG_INF, 0.0).astype(jnp.float32)[:, None, :]
    tgt_bias = jnp.where(target == pad, NEG_INF, 0.0).astype(jnp.float32)[:, None, :]

    # ---- Encoder ----
    x = embed(source, params["src_emb"], pos_table, pad, emb_scale)
    for lp in params["enc_layers"]:
        x = attention_block(x, None, src_bias, lp["ln1"], lp["attn"], n_head,
                            causal=False, self_attn=True)
        x = ffn_block(x, lp["ln2"], lp["ffn"])
    enc_out = layer_norm(x, params["enc_ln"])

    # ---- Decoder ----
    y = embed(target, params["tgt_emb"], pos_table, pad, emb_scale)
    for lp in params["dec_layers"]:
        y = attention_block(y, None, tgt_bias, lp["ln1"], lp["self_attn"], n_head,
                            causal=True, self_attn=True)
        y = attention_block(y, enc_out, src_bias, lp["ln2"], lp["cross_attn"],
                            n_head, causal=False, self_attn=False)
        y = ffn_block(y, lp["ln3"], lp["ffn"])

    # Final decoder LN + weight-tied vocab projection (y @ tgt_emb^T, no bias)
    return logits_proj(y, params["dec_ln"], params["tgt_emb"].astype(WEIGHT_DTYPE))


# ----------------------------- parameter init ---------------------------------

def init_params(key, cfg):
    H, F, n_head = cfg["hidden_dim"], cfg["ffn_dim"], cfg["n_head"]
    d = H // n_head
    keys = iter(jax.random.split(key, 512))

    def dense_w(kin, kout):
        return (jax.random.normal(next(keys), (kin, kout), jnp.float32)
                * (1.0 / math.sqrt(kin)))

    def head_major(w):
        # [H, n_head*d] -> [n_head, H, d] (kernel indexes heads on axis 0)
        kin = w.shape[0]
        return jnp.transpose(w.reshape(kin, n_head, d), (1, 0, 2)).astype(WEIGHT_DTYPE)

    def attn():
        return {"wq": head_major(dense_w(H, H)),
                "bq": jnp.zeros((n_head, 1, d), jnp.float32),
                "wk": head_major(dense_w(H, H)),
                "bk": jnp.zeros((n_head, 1, d), jnp.float32),
                "wv": head_major(dense_w(H, H)),
                "bv": jnp.zeros((n_head, 1, d), jnp.float32),
                "wo": dense_w(H, H).astype(WEIGHT_DTYPE),
                "bo": jnp.zeros((1, H), jnp.float32)}

    def ln():
        return {"g": jnp.ones((1, H), jnp.float32),
                "b": jnp.zeros((1, H), jnp.float32)}

    def ffn_p():
        return {"w1": dense_w(H, F).astype(WEIGHT_DTYPE),
                "b1": jnp.zeros((1, F), jnp.float32),
                "w2": dense_w(F, H).astype(WEIGHT_DTYPE),
                "b2": jnp.zeros((1, H), jnp.float32)}

    enc_layers = [{"ln1": ln(), "attn": attn(), "ln2": ln(), "ffn": ffn_p()}
                  for _ in range(cfg["n_layer"])]
    dec_layers = [{"ln1": ln(), "self_attn": attn(),
                   "ln2": ln(), "cross_attn": attn(),
                   "ln3": ln(), "ffn": ffn_p()}
                  for _ in range(cfg["n_layer"])]

    src_emb = jax.random.normal(next(keys), (cfg["src_vocab"], H),
                                jnp.float32) * (H ** -0.5)
    tgt_emb = jax.random.normal(next(keys), (cfg["tgt_vocab"], H),
                                jnp.float32) * (H ** -0.5)
    # padding_idx row is zero-initialized in nn.Embedding
    src_emb = src_emb.at[cfg["pad_idx"]].set(0.0)
    tgt_emb = tgt_emb.at[cfg["pad_idx"]].set(0.0)

    return {"src_emb": src_emb, "tgt_emb": tgt_emb,
            "enc_layers": enc_layers, "enc_ln": ln(),
            "dec_layers": dec_layers, "dec_ln": ln()}


# ----------------------------------- main -------------------------------------

if __name__ == "__main__":
    cfg = dict(hidden_dim=32, ffn_dim=64, n_head=4, n_layer=2,
               src_vocab=40, tgt_vocab=48, max_len=16, pad_idx=0)

    key = jax.random.PRNGKey(0)
    k_p, k_s, k_t = jax.random.split(key, 3)
    params = init_params(k_p, cfg)

    B, Ts, Tt = 2, 8, 8
    source = jax.random.randint(k_s, (B, Ts), 1, cfg["src_vocab"], dtype=jnp.int32)
    target = jax.random.randint(k_t, (B, Tt), 1, cfg["tgt_vocab"], dtype=jnp.int32)
    # exercise the padding masks
    source = source.at[1, Ts - 2:].set(cfg["pad_idx"])
    target = target.at[1, Tt - 1:].set(cfg["pad_idx"])

    fwd = jax.jit(lambda p, s, t: transformer_forward(p, s, t, cfg))
    logits = fwd(params, source, target)
    jax.block_until_ready(logits)

    assert logits.shape == (B, Tt, cfg["tgt_vocab"])
    assert bool(jnp.all(jnp.isfinite(logits)))
    print("KERNEL_OK")
</pallas_src>

<mosaic_0001>
module attributes {stable_mosaic.version = 11 : i64} {
  func.func @_layernorm_kernel(%arg0: i32, %arg1: memref<16x32xbf16, #tpu.memory_space<vmem>>, %arg2: memref<1x32xf32, #tpu.memory_space<vmem>>, %arg3: memref<1x32xf32, #tpu.memory_space<vmem>>, %arg4: memref<16x32xbf16, #tpu.memory_space<vmem>>) attributes {dimension_semantics = [#tpu.dimension_semantics<parallel>], iteration_bounds = array<i64: 1>, scalar_prefetch = 0 : i64, scratch_operands = 0 : i64, tpu.core_type = #tpu.core_type<tc>, window_params = [{transform_indices = @transform_0, window_bounds = array<i64: 16, 32>}, {pipeline_mode = #tpu.pipeline_mode<synchronous>, transform_indices = @transform_1, window_bounds = array<i64: 1, 32>}, {pipeline_mode = #tpu.pipeline_mode<synchronous>, transform_indices = @transform_2, window_bounds = array<i64: 1, 32>}, {transform_indices = @transform_3, window_bounds = array<i64: 16, 32>}]} {
    %c0 = arith.constant 0 : index
    %c0_0 = arith.constant 0 : index
    %0 = vector.load %arg1[%c0, %c0_0] : memref<16x32xbf16, #tpu.memory_space<vmem>>, vector<16x32xbf16>
    %1 = arith.extf %0 : vector<16x32xbf16> to vector<16x32xf32>
    %c0_1 = arith.constant 0 : index
    %c0_2 = arith.constant 0 : index
    %2 = vector.load %arg2[%c0_1, %c0_2] : memref<1x32xf32, #tpu.memory_space<vmem>>, vector<1x32xf32>
    %c0_3 = arith.constant 0 : index
    %c0_4 = arith.constant 0 : index
    %3 = vector.load %arg3[%c0_3, %c0_4] : memref<1x32xf32, #tpu.memory_space<vmem>>, vector<1x32xf32>
    %cst = arith.constant dense<0.000000e+00> : vector<16xf32>
    %4 = vector.multi_reduction <add>, %1, %cst [1] : vector<16x32xf32> to vector<16xf32>
    %5 = vector.shape_cast %4 : vector<16xf32> to vector<16x1xf32>
    %cst_5 = arith.constant 3.200000e+01 : f32
    %6 = vector.broadcast %cst_5 : f32 to vector<16x1xf32>
    %7 = arith.divf %5, %6 : vector<16x1xf32>
    %8 = vector.broadcast %7 : vector<16x1xf32> to vector<16x32xf32>
    %9 = arith.subf %1, %8 : vector<16x32xf32>
    %10 = arith.mulf %9, %9 : vector<16x32xf32>
    %cst_6 = arith.constant dense<0.000000e+00> : vector<16xf32>
    %11 = vector.multi_reduction <add>, %10, %cst_6 [1] : vector<16x32xf32> to vector<16xf32>
    %12 = vector.shape_cast %11 : vector<16xf32> to vector<16x1xf32>
    %cst_7 = arith.constant 3.200000e+01 : f32
    %13 = vector.broadcast %cst_7 : f32 to vector<16x1xf32>
    %14 = arith.divf %12, %13 : vector<16x1xf32>
    %15 = vector.broadcast %7 : vector<16x1xf32> to vector<16x32xf32>
    %16 = arith.subf %1, %15 : vector<16x32xf32>
    %cst_8 = arith.constant 9.99999974E-6 : f32
    %17 = vector.broadcast %cst_8 : f32 to vector<16x1xf32>
    %18 = arith.addf %14, %17 : vector<16x1xf32>
    %19 = math.rsqrt %18 : vector<16x1xf32>
    %20 = vector.broadcast %19 : vector<16x1xf32> to vector<16x32xf32>
    %21 = arith.mulf %16, %20 : vector<16x32xf32>
    %22 = vector.broadcast %2 : vector<1x32xf32> to vector<16x32xf32>
    %23 = arith.mulf %21, %22 : vector<16x32xf32>
    %24 = vector.broadcast %3 : vector<1x32xf32> to vector<16x32xf32>
    %25 = arith.addf %23, %24 : vector<16x32xf32>
    %26 = arith.truncf %25 : vector<16x32xf32> to vector<16x32xbf16>
    %c0_9 = arith.constant 0 : index
    %c0_10 = arith.constant 0 : index
    %27 = vector.load %arg4[%c0_9, %c0_10] : memref<16x32xbf16, #tpu.memory_space<vmem>>, vector<16x32xbf16>
    tpu.vector_store %arg4[%c0_9, %c0_10], %26 {strides = array<i32>} : memref<16x32xbf16, #tpu.memory_space<vmem>>, vector<16x32xbf16>,
    return
  }
  func.func @transform_0(%arg0: i32) -> (i32, i32) {
    %c0_i32 = arith.constant 0 : i32
    %c0_i32_0 = arith.constant 0 : i32
    return %arg0, %c0_i32 : i32, i32
  }
  func.func @transform_1(%arg0: i32) -> (i32, i32) {
    %c0_i32 = arith.constant 0 : i32
    %c0_i32_0 = arith.constant 0 : i32
    %c0_i32_1 = arith.constant 0 : i32
    return %c0_i32, %c0_i32_0 : i32, i32
  }
  func.func @transform_2(%arg0: i32) -> (i32, i32) {
    %c0_i32 = arith.constant 0 : i32
    %c0_i32_0 = arith.constant 0 : i32
    %c0_i32_1 = arith.constant 0 : i32
    return %c0_i32, %c0_i32_0 : i32, i32
  }
  func.func @transform_3(%arg0: i32) -> (i32, i32) {
    %c0_i32 = arith.constant 0 : i32
    %c0_i32_0 = arith.constant 0 : i32
    return %arg0, %c0_i32 : i32, i32
  }
}

module attributes {stable_mosaic.version = 11 : i64} {
  func.func @_ffn_block_kernel(%arg0: i32, %arg1: i32, %arg2: memref<16x32xbf16, #tpu.memory_space<vmem>>, %arg3: memref<1x32xf32, #tpu.memory_space<vmem>>, %arg4: memref<1x32xf32, #tpu.memory_space<vmem>>, %arg5: memref<32x64xbf16, #tpu.memory_space<vmem>>, %arg6: memref<1x64xf32, #tpu.memory_space<vmem>>, %arg7: memref<64x32xbf16, #tpu.memory_space<vmem>>, %arg8: memref<1x32xf32, #tpu.memory_space<vmem>>, %arg9: memref<16x32xbf16, #tpu.memory_space<vmem>>, %arg10: memref<16x32xf32, #tpu.memory_space<vmem>>, %arg11: memref<16x32xf32, #tpu.memory_space<vmem>>) attributes {dimension_semantics = [#tpu.dimension_semantics<parallel>, #tpu.dimension_semantics<arbitrary>], iteration_bounds = array<i64: 1, 1>, scalar_prefetch = 0 : i64, scratch_operands = 2 : i64, tpu.core_type = #tpu.core_type<tc>, window_params = [{transform_indices = @transform_0, window_bounds = array<i64: 16, 32>}, {pipeline_mode = #tpu.pipeline_mode<synchronous>, transform_indices = @transform_1, window_bounds = array<i64: 1, 32>}, {pipeline_mode = #tpu.pipeline_mode<synchronous>, transform_indices = @transform_2, window_bounds = array<i64: 1, 32>}, {transform_indices = @transform_3, window_bounds = array<i64: 32, 64>}, {transform_indices = @transform_4, window_bounds = array<i64: 1, 64>}, {transform_indices = @transform_5, window_bounds = array<i64: 64, 32>}, {pipeline_mode = #tpu.pipeline_mode<synchronous>, transform_indices = @transform_6, window_bounds = array<i64: 1, 32>}, {transform_indices = @transform_7, window_bounds = array<i64: 16, 32>}]} {
    %c0_i32 = arith.constant 0 : i32
    %0 = arith.cmpi eq, %arg1, %c0_i32 : i32
    %1 = arith.extui %0 : i1 to i32
    %c0_i32_0 = arith.constant 0 : i32
    %2 = arith.cmpi ne, %1, %c0_i32_0 : i32
    scf.if %2 {
      %c0_16 = arith.constant 0 : index
      %c0_17 = arith.constant 0 : index
      %21 = vector.load %arg2[%c0_16, %c0_17] : memref<16x32xbf16, #tpu.memory_space<vmem>>, vector<16x32xbf16>
      %22 = arith.extf %21 : vector<16x32xbf16> to vector<16x32xf32>
      %c0_18 = arith.constant 0 : index
      %c0_19 = arith.constant 0 : index
      %23 = vector.load %arg3[%c0_18, %c0_19] : memref<1x32xf32, #tpu.memory_space<vmem>>, vector<1x32xf32>
      %c0_20 = arith.constant 0 : index
      %c0_21 = arith.constant 0 : index
      %24 = vector.load %arg4[%c0_20, %c0_21] : memref<1x32xf32, #tpu.memory_space<vmem>>, vector<1x32xf32>
      %cst_22 = arith.constant dense<0.000000e+00> : vector<16xf32>
      %25 = vector.multi_reduction <add>, %22, %cst_22 [1] : vector<16x32xf32> to vector<16xf32>
      %26 = vector.shape_cast %25 : vector<16xf32> to vector<16x1xf32>
      %cst_23 = arith.constant 3.200000e+01 : f32
      %27 = vector.broadcast %cst_23 : f32 to vector<16x1xf32>
      %28 = arith.divf %26, %27 : vector<16x1xf32>
      %29 = vector.broadcast %28 : vector<16x1xf32> to vector<16x32xf32>
      %30 = arith.subf %22, %29 : vector<16x32xf32>
      %31 = arith.mulf %30, %30 : vector<16x32xf32>
      %cst_24 = arith.constant dense<0.000000e+00> : vector<16xf32>
      %32 = vector.multi_reduction <add>, %31, %cst_24 [1] : vector<16x32xf32> to vector<16xf32>
      %33 = vector.shape_cast %32 : vector<16xf32> to vector<16x1xf32>
      %cst_25 = arith.constant 3.200000e+01 : f32
      %34 = vector.broadcast %cst_25 : f32 to vector<16x1xf32>
      %35 = arith.divf %33, %34 : vector<16x1xf32>
      %36 = vector.broadcast %28 : vector<16x1xf32> to vector<16x32xf32>
      %37 = arith.subf %22, %36 : vector<16x32xf32>
      %cst_26 = arith.constant 9.99999974E-6 : f32
      %38 = vector.broadcast %cst_26 : f32 to vector<16x1xf32>
      %39 = arith.addf %35, %38 : vector<16x1xf32>
      %40 = math.rsqrt %39 : vector<16x1xf32>
      %41 = vector.broadcast %40 : vector<16x1xf32> to vector<16x32xf32>
      %42 = arith.mulf %37, %41 : vector<16x32xf32>
      %43 = vector.broadcast %23 : vector<1x32xf32> to vector<16x32xf32>
      %44 = arith.mulf %42, %43 : vector<16x32xf32>
      %45 = vector.broadcast %24 : vector<1x32xf32> to vector<16x32xf32>
      %46 = arith.addf %44, %45 : vector<16x32xf32>
      %c0_27 = arith.constant 0 : index
      %c0_28 = arith.constant 0 : index
      %47 = vector.load %arg10[%c0_27, %c0_28] : memref<16x32xf32, #tpu.memory_space<vmem>>, vector<16x32xf32>
      tpu.vector_store %arg10[%c0_27, %c0_28], %46 {strides = array<i32>} : memref<16x32xf32, #tpu.memory_space<vmem>>, vector<16x32xf32>,
      %cst_29 = arith.constant 0.000000e+00 : f32
      %48 = vector.broadcast %cst_29 : f32 to vector<16x32xf32>
      %c0_30 = arith.constant 0 : index
      %c0_31 = arith.constant 0 : index
      %49 = vector.load %arg11[%c0_30, %c0_31] : memref<16x32xf32, #tpu.memory_space<vmem>>, vector<16x32xf32>
      tpu.vector_store %arg11[%c0_30, %c0_31], %48 {strides = array<i32>} : memref<16x32xf32, #tpu.memory_space<vmem>>, vector<16x32xf32>,
    } else {
    }
    %c0 = arith.constant 0 : index
    %c0_1 = arith.constant 0 : index
    %3 = vector.load %arg10[%c0, %c0_1] : memref<16x32xf32, #tpu.memory_space<vmem>>, vector<16x32xf32>
    %c0_2 = arith.constant 0 : index
    %c0_3 = arith.constant 0 : index
    %4 = vector.load %arg5[%c0_2, %c0_3] : memref<32x64xbf16, #tpu.memory_space<vmem>>, vector<32x64xbf16>
    %5 = arith.truncf %3 : vector<16x32xf32> to vector<16x32xbf16>
    %cst = arith.constant dense<0.000000e+00> : vector<16x64xf32>
    %6 = tpu.matmul %5, %4, %cst {dimension_numbers = #tpu.dot_dimension_numbers<[1], [0], [0], [1], [0, 0, 1, 1], [], []>} : vector<16x32xbf16>, vector<32x64xbf16>, vector<16x64xf32> -> vector<16x64xf32>
    %c0_4 = arith.constant 0 : index
    %c0_5 = arith.constant 0 : index
    %7 = vector.load %arg6[%c0_4, %c0_5] : memref<1x64xf32, #tpu.memory_space<vmem>>, vector<1x64xf32>
    %8 = vector.broadcast %7 : vector<1x64xf32> to vector<16x64xf32>
    %9 = arith.addf %6, %8 : vector<16x64xf32>
    %cst_6 = arith.constant 0.000000e+00 : f32
    %10 = vector.broadcast %cst_6 : f32 to vector<16x64xf32>
    %11 = arith.maximumf %9, %10 : vector<16x64xf32>
    %c0_7 = arith.constant 0 : index
    %c0_8 = arith.constant 0 : index
    %12 = vector.load %arg11[%c0_7, %c0_8] : memref<16x32xf32, #tpu.memory_space<vmem>>, vector<16x32xf32>
    %c0_9 = arith.constant 0 : index
    %c0_10 = arith.constant 0 : index
    %13 = vector.load %arg7[%c0_9, %c0_10] : memref<64x32xbf16, #tpu.memory_space<vmem>>, vector<64x32xbf16>
    %14 = arith.truncf %11 : vector<16x64xf32> to vector<16x64xbf16>
    %cst_11 = arith.constant dense<0.000000e+00> : vector<16x32xf32>
    %15 = tpu.matmul %14, %13, %cst_11 {dimension_numbers = #tpu.dot_dimension_numbers<[1], [0], [0], [1], [0, 0, 1, 1], [], []>} : vector<16x64xbf16>, vector<64x32xbf16>, vector<16x32xf32> -> vector<16x32xf32>
    %16 = arith.addf %12, %15 : vector<16x32xf32>
    %c0_12 = arith.constant 0 : index
    %c0_13 = arith.constant 0 : index
    %17 = vector.load %arg11[%c0_12, %c0_13] : memref<16x32xf32, #tpu.memory_space<vmem>>, vector<16x32xf32>
    tpu.vector_store %arg11[%c0_12, %c0_13], %16 {strides = array<i32>} : memref<16x32xf32, #tpu.memory_space<vmem>>, vector<16x32xf32>,
    %c0_i32_14 = arith.constant 0 : i32
    %18 = arith.cmpi eq, %arg1, %c0_i32_14 : i32
    %19 = arith.extui %18 : i1 to i32
    %c0_i32_15 = arith.constant 0 : i32
    %20 = arith.cmpi ne, %19, %c0_i32_15 : i32
    scf.if %20 {
      %c0_16 = arith.constant 0 : index
      %c0_17 = arith.constant 0 : index
      %21 = vector.load %arg2[%c0_16, %c0_17] : memref<16x32xbf16, #tpu.memory_space<vmem>>, vector<16x32xbf16>
      %22 = arith.extf %21 : vector<16x32xbf16> to vector<16x32xf32>
      %c0_18 = arith.constant 0 : index
      %c0_19 = arith.constant 0 : index
      %23 = vector.load %arg11[%c0_18, %c0_19] : memref<16x32xf32, #tpu.memory_space<vmem>>, vector<16x32xf32>
      %24 = arith.addf %22, %23 : vector<16x32xf32>
      %c0_20 = arith.constant 0 : index
      %c0_21 = arith.constant 0 : index
      %25 = vector.load %arg8[%c0_20, %c0_21] : memref<1x32xf32, #tpu.memory_space<vmem>>, vector<1x32xf32>
      %26 = vector.broadcast %25 : vector<1x32xf32> to vector<16x32xf32>
      %27 = arith.addf %24, %26 : vector<16x32xf32>
      %28 = arith.truncf %27 : vector<16x32xf32> to vector<16x32xbf16>
      %c0_22 = arith.constant 0 : index
      %c0_23 = arith.constant 0 : index
      %29 = vector.load %arg9[%c0_22, %c0_23] : memref<16x32xbf16, #tpu.memory_space<vmem>>, vector<16x32xbf16>
      tpu.vector_store %arg9[%c0_22, %c0_23], %28 {strides = array<i32>} : memref<16x32xbf16, #tpu.memory_space<vmem>>, vector<16x32xbf16>,
    } else {
    }
    return
  }
  func.func @transform_0(%arg0: i32, %arg1: i32) -> (i32, i32) {
    %c0_i32 = arith.constant 0 : i32
    %c0_i32_0 = arith.constant 0 : i32
    return %arg0, %c0_i32 : i32, i32
  }
  func.func @transform_1(%arg0: i32, %arg1: i32) -> (i32, i32) {
    %c0_i32 = arith.constant 0 : i32
    %c0_i32_0 = arith.constant 0 : i32
    %c0_i32_1 = arith.constant 0 : i32
    return %c0_i32, %c0_i32_0 : i32, i32
  }
  func.func @transform_2(%arg0: i32, %arg1: i32) -> (i32, i32) {
    %c0_i32 = arith.constant 0 : i32
    %c0_i32_0 = arith.constant 0 : i32
    %c0_i32_1 = arith.constant 0 : i32
    return %c0_i32, %c0_i32_0 : i32, i32
  }
  func.func @transform_3(%arg0: i32, %arg1: i32) -> (i32, i32) {
    %c0_i32 = arith.constant 0 : i32
    %c0_i32_0 = arith.constant 0 : i32
    return %c0_i32, %arg1 : i32, i32
  }
  func.func @transform_4(%arg0: i32, %arg1: i32) -> (i32, i32) {
    %c0_i32 = arith.constant 0 : i32
    %c0_i32_0 = arith.constant 0 : i32
    return %c0_i32, %arg1 : i32, i32
  }
  func.func @transform_5(%arg0: i32, %arg1: i32) -> (i32, i32) {
    %c0_i32 = arith.constant 0 : i32
    %c0_i32_0 = arith.constant 0 : i32
    return %arg1, %c0_i32 : i32, i32
  }
  func.func @transform_6(%arg0: i32, %arg1: i32) -> (i32, i32) {
    %c0_i32 = arith.constant 0 : i32
    %c0_i32_0 = arith.constant 0 : i32
    %c0_i32_1 = arith.constant 0 : i32
    return %c0_i32, %c0_i32_0 : i32, i32
  }
  func.func @transform_7(%arg0: i32, %arg1: i32) -> (i32, i32) {
    %c0_i32 = arith.constant 0 : i32
    %c0_i32_0 = arith.constant 0 : i32
    return %arg0, %c0_i32 : i32, i32
  }
}

module attributes {stable_mosaic.version = 11 : i64} {
  func.func @_attn_block_kernel(%arg0: i32, %arg1: memref<1x8x32xbf16, #tpu.memory_space<vmem>>, %arg2: memref<1x1x8xf32, #tpu.memory_space<vmem>>, %arg3: memref<1x32xf32, #tpu.memory_space<vmem>>, %arg4: memref<1x32xf32, #tpu.memory_space<vmem>>, %arg5: memref<4x32x8xbf16, #tpu.memory_space<vmem>>, %arg6: memref<4x1x8xf32, #tpu.memory_space<vmem>>, %arg7: memref<4x32x8xbf16, #tpu.memory_space<vmem>>, %arg8: memref<4x1x8xf32, #tpu.memory_space<vmem>>, %arg9: memref<4x32x8xbf16, #tpu.memory_space<vmem>>, %arg10: memref<4x1x8xf32, #tpu.memory_space<vmem>>, %arg11: memref<32x32xbf16, #tpu.memory_space<vmem>>, %arg12: memref<1x32xf32, #tpu.memory_space<vmem>>, %arg13: memref<1x8x32xbf16, #tpu.memory_space<vmem>>, %arg14: memref<8x32xf32, #tpu.memory_space<vmem>>) attributes {dimension_semantics = [#tpu.dimension_semantics<parallel>], iteration_bounds = array<i64: 2>, scalar_prefetch = 0 : i64, scratch_operands = 1 : i64, tpu.core_type = #tpu.core_type<tc>, window_params = [{transform_indices = @transform_0, window_bounds = array<i64: 1, 8, 32>}, {transform_indices = @transform_1, window_bounds = array<i64: 1, 1, 8>}, {pipeline_mode = #tpu.pipeline_mode<synchronous>, transform_indices = @transform_2, window_bounds = array<i64: 1, 32>}, {pipeline_mode = #tpu.pipeline_mode<synchronous>, transform_indices = @transform_3, window_bounds = array<i64: 1, 32>}, {pipeline_mode = #tpu.pipeline_mode<synchronous>, transform_indices = @transform_4, window_bounds = array<i64: 4, 32, 8>}, {pipeline_mode = #tpu.pipeline_mode<synchronous>, transform_indices = @transform_5, window_bounds = array<i64: 4, 1, 8>}, {pipeline_mode = #tpu.pipeline_mode<synchronous>, transform_indices = @transform_6, window_bounds = array<i64: 4, 32, 8>}, {pipeline_mode = #tpu.pipeline_mode<synchronous>, transform_indices = @transform_7, window_bounds = array<i64: 4, 1, 8>}, {pipeline_mode = #tpu.pipeline_mode<synchronous>, transform_indices = @transform_8, window_bounds = array<i64: 4, 32, 8>}, {pipeline_mode = #tpu.pipeline_mode<synchronous>, transform_indices = @transform_9, window_bounds = array<i64: 4, 1, 8>}, {pipeline_mode = #tpu.pipeline_mode<synchronous>, transform_indices = @transform_10, window_bounds = array<i64: 32, 32>}, {pipeline_mode = #tpu.pipeline_mode<synchronous>, transform_indices = @transform_11, window_bounds = array<i64: 1, 32>}, {transform_indices = @transform_12, window_bounds = array<i64: 1, 8, 32>}]} {
    %c0 = arith.constant 0 : index
    %c0_0 = arith.constant 0 : index
    %c0_1 = arith.constant 0 : index
    %0 = vector.load %arg1[%c0, %c0_0, %c0_1] : memref<1x8x32xbf16, #tpu.memory_space<vmem>>, vector<1x8x32xbf16>
    %1 = vector.shape_cast %0 : vector<1x8x32xbf16> to vector<8x32xbf16>
    %2 = arith.extf %1 : vector<8x32xbf16> to vector<8x32xf32>
    %c0_2 = arith.constant 0 : index
    %c0_3 = arith.constant 0 : index
    %3 = vector.load %arg3[%c0_2, %c0_3] : memref<1x32xf32, #tpu.memory_space<vmem>>, vector<1x32xf32>
    %c0_4 = arith.constant 0 : index
    %c0_5 = arith.constant 0 : index
    %4 = vector.load %arg4[%c0_4, %c0_5] : memref<1x32xf32, #tpu.memory_space<vmem>>, vector<1x32xf32>
    %cst = arith.constant dense<0.000000e+00> : vector<8xf32>
    %5 = vector.multi_reduction <add>, %2, %cst [1] : vector<8x32xf32> to vector<8xf32>
    %6 = vector.shape_cast %5 : vector<8xf32> to vector<8x1xf32>
    %cst_6 = arith.constant 3.200000e+01 : f32
    %7 = vector.broadcast %cst_6 : f32 to vector<8x1xf32>
    %8 = arith.divf %6, %7 : vector<8x1xf32>
    %9 = vector.broadcast %8 : vector<8x1xf32> to vector<8x32xf32>
    %10 = arith.subf %2, %9 : vector<8x32xf32>
    %11 = arith.mulf %10, %10 : vector<8x32xf32>
    %cst_7 = arith.constant dense<0.000000e+00> : vector<8xf32>
    %12 = vector.multi_reduction <add>, %11, %cst_7 [1] : vector<8x32xf32> to vector<8xf32>
    %13 = vector.shape_cast %12 : vector<8xf32> to vector<8x1xf32>
    %cst_8 = arith.constant 3.200000e+01 : f32
    %14 = vector.broadcast %cst_8 : f32 to vector<8x1xf32>
    %15 = arith.divf %13, %14 : vector<8x1xf32>
    %16 = vector.broadcast %8 : vector<8x1xf32> to vector<8x32xf32>
    %17 = arith.subf %2, %16 : vector<8x32xf32>
    %cst_9 = arith.constant 9.99999974E-6 : f32
    %18 = vector.broadcast %cst_9 : f32 to vector<8x1xf32>
    %19 = arith.addf %15, %18 : vector<8x1xf32>
    %20 = math.rsqrt %19 : vector<8x1xf32>
    %21 = vector.broadcast %20 : vector<8x1xf32> to vector<8x32xf32>
    %22 = arith.mulf %17, %21 : vector<8x32xf32>
    %23 = vector.broadcast %3 : vector<1x32xf32> to vector<8x32xf32>
    %24 = arith.mulf %22, %23 : vector<8x32xf32>
    %25 = vector.broadcast %4 : vector<1x32xf32> to vector<8x32xf32>
    %26 = arith.addf %24, %25 : vector<8x32xf32>
    %c0_10 = arith.constant 0 : index
    %c0_11 = arith.constant 0 : index
    %c0_12 = arith.constant 0 : index
    %27 = vector.load %arg2[%c0_10, %c0_11, %c0_12] : memref<1x1x8xf32, #tpu.memory_space<vmem>>, vector<1x1x8xf32>
    %28 = vector.shape_cast %27 : vector<1x1x8xf32> to vector<1x8xf32>
    %c0_13 = arith.constant 0 : index
    %c0_14 = arith.constant 0 : index
    %c0_15 = arith.constant 0 : index
    %29 = vector.load %arg5[%c0_13, %c0_14, %c0_15] : memref<4x32x8xbf16, #tpu.memory_space<vmem>>, vector<1x32x8xbf16>
    %30 = vector.shape_cast %29 : vector<1x32x8xbf16> to vector<32x8xbf16>
    %31 = arith.truncf %26 : vector<8x32xf32> to vector<8x32xbf16>
    %cst_16 = arith.constant dense<0.000000e+00> : vector<8x8xf32>
    %32 = tpu.matmul %31, %30, %cst_16 {dimension_numbers = #tpu.dot_dimension_numbers<[1], [0], [0], [1], [0, 0, 1, 1], [], []>} : vector<8x32xbf16>, vector<32x8xbf16>, vector<8x8xf32> -> vector<8x8xf32>
    %c0_17 = arith.constant 0 : index
    %c0_18 = arith.constant 0 : index
    %c0_19 = arith.constant 0 : index
    %33 = vector.load %arg6[%c0_17, %c0_18, %c0_19] : memref<4x1x8xf32, #tpu.memory_space<vmem>>, vector<1x1x8xf32>
    %34 = vector.shape_cast %33 : vector<1x1x8xf32> to vector<1x8xf32>
    %35 = vector.broadcast %34 : vector<1x8xf32> to vector<8x8xf32>
    %36 = arith.addf %32, %35 : vector<8x8xf32>
    %c0_20 = arith.constant 0 : index
    %c0_21 = arith.constant 0 : index
    %c0_22 = arith.constant 0 : index
    %37 = vector.load %arg7[%c0_20, %c0_21, %c0_22] : memref<4x32x8xbf16, #tpu.memory_space<vmem>>, vector<1x32x8xbf16>
    %38 = vector.shape_cast %37 : vector<1x32x8xbf16> to vector<32x8xbf16>
    %39 = arith.truncf %26 : vector<8x32xf32> to vector<8x32xbf16>
    %cst_23 = arith.constant dense<0.000000e+00> : vector<8x8xf32>
    %40 = tpu.matmul %39, %38, %cst_23 {dimension_numbers = #tpu.dot_dimension_numbers<[1], [0], [0], [1], [0, 0, 1, 1], [], []>} : vector<8x32xbf16>, vector<32x8xbf16>, vector<8x8xf32> -> vector<8x8xf32>
    %c0_24 = arith.constant 0 : index
    %c0_25 = arith.constant 0 : index
    %c0_26 = arith.constant 0 : index
    %41 = vector.load %arg8[%c0_24, %c0_25, %c0_26] : memref<4x1x8xf32, #tpu.memory_space<vmem>>, vector<1x1x8xf32>
    %42 = vector.shape_cast %41 : vector<1x1x8xf32> to vector<1x8xf32>
    %43 = vector.broadcast %42 : vector<1x8xf32> to vector<8x8xf32>
    %44 = arith.addf %40, %43 : vector<8x8xf32>
    %c0_27 = arith.constant 0 : index
    %c0_28 = arith.constant 0 : index
    %c0_29 = arith.constant 0 : index
    %45 = vector.load %arg9[%c0_27, %c0_28, %c0_29] : memref<4x32x8xbf16, #tpu.memory_space<vmem>>, vector<1x32x8xbf16>
    %46 = vector.shape_cast %45 : vector<1x32x8xbf16> to vector<32x8xbf16>
    %47 = arith.truncf %26 : vector<8x32xf32> to vector<8x32xbf16>
    %cst_30 = arith.constant dense<0.000000e+00> : vector<8x8xf32>
    %48 = tpu.matmul %47, %46, %cst_30 {dimension_numbers = #tpu.dot_dimension_numbers<[1], [0], [0], [1], [0, 0, 1, 1], [], []>} : vector<8x32xbf16>, vector<32x8xbf16>, vector<8x8xf32> -> vector<8x8xf32>
    %c0_31 = arith.constant 0 : index
    %c0_32 = arith.constant 0 : index
    %c0_33 = arith.constant 0 : index
    %49 = vector.load %arg10[%c0_31, %c0_32, %c0_33] : memref<4x1x8xf32, #tpu.memory_space<vmem>>, vector<1x1x8xf32>
    %50 = vector.shape_cast %49 : vector<1x1x8xf32> to vector<1x8xf32>
    %51 = vector.broadcast %50 : vector<1x8xf32> to vector<8x8xf32>
    %52 = arith.addf %48, %51 : vector<8x8xf32>
    %53 = arith.truncf %36 : vector<8x8xf32> to vector<8x8xbf16>
    %54 = arith.truncf %44 : vector<8x8xf32> to vector<8x8xbf16>
    %cst_34 = arith.constant dense<0.000000e+00> : vector<8x8xf32>
    %55 = tpu.matmul %53, %54, %cst_34 {dimension_numbers = #tpu.dot_dimension_numbers<[1], [1], [0], [0], [0, 0, 1, 0], [], []>} : vector<8x8xbf16>, vector<8x8xbf16>, vector<8x8xf32> -> vector<8x8xf32>
    %cst_35 = arith.constant 0.353553385 : f32
    %56 = vector.broadcast %cst_35 : f32 to vector<8x8xf32>
    %57 = arith.mulf %55, %56 : vector<8x8xf32>
    %58 = vector.broadcast %28 : vector<1x8xf32> to vector<8x8xf32>
    %59 = arith.addf %57, %58 : vector<8x8xf32>
    %cst_36 = arith.constant dense<0xFF800000> : vector<8xf32>
    %60 = vector.multi_reduction <maximumf>, %59, %cst_36 [1] : vector<8x8xf32> to vector<8xf32>
    %61 = vector.shape_cast %60 : vector<8xf32> to vector<8x1xf32>
    %62 = vector.broadcast %61 : vector<8x1xf32> to vector<8x8xf32>
    %63 = arith.subf %59, %62 : vector<8x8xf32>
    %64 = math.exp %63 : vector<8x8xf32>
    %cst_37 = arith.constant dense<0.000000e+00> : vector<8xf32>
    %65 = vector.multi_reduction <add>, %64, %cst_37 [1] : vector<8x8xf32> to vector<8xf32>
    %66 = vector.shape_cast %65 : vector<8xf32> to vector<8x1xf32>
    %67 = tpu.reciprocal %66 {approx = true} : vector<8x1xf32> -> vector<8x1xf32>
    %68 = vector.broadcast %67 : vector<8x1xf32> to vector<8x8xf32>
    %69 = arith.mulf %64, %68 : vector<8x8xf32>
    %70 = arith.truncf %69 : vector<8x8xf32> to vector<8x8xbf16>
    %71 = arith.truncf %52 : vector<8x8xf32> to vector<8x8xbf16>
    %cst_38 = arith.constant dense<0.000000e+00> : vector<8x8xf32>
    %72 = tpu.matmul %70, %71, %cst_38 {dimension_numbers = #tpu.dot_dimension_numbers<[1], [0], [0], [1], [0, 0, 1, 1], [], []>} : vector<8x8xbf16>, vector<8x8xbf16>, vector<8x8xf32> -> vector<8x8xf32>
    %c0_39 = arith.constant 0 : index
    %c0_40 = arith.constant 0 : index
    %73 = vector.load %arg14[%c0_39, %c0_40] : memref<8x32xf32, #tpu.memory_space<vmem>>, vector<8x8xf32>
    tpu.vector_store %arg14[%c0_39, %c0_40], %72 {strides = array<i32>} : memref<8x32xf32, #tpu.memory_space<vmem>>, vector<8x8xf32>,
    %c1 = arith.constant 1 : index
    %c0_41 = arith.constant 0 : index
    %c0_42 = arith.constant 0 : index
    %74 = vector.load %arg5[%c1, %c0_41, %c0_42] : memref<4x32x8xbf16, #tpu.memory_space<vmem>>, vector<1x32x8xbf16>
    %75 = vector.shape_cast %74 : vector<1x32x8xbf16> to vector<32x8xbf16>
    %76 = arith.truncf %26 : vector<8x32xf32> to vector<8x32xbf16>
    %cst_43 = arith.constant dense<0.000000e+00> : vector<8x8xf32>
    %77 = tpu.matmul %76, %75, %cst_43 {dimension_numbers = #tpu.dot_dimension_numbers<[1], [0], [0], [1], [0, 0, 1, 1], [], []>} : vector<8x32xbf16>, vector<32x8xbf16>, vector<8x8xf32> -> vector<8x8xf32>
    %c1_44 = arith.constant 1 : index
    %c0_45 = arith.constant 0 : index
    %c0_46 = arith.constant 0 : index
    %78 = vector.load %arg6[%c1_44, %c0_45, %c0_46] : memref<4x1x8xf32, #tpu.memory_space<vmem>>, vector<1x1x8xf32>
    %79 = vector.shape_cast %78 : vector<1x1x8xf32> to vector<1x8xf32>
    %80 = vector.broadcast %79 : vector<1x8xf32> to vector<8x8xf32>
    %81 = arith.addf %77, %80 : vector<8x8xf32>
    %c1_47 = arith.constant 1 : index
    %c0_48 = arith.constant 0 : index
    %c0_49 = arith.constant 0 : index
    %82 = vector.load %arg7[%c1_47, %c0_48, %c0_49] : memref<4x32x8xbf16, #tpu.memory_space<vmem>>, vector<1x32x8xbf16>
    %83 = vector.shape_cast %82 : vector<1x32x8xbf16> to vector<32x8xbf16>
    %84 = arith.truncf %26 : vector<8x32xf32> to vector<8x32xbf16>
    %cst_50 = arith.constant dense<0.000000e+00> : vector<8x8xf32>
    %85 = tpu.matmul %84, %83, %cst_50 {dimension_numbers = #tpu.dot_dimension_numbers<[1], [0], [0], [1], [0, 0, 1, 1], [], []>} : vector<8x32xbf16>, vector<32x8xbf16>, vector<8x8xf32> -> vector<8x8xf32>
    %c1_51 = arith.constant 1 : index
    %c0_52 = arith.constant 0 : index
    %c0_53 = arith.constant 0 : index
    %86 = vector.load %arg8[%c1_51, %c0_52, %c0_53] : memref<4x1x8xf32, #tpu.memory_space<vmem>>, vector<1x1x8xf32>
    %87 = vector.shape_cast %86 : vector<1x1x8xf32> to vector<1x8xf32>
    %88 = vector.broadcast %87 : vector<1x8xf32> to vector<8x8xf32>
    %89 = arith.addf %85, %88 : vector<8x8xf32>
    %c1_54 = arith.constant 1 : index
    %c0_55 = arith.constant 0 : index
    %c0_56 = arith.constant 0 : index
    %90 = vector.load %arg9[%c1_54, %c0_55, %c0_56] : memref<4x32x8xbf16, #tpu.memory_space<vmem>>, vector<1x32x8xbf16>
    %91 = vector.shape_cast %90 : vector<1x32x8xbf16> to vector<32x8xbf16>
    %92 = arith.truncf %26 : vector<8x32xf32> to vector<8x32xbf16>
    %cst_57 = arith.constant dense<0.000000e+00> : vector<8x8xf32>
    %93 = tpu.matmul %92, %91, %cst_57 {dimension_numbers = #tpu.dot_dimension_numbers<[1], [0], [0], [1], [0, 0, 1, 1], [], []>} : vector<8x32xbf16>, vector<32x8xbf16>, vector<8x8xf32> -> vector<8x8xf32>
    %c1_58 = arith.constant 1 : index
    %c0_59 = arith.constant 0 : index
    %c0_60 = arith.constant 0 : index
    %94 = vector.load %arg10[%c1_58, %c0_59, %c0_60] : memref<4x1x8xf32, #tpu.memory_space<vmem>>, vector<1x1x8xf32>
    %95 = vector.shape_cast %94 : vector<1x1x8xf32> to vector<1x8xf32>
    %96 = vector.broadcast %95 : vector<1x8xf32> to vector<8x8xf32>
    %97 = arith.addf %93, %96 : vector<8x8xf32>
    %98 = arith.truncf %81 : vector<8x8xf32> to vector<8x8xbf16>
    %99 = arith.truncf %89 : vector<8x8xf32> to vector<8x8xbf16>
    %cst_61 = arith.constant dense<0.000000e+00> : vector<8x8xf32>
    %100 = tpu.matmul %98, %99, %cst_61 {dimension_numbers = #tpu.dot_dimension_numbers<[1], [1], [0], [0], [0, 0, 1, 0], [], []>} : vector<8x8xbf16>, vector<8x8xbf16>, vector<8x8xf32> -> vector<8x8xf32>
    %cst_62 = arith.constant 0.353553385 : f32
    %101 = vector.broadcast %cst_62 : f32 to vector<8x8xf32>
    %102 = arith.mulf %100, %101 : vector<8x8xf32>
    %103 = vector.broadcast %28 : vector<1x8xf32> to vector<8x8xf32>
    %104 = arith.addf %102, %103 : vector<8x8xf32>
    %cst_63 = arith.constant dense<0xFF800000> : vector<8xf32>
    %105 = vector.multi_reduction <maximumf>, %104, %cst_63 [1] : vector<8x8xf32> to vector<8xf32>
    %106 = vector.shape_cast %105 : vector<8xf32> to vector<8x1xf32>
    %107 = vector.broadcast %106 : vector<8x1xf32> to vector<8x8xf32>
    %108 = arith.subf %104, %107 : vector<8x8xf32>
    %109 = math.exp %108 : vector<8x8xf32>
    %cst_64 = arith.constant dense<0.000000e+00> : vector<8xf32>
    %110 = vector.multi_reduction <add>, %109, %cst_64 [1] : vector<8x8xf32> to vector<8xf32>
    %111 = vector.shape_cast %110 : vector<8xf32> to vector<8x1xf32>
    %112 = tpu.reciprocal %111 {approx = true} : vector<8x1xf32> -> vector<8x1xf32>
    %113 = vector.broadcast %112 : vector<8x1xf32> to vector<8x8xf32>
    %114 = arith.mulf %109, %113 : vector<8x8xf32>
    %115 = arith.truncf %114 : vector<8x8xf32> to vector<8x8xbf16>
    %116 = arith.truncf %97 : vector<8x8xf32> to vector<8x8xbf16>
    %cst_65 = arith.constant dense<0.000000e+00> : vector<8x8xf32>
    %117 = tpu.matmul %115, %116, %cst_65 {dimension_numbers = #tpu.dot_dimension_numbers<[1], [0], [0], [1], [0, 0, 1, 1], [], []>} : vector<8x8xbf16>, vector<8x8xbf16>, vector<8x8xf32> -> vector<8x8xf32>
    %c0_66 = arith.constant 0 : index
    %c8 = arith.constant 8 : index
    %118 = vector.load %arg14[%c0_66, %c8] : memref<8x32xf32, #tpu.memory_space<vmem>>, vector<8x8xf32>
    tpu.vector_store %arg14[%c0_66, %c8], %117 {strides = array<i32>} : memref<8x32xf32, #tpu.memory_space<vmem>>, vector<8x8xf32>,
    %c2 = arith.constant 2 : index
    %c0_67 = arith.constant 0 : index
    %c0_68 = arith.constant 0 : index
    %119 = vector.load %arg5[%c2, %c0_67, %c0_68] : memref<4x32x8xbf16, #tpu.memory_space<vmem>>, vector<1x32x8xbf16>
    %120 = vector.shape_cast %119 : vector<1x32x8xbf16> to vector<32x8xbf16>
    %121 = arith.truncf %26 : vector<8x32xf32> to vector<8x32xbf16>
    %cst_69 = arith.constant dense<0.000000e+00> : vector<8x8xf32>
    %122 = tpu.matmul %121, %120, %cst_69 {dimension_numbers = #tpu.dot_dimension_numbers<[1], [0], [0], [1], [0, 0, 1, 1], [], []>} : vector<8x32xbf16>, vector<32x8xbf16>, vector<8x8xf32> -> vector<8x8xf32>
    %c2_70 = arith.constant 2 : index
    %c0_71 = arith.constant 0 : index
    %c0_72 = arith.constant 0 : index
    %123 = vector.load %arg6[%c2_70, %c0_71, %c0_72] : memref<4x1x8xf32, #tpu.memory_space<vmem>>, vector<1x1x8xf32>
    %124 = vector.shape_cast %123 : vector<1x1x8xf32> to vector<1x8xf32>
    %125 = vector.broadcast %124 : vector<1x8xf32> to vector<8x8xf32>
    %126 = arith.addf %122, %125 : vector<8x8xf32>
    %c2_73 = arith.constant 2 : index
    %c0_74 = arith.constant 0 : index
    %c0_75 = arith.constant 0 : index
    %127 = vector.load %arg7[%c2_73, %c0_74, %c0_75] : memref<4x32x8xbf16, #tpu.memory_space<vmem>>, vector<1x32x8xbf16>
    %128 = vector.shape_cast %127 : vector<1x32x8xbf16> to vector<32x8xbf16>
    %129 = arith.truncf %26 : vector<8x32xf32> to vector<8x32xbf16>
    %cst_76 = arith.constant dense<0.000000e+00> : vector<8x8xf32>
    %130 = tpu.matmul %129, %128, %cst_76 {dimension_numbers = #tpu.dot_dimension_numbers<[1], [0], [0], [1], [0, 0, 1, 1], [], []>} : vector<8x32xbf16>, vector<32x8xbf16>, vector<8x8xf32> -> vector<8x8xf32>
    %c2_77 = arith.constant 2 : index
    %c0_78 = arith.constant 0 : index
    %c0_79 = arith.constant 0 : index
    %131 = vector.load %arg8[%c2_77, %c0_78, %c0_79] : memref<4x1x8xf32, #tpu.memory_space<vmem>>, vector<1x1x8xf32>
    %132 = vector.shape_cast %131 : vector<1x1x8xf32> to vector<1x8xf32>
    %133 = vector.broadcast %132 : vector<1x8xf32> to vector<8x8xf32>
    %134 = arith.addf %130, %133 : vector<8x8xf32>
    %c2_80 = arith.constant 2 : index
    %c0_81 = arith.constant 0 : index
    %c0_82 = arith.constant 0 : index
    %135 = vector.load %arg9[%c2_80, %c0_81, %c0_82] : memref<4x32x8xbf16, #tpu.memory_space<vmem>>, vector<1x32x8xbf16>
    %136 = vector.shape_cast %135 : vector<1x32x8xbf16> to vector<32x8xbf16>
    %137 = arith.truncf %26 : vector<8x32xf32> to vector<8x32xbf16>
    %cst_83 = arith.constant dense<0.000000e+00> : vector<8x8xf32>
    %138 = tpu.matmul %137, %136, %cst_83 {dimension_numbers = #tpu.dot_dimension_numbers<[1], [0], [0], [1], [0, 0, 1, 1], [], []>} : vector<8x32xbf16>, vector<32x8xbf16>, vector<8x8xf32> -> vector<8x8xf32>
    %c2_84 = arith.constant 2 : index
    %c0_85 = arith.constant 0 : index
    %c0_86 = arith.constant 0 : index
    %139 = vector.load %arg10[%c2_84, %c0_85, %c0_86] : memref<4x1x8xf32, #tpu.memory_space<vmem>>, vector<1x1x8xf32>
    %140 = vector.shape_cast %139 : vector<1x1x8xf32> to vector<1x8xf32>
    %141 = vector.broadcast %140 : vector<1x8xf32> to vector<8x8xf32>
    %142 = arith.addf %138, %141 : vector<8x8xf32>
    %143 = arith.truncf %126 : vector<8x8xf32> to vector<8x8xbf16>
    %144 = arith.truncf %134 : vector<8x8xf32> to vector<8x8xbf16>
    %cst_87 = arith.constant dense<0.000000e+00> : vector<8x8xf32>
    %145 = tpu.matmul %143, %144, %cst_87 {dimension_numbers = #tpu.dot_dimension_numbers<[1], [1], [0], [0], [0, 0, 1, 0], [], []>} : vector<8x8xbf16>, vector<8x8xbf16>, vector<8x8xf32> -> vector<8x8xf32>
    %cst_88 = arith.constant 0.353553385 : f32
    %146 = vector.broadcast %cst_88 : f32 to vector<8x8xf32>
    %147 = arith.mulf %145, %146 : vector<8x8xf32>
    %148 = vector.broadcast %28 : vector<1x8xf32> to vector<8x8xf32>
    %149 = arith.addf %147, %148 : vector<8x8xf32>
    %cst_89 = arith.constant dense<0xFF800000> : vector<8xf32>
    %150 = vector.multi_reduction <maximumf>, %149, %cst_89 [1] : vector<8x8xf32> to vector<8xf32>
    %151 = vector.shape_cast %150 : vector<8xf32> to vector<8x1xf32>
    %152 = vector.broadcast %151 : vector<8x1xf32> to vector<8x8xf32>
    %153 = arith.subf %149, %152 : vector<8x8xf32>
    %154 = math.exp %153 : vector<8x8xf32>
    %cst_90 = arith.constant dense<0.000000e+00> : vector<8xf32>
    %155 = vector.multi_reduction <add>, %154, %cst_90 [1] : vector<8x8xf32> to vector<8xf32>
    %156 = vector.shape_cast %155 : vector<8xf32> to vector<8x1xf32>
    %157 = tpu.reciprocal %156 {approx = true} : vector<8x1xf32> -> vector<8x1xf32>
    %158 = vector.broadcast %157 : vector<8x1xf32> to vector<8x8xf32>
    %159 = arith.mulf %154, %158 : vector<8x8xf32>
    %160 = arith.truncf %159 : vector<8x8xf32> to vector<8x8xbf16>
    %161 = arith.truncf %142 : vector<8x8xf32> to vector<8x8xbf16>
    %cst_91 = arith.constant dense<0.000000e+00> : vector<8x8xf32>
    %162 = tpu.matmul %160, %161, %cst_91 {dimension_numbers = #tpu.dot_dimension_numbers<[1], [0], [0], [1], [0, 0, 1, 1], [], []>} : vector<8x8xbf16>, vector<8x8xbf16>, vector<8x8xf32> -> vector<8x8xf32>
    %c0_92 = arith.constant 0 : index
    %c16 = arith.constant 16 : index
    %163 = vector.load %arg14[%c0_92, %c16] : memref<8x32xf32, #tpu.memory_space<vmem>>, vector<8x8xf32>
    tpu.vector_store %arg14[%c0_92, %c16], %162 {strides = array<i32>} : memref<8x32xf32, #tpu.memory_space<vmem>>, vector<8x8xf32>,
    %c3 = arith.constant 3 : index
    %c0_93 = arith.constant 0 : index
    %c0_94 = arith.constant 0 : index
    %164 = vector.load %arg5[%c3, %c0_93, %c0_94] : memref<4x32x8xbf16, #tpu.memory_space<vmem>>, vector<1x32x8xbf16>
    %165 = vector.shape_cast %164 : vector<1x32x8xbf16> to vector<32x8xbf16>
    %166 = arith.truncf %26 : vector<8x32xf32> to vector<8x32xbf16>
    %cst_95 = arith.constant dense<0.000000e+00> : vector<8x8xf32>
    %167 = tpu.matmul %166, %165, %cst_95 {dimension_numbers = #tpu.dot_dimension_numbers<[1], [0], [0], [1], [0, 0, 1, 1], [], []>} : vector<8x32xbf16>, vector<32x8xbf16>, vector<8x8xf32> -> vector<8x8xf32>
    %c3_96 = arith.constant 3 : index
    %c0_97 = arith.constant 0 : index
    %c0_98 = arith.constant 0 : index
    %168 = vector.load %arg6[%c3_96, %c0_97, %c0_98] : memref<4x1x8xf32, #tpu.memory_space<vmem>>, vector<1x1x8xf32>
    %169 = vector.shape_cast %168 : vector<1x1x8xf32> to vector<1x8xf32>
    %170 = vector.broadcast %169 : vector<1x8xf32> to vector<8x8xf32>
    %171 = arith.addf %167, %170 : vector<8x8xf32>
    %c3_99 = arith.constant 3 : index
    %c0_100 = arith.constant 0 : index
    %c0_101 = arith.constant 0 : index
    %172 = vector.load %arg7[%c3_99, %c0_100, %c0_101] : memref<4x32x8xbf16, #tpu.memory_space<vmem>>, vector<1x32x8xbf16>
    %173 = vector.shape_cast %172 : vector<1x32x8xbf16> to vector<32x8xbf16>
    %174 = arith.truncf %26 : vector<8x32xf32> to vector<8x32xbf16>
    %cst_102 = arith.constant dense<0.000000e+00> : vector<8x8xf32>
    %175 = tpu.matmul %174, %173, %cst_102 {dimension_numbers = #tpu.dot_dimension_numbers<[1], [0], [0], [1], [0, 0, 1, 1], [], []>} : vector<8x32xbf16>, vector<32x8xbf16>, vector<8x8xf32> -> vector<8x8xf32>
    %c3_103 = arith.constant 3 : index
    %c0_104 = arith.constant 0 : index
    %c0_105 = arith.constant 0 : index
    %176 = vector.load %arg8[%c3_103, %c0_104, %c0_105] : memref<4x1x8xf32, #tpu.memory_space<vmem>>, vector<1x1x8xf32>
    %177 = vector.shape_cast %176 : vector<1x1x8xf32> to vector<1x8xf32>
    %178 = vector.broadcast %177 : vector<1x8xf32> to vector<8x8xf32>
    %179 = arith.addf %175, %178 : vector<8x8xf32>
    %c3_106 = arith.constant 3 : index
    %c0_107 = arith.constant 0 : index
    %c0_108 = arith.constant 0 : index
    %180 = vector.load %arg9[%c3_106, %c0_107, %c0_108] : memref<4x32x8xbf16, #tpu.memory_space<vmem>>, vector<1x32x8xbf16>
    %181 = vector.shape_cast %180 : vector<1x32x8xbf16> to vector<32x8xbf16>
    %182 = arith.truncf %26 : vector<8x32xf32> to vector<8x32xbf16>
    %cst_109 = arith.constant dense<0.000000e+00> : vector<8x8xf32>
    %183 = tpu.matmul %182, %181, %cst_109 {dimension_numbers = #tpu.dot_dimension_numbers<[1], [0], [0], [1], [0, 0, 1, 1], [], []>} : vector<8x32xbf16>, vector<32x8xbf16>, vector<8x8xf32> -> vector<8x8xf32>
    %c3_110 = arith.constant 3 : index
    %c0_111 = arith.constant 0 : index
    %c0_112 = arith.constant 0 : index
    %184 = vector.load %arg10[%c3_110, %c0_111, %c0_112] : memref<4x1x8xf32, #tpu.memory_space<vmem>>, vector<1x1x8xf32>
    %185 = vector.shape_cast %184 : vector<1x1x8xf32> to vector<1x8xf32>
    %186 = vector.broadcast %185 : vector<1x8xf32> to vector<8x8xf32>
    %187 = arith.addf %183, %186 : vector<8x8xf32>
    %188 = arith.truncf %171 : vector<8x8xf32> to vector<8x8xbf16>
    %189 = arith.truncf %179 : vector<8x8xf32> to vector<8x8xbf16>
    %cst_113 = arith.constant dense<0.000000e+00> : vector<8x8xf32>
    %190 = tpu.matmul %188, %189, %cst_113 {dimension_numbers = #tpu.dot_dimension_numbers<[1], [1], [0], [0], [0, 0, 1, 0], [], []>} : vector<8x8xbf16>, vector<8x8xbf16>, vector<8x8xf32> -> vector<8x8xf32>
    %cst_114 = arith.constant 0.353553385 : f32
    %191 = vector.broadcast %cst_114 : f32 to vector<8x8xf32>
    %192 = arith.mulf %190, %191 : vector<8x8xf32>
    %193 = vector.broadcast %28 : vector<1x8xf32> to vector<8x8xf32>
    %194 = arith.addf %192, %193 : vector<8x8xf32>
    %cst_115 = arith.constant dense<0xFF800000> : vector<8xf32>
    %195 = vector.multi_reduction <maximumf>, %194, %cst_115 [1] : vector<8x8xf32> to vector<8xf32>
    %196 = vector.shape_cast %195 : vector<8xf32> to vector<8x1xf32>
    %197 = vector.broadcast %196 : vector<8x1xf32> to vector<8x8xf32>
    %198 = arith.subf %194, %197 : vector<8x8xf32>
    %199 = math.exp %198 : vector<8x8xf32>
    %cst_116 = arith.constant dense<0.000000e+00> : vector<8xf32>
    %200 = vector.multi_reduction <add>, %199, %cst_116 [1] : vector<8x8xf32> to vector<8xf32>
    %201 = vector.shape_cast %200 : vector<8xf32> to vector<8x1xf32>
    %202 = tpu.reciprocal %201 {approx = true} : vector<8x1xf32> -> vector<8x1xf32>
    %203 = vector.broadcast %202 : vector<8x1xf32> to vector<8x8xf32>
    %204 = arith.mulf %199, %203 : vector<8x8xf32>
    %205 = arith.truncf %204 : vector<8x8xf32> to vector<8x8xbf16>
    %206 = arith.truncf %187 : vector<8x8xf32> to vector<8x8xbf16>
    %cst_117 = arith.constant dense<0.000000e+00> : vector<8x8xf32>
    %207 = tpu.matmul %205, %206, %cst_117 {dimension_numbers = #tpu.dot_dimension_numbers<[1], [0], [0], [1], [0, 0, 1, 1], [], []>} : vector<8x8xbf16>, vector<8x8xbf16>, vector<8x8xf32> -> vector<8x8xf32>
    %c0_118 = arith.constant 0 : index
    %c24 = arith.constant 24 : index
    %208 = vector.load %arg14[%c0_118, %c24] : memref<8x32xf32, #tpu.memory_space<vmem>>, vector<8x8xf32>
    tpu.vector_store %arg14[%c0_118, %c24], %207 {strides = array<i32>} : memref<8x32xf32, #tpu.memory_space<vmem>>, vector<8x8xf32>,
    %c0_119 = arith.constant 0 : index
    %c0_120 = arith.constant 0 : index
    %209 = vector.load %arg14[%c0_119, %c0_120] : memref<8x32xf32, #tpu.memory_space<vmem>>, vector<8x32xf32>
    %c0_121 = arith.constant 0 : index
    %c0_122 = arith.constant 0 : index
    %210 = vector.load %arg11[%c0_121, %c0_122] : memref<32x32xbf16, #tpu.memory_space<vmem>>, vector<32x32xbf16>
    %211 = arith.truncf %209 : vector<8x32xf32> to vector<8x32xbf16>
    %cst_123 = arith.constant dense<0.000000e+00> : vector<8x32xf32>
    %212 = tpu.matmul %211, %210, %cst_123 {dimension_numbers = #tpu.dot_dimension_numbers<[1], [0], [0], [1], [0, 0, 1, 1], [], []>} : vector<8x32xbf16>, vector<32x32xbf16>, vector<8x32xf32> -> vector<8x32xf32>
    %213 = arith.addf %2, %212 : vector<8x32xf32>
    %c0_124 = arith.constant 0 : index
    %c0_125 = arith.constant 0 : index
    %214 = vector.load %arg12[%c0_124, %c0_125] : memref<1x32xf32, #tpu.memory_space<vmem>>, vector<1x32xf32>
    %215 = vector.broadcast %214 : vector<1x32xf32> to vector<8x32xf32>
    %216 = arith.addf %213, %215 : vector<8x32xf32>
    %217 = arith.truncf %216 : vector<8x32xf32> to vector<8x32xbf16>
    %c0_126 = arith.constant 0 : index
    %c0_127 = arith.constant 0 : index
    %c0_128 = arith.constant 0 : index
    %218 = vector.load %arg13[%c0_126, %c0_127, %c0_128] : memref<1x8x32xbf16, #tpu.memory_space<vmem>>, vector<1x8x32xbf16>
    %219 = vector.shape_cast %218 : vector<1x8x32xbf16> to vector<8x32xbf16>
    %220 = vector.shape_cast %217 : vector<8x32xbf16> to vector<1x8x32xbf16>
    tpu.vector_store %arg13[%c0_126, %c0_127, %c0_128], %220 {strides = array<i32>} : memref<1x8x32xbf16, #tpu.memory_space<vmem>>, vector<1x8x32xbf16>,
    return
  }
  func.func @transform_0(%arg0: i32) -> (i32, i32, i32) {
    %c0_i32 = arith.constant 0 : i32
    %c0_i32_0 = arith.constant 0 : i32
    %c0_i32_1 = arith.constant 0 : i32
    return %arg0, %c0_i32, %c0_i32_0 : i32, i32, i32
  }
  func.func @transform_1(%arg0: i32) -> (i32, i32, i32) {
    %c0_i32 = arith.constant 0 : i32
    %c0_i32_0 = arith.constant 0 : i32
    %c0_i32_1 = arith.constant 0 : i32
    return %arg0, %c0_i32, %c0_i32_0 : i32, i32, i32
  }
  func.func @transform_2(%arg0: i32) -> (i32, i32) {
    %c0_i32 = arith.constant 0 : i32
    %c0_i32_0 = arith.constant 0 : i32
    %c0_i32_1 = arith.constant 0 : i32
    return %c0_i32, %c0_i32_0 : i32, i32
  }
  func.func @transform_3(%arg0: i32) -> (i32, i32) {
    %c0_i32 = arith.constant 0 : i32
    %c0_i32_0 = arith.constant 0 : i32
    %c0_i32_1 = arith.constant 0 : i32
    return %c0_i32, %c0_i32_0 : i32, i32
  }
  func.func @transform_4(%arg0: i32) -> (i32, i32, i32) {
    %c0_i32 = arith.constant 0 : i32
    %c0_i32_0 = arith.constant 0 : i32
    %c0_i32_1 = arith.constant 0 : i32
    %c0_i32_2 = arith.constant 0 : i32
    return %c0_i32, %c0_i32_0, %c0_i32_1 : i32, i32, i32
  }
  func.func @transform_5(%arg0: i32) -> (i32, i32, i32) {
    %c0_i32 = arith.constant 0 : i32
    %c0_i32_0 = arith.constant 0 : i32
    %c0_i32_1 = arith.constant 0 : i32
    %c0_i32_2 = arith.constant 0 : i32
    return %c0_i32, %c0_i32_0, %c0_i32_1 : i32, i32, i32
  }
  func.func @transform_6(%arg0: i32) -> (i32, i32, i32) {
    %c0_i32 = arith.constant 0 : i32
    %c0_i32_0 = arith.constant 0 : i32
    %c0_i32_1 = arith.constant 0 : i32
    %c0_i32_2 = arith.constant 0 : i32
    return %c0_i32, %c0_i32_0, %c0_i32_1 : i32, i32, i32
  }
  func.func @transform_7(%arg0: i32) -> (i32, i32, i32) {
    %c0_i32 = arith.constant 0 : i32
    %c0_i32_0 = arith.constant 0 : i32
    %c0_i32_1 = arith.constant 0 : i32
    %c0_i32_2 = arith.constant 0 : i32
    return %c0_i32, %c0_i32_0, %c0_i32_1 : i32, i32, i32
  }
  func.func @transform_8(%arg0: i32) -> (i32, i32, i32) {
    %c0_i32 = arith.constant 0 : i32
    %c0_i32_0 = arith.constant 0 : i32
    %c0_i32_1 = arith.constant 0 : i32
    %c0_i32_2 = arith.constant 0 : i32
    return %c0_i32, %c0_i32_0, %c0_i32_1 : i32, i32, i32
  }
  func.func @transform_9(%arg0: i32) -> (i32, i32, i32) {
    %c0_i32 = arith.constant 0 : i32
    %c0_i32_0 = arith.constant 0 : i32
    %c0_i32_1 = arith.constant 0 : i32
    %c0_i32_2 = arith.constant 0 : i32
    return %c0_i32, %c0_i32_0, %c0_i32_1 : i32, i32, i32
  }
  func.func @transform_10(%arg0: i32) -> (i32, i32) {
    %c0_i32 = arith.constant 0 : i32
    %c0_i32_0 = arith.constant 0 : i32
    %c0_i32_1 = arith.constant 0 : i32
    return %c0_i32, %c0_i32_0 : i32, i32
  }
  func.func @transform_11(%arg0: i32) -> (i32, i32) {
    %c0_i32 = arith.constant 0 : i32
    %c0_i32_0 = arith.constant 0 : i32
    %c0_i32_1 = arith.constant 0 : i32
    return %c0_i32, %c0_i32_0 : i32, i32
  }
  func.func @transform_12(%arg0: i32) -> (i32, i32, i32) {
    %c0_i32 = arith.constant 0 : i32
    %c0_i32_0 = arith.constant 0 : i32
    %c0_i32_1 = arith.constant 0 : i32
    return %arg0, %c0_i32, %c0_i32_0 : i32, i32, i32
  }
}

module attributes {stable_mosaic.version = 11 : i64} {
  func.func @_attn_block_kernel(%arg0: i32, %arg1: memref<1x8x32xbf16, #tpu.memory_space<vmem>>, %arg2: memref<1x1x8xf32, #tpu.memory_space<vmem>>, %arg3: memref<1x32xf32, #tpu.memory_space<vmem>>, %arg4: memref<1x32xf32, #tpu.memory_space<vmem>>, %arg5: memref<4x32x8xbf16, #tpu.memory_space<vmem>>, %arg6: memref<4x1x8xf32, #tpu.memory_space<vmem>>, %arg7: memref<4x32x8xbf16, #tpu.memory_space<vmem>>, %arg8: memref<4x1x8xf32, #tpu.memory_space<vmem>>, %arg9: memref<4x32x8xbf16, #tpu.memory_space<vmem>>, %arg10: memref<4x1x8xf32, #tpu.memory_space<vmem>>, %arg11: memref<32x32xbf16, #tpu.memory_space<vmem>>, %arg12: memref<1x32xf32, #tpu.memory_space<vmem>>, %arg13: memref<1x8x32xbf16, #tpu.memory_space<vmem>>, %arg14: memref<8x32xf32, #tpu.memory_space<vmem>>) attributes {dimension_semantics = [#tpu.dimension_semantics<parallel>], iteration_bounds = array<i64: 2>, scalar_prefetch = 0 : i64, scratch_operands = 1 : i64, tpu.core_type = #tpu.core_type<tc>, window_params = [{transform_indices = @transform_0, window_bounds = array<i64: 1, 8, 32>}, {transform_indices = @transform_1, window_bounds = array<i64: 1, 1, 8>}, {pipeline_mode = #tpu.pipeline_mode<synchronous>, transform_indices = @transform_2, window_bounds = array<i64: 1, 32>}, {pipeline_mode = #tpu.pipeline_mode<synchronous>, transform_indices = @transform_3, window_bounds = array<i64: 1, 32>}, {pipeline_mode = #tpu.pipeline_mode<synchronous>, transform_indices = @transform_4, window_bounds = array<i64: 4, 32, 8>}, {pipeline_mode = #tpu.pipeline_mode<synchronous>, transform_indices = @transform_5, window_bounds = array<i64: 4, 1, 8>}, {pipeline_mode = #tpu.pipeline_mode<synchronous>, transform_indices = @transform_6, window_bounds = array<i64: 4, 32, 8>}, {pipeline_mode = #tpu.pipeline_mode<synchronous>, transform_indices = @transform_7, window_bounds = array<i64: 4, 1, 8>}, {pipeline_mode = #tpu.pipeline_mode<synchronous>, transform_indices = @transform_8, window_bounds = array<i64: 4, 32, 8>}, {pipeline_mode = #tpu.pipeline_mode<synchronous>, transform_indices = @transform_9, window_bounds = array<i64: 4, 1, 8>}, {pipeline_mode = #tpu.pipeline_mode<synchronous>, transform_indices = @transform_10, window_bounds = array<i64: 32, 32>}, {pipeline_mode = #tpu.pipeline_mode<synchronous>, transform_indices = @transform_11, window_bounds = array<i64: 1, 32>}, {transform_indices = @transform_12, window_bounds = array<i64: 1, 8, 32>}]} {
    %c0 = arith.constant 0 : index
    %c0_0 = arith.constant 0 : index
    %c0_1 = arith.constant 0 : index
    %0 = vector.load %arg1[%c0, %c0_0, %c0_1] : memref<1x8x32xbf16, #tpu.memory_space<vmem>>, vector<1x8x32xbf16>
    %1 = vector.shape_cast %0 : vector<1x8x32xbf16> to vector<8x32xbf16>
    %2 = arith.extf %1 : vector<8x32xbf16> to vector<8x32xf32>
    %c0_2 = arith.constant 0 : index
    %c0_3 = arith.constant 0 : index
    %3 = vector.load %arg3[%c0_2, %c0_3] : memref<1x32xf32, #tpu.memory_space<vmem>>, vector<1x32xf32>
    %c0_4 = arith.constant 0 : index
    %c0_5 = arith.constant 0 : index
    %4 = vector.load %arg4[%c0_4, %c0_5] : memref<1x32xf32, #tpu.memory_space<vmem>>, vector<1x32xf32>
    %cst = arith.constant dense<0.000000e+00> : vector<8xf32>
    %5 = vector.multi_reduction <add>, %2, %cst [1] : vector<8x32xf32> to vector<8xf32>
    %6 = vector.shape_cast %5 : vector<8xf32> to vector<8x1xf32>
    %cst_6 = arith.constant 3.200000e+01 : f32
    %7 = vector.broadcast %cst_6 : f32 to vector<8x1xf32>
    %8 = arith.divf %6, %7 : vector<8x1xf32>
    %9 = vector.broadcast %8 : vector<8x1xf32> to vector<8x32xf32>
    %10 = arith.subf %2, %9 : vector<8x32xf32>
    %11 = arith.mulf %10, %10 : vector<8x32xf32>
    %cst_7 = arith.constant dense<0.000000e+00> : vector<8xf32>
    %12 = vector.multi_reduction <add>, %11, %cst_7 [1] : vector<8x32xf32> to vector<8xf32>
    %13 = vector.shape_cast %12 : vector<8xf32> to vector<8x1xf32>
    %cst_8 = arith.constant 3.200000e+01 : f32
    %14 = vector.broadcast %cst_8 : f32 to vector<8x1xf32>
    %15 = arith.divf %13, %14 : vector<8x1xf32>
    %16 = vector.broadcast %8 : vector<8x1xf32> to vector<8x32xf32>
    %17 = arith.subf %2, %16 : vector<8x32xf32>
    %cst_9 = arith.constant 9.99999974E-6 : f32
    %18 = vector.broadcast %cst_9 : f32 to vector<8x1xf32>
    %19 = arith.addf %15, %18 : vector<8x1xf32>
    %20 = math.rsqrt %19 : vector<8x1xf32>
    %21 = vector.broadcast %20 : vector<8x1xf32> to vector<8x32xf32>
    %22 = arith.mulf %17, %21 : vector<8x32xf32>
    %23 = vector.broadcast %3 : vector<1x32xf32> to vector<8x32xf32>
    %24 = arith.mulf %22, %23 : vector<8x32xf32>
    %25 = vector.broadcast %4 : vector<1x32xf32> to vector<8x32xf32>
    %26 = arith.addf %24, %25 : vector<8x32xf32>
    %c0_10 = arith.constant 0 : index
    %c0_11 = arith.constant 0 : index
    %c0_12 = arith.constant 0 : index
    %27 = vector.load %arg2[%c0_10, %c0_11, %c0_12] : memref<1x1x8xf32, #tpu.memory_space<vmem>>, vector<1x1x8xf32>
    %28 = vector.shape_cast %27 : vector<1x1x8xf32> to vector<1x8xf32>
    %29 = tpu.iota {dimensions = array<i32: 0>} : vector<8x8xi32>
    %30 = tpu.iota {dimensions = array<i32: 1>} : vector<8x8xi32>
    %31 = arith.cmpi sgt, %30, %29 : vector<8x8xi32>
    %cst_13 = arith.constant -1.000000e+09 : f32
    %cst_14 = arith.constant 0.000000e+00 : f32
    %32 = vector.broadcast %cst_13 : f32 to vector<8x8xf32>
    %33 = vector.broadcast %cst_14 : f32 to vector<8x8xf32>
    %34 = arith.select %31, %32, %33 : vector<8x8xi1>, vector<8x8xf32>
    %35 = vector.broadcast %28 : vector<1x8xf32> to vector<8x8xf32>
    %36 = arith.addf %35, %34 : vector<8x8xf32>
    %c0_15 = arith.constant 0 : index
    %c0_16 = arith.constant 0 : index
    %c0_17 = arith.constant 0 : index
    %37 = vector.load %arg5[%c0_15, %c0_16, %c0_17] : memref<4x32x8xbf16, #tpu.memory_space<vmem>>, vector<1x32x8xbf16>
    %38 = vector.shape_cast %37 : vector<1x32x8xbf16> to vector<32x8xbf16>
    %39 = arith.truncf %26 : vector<8x32xf32> to vector<8x32xbf16>
    %cst_18 = arith.constant dense<0.000000e+00> : vector<8x8xf32>
    %40 = tpu.matmul %39, %38, %cst_18 {dimension_numbers = #tpu.dot_dimension_numbers<[1], [0], [0], [1], [0, 0, 1, 1], [], []>} : vector<8x32xbf16>, vector<32x8xbf16>, vector<8x8xf32> -> vector<8x8xf32>
    %c0_19 = arith.constant 0 : index
    %c0_20 = arith.constant 0 : index
    %c0_21 = arith.constant 0 : index
    %41 = vector.load %arg6[%c0_19, %c0_20, %c0_21] : memref<4x1x8xf32, #tpu.memory_space<vmem>>, vector<1x1x8xf32>
    %42 = vector.shape_cast %41 : vector<1x1x8xf32> to vector<1x8xf32>
    %43 = vector.broadcast %42 : vector<1x8xf32> to vector<8x8xf32>
    %44 = arith.addf %40, %43 : vector<8x8xf32>
    %c0_22 = arith.constant 0 : index
    %c0_23 = arith.constant 0 : index
    %c0_24 = arith.constant 0 : index
    %45 = vector.load %arg7[%c0_22, %c0_23, %c0_24] : memref<4x32x8xbf16, #tpu.memory_space<vmem>>, vector<1x32x8xbf16>
    %46 = vector.shape_cast %45 : vector<1x32x8xbf16> to vector<32x8xbf16>
    %47 = arith.truncf %26 : vector<8x32xf32> to vector<8x32xbf16>
    %cst_25 = arith.constant dense<0.000000e+00> : vector<8x8xf32>
    %48 = tpu.matmul %47, %46, %cst_25 {dimension_numbers = #tpu.dot_dimension_numbers<[1], [0], [0], [1], [0, 0, 1, 1], [], []>} : vector<8x32xbf16>, vector<32x8xbf16>, vector<8x8xf32> -> vector<8x8xf32>
    %c0_26 = arith.constant 0 : index
    %c0_27 = arith.constant 0 : index
    %c0_28 = arith.constant 0 : index
    %49 = vector.load %arg8[%c0_26, %c0_27, %c0_28] : memref<4x1x8xf32, #tpu.memory_space<vmem>>, vector<1x1x8xf32>
    %50 = vector.shape_cast %49 : vector<1x1x8xf32> to vector<1x8xf32>
    %51 = vector.broadcast %50 : vector<1x8xf32> to vector<8x8xf32>
    %52 = arith.addf %48, %51 : vector<8x8xf32>
    %c0_29 = arith.constant 0 : index
    %c0_30 = arith.constant 0 : index
    %c0_31 = arith.constant 0 : index
    %53 = vector.load %arg9[%c0_29, %c0_30, %c0_31] : memref<4x32x8xbf16, #tpu.memory_space<vmem>>, vector<1x32x8xbf16>
    %54 = vector.shape_cast %53 : vector<1x32x8xbf16> to vector<32x8xbf16>
    %55 = arith.truncf %26 : vector<8x32xf32> to vector<8x32xbf16>
    %cst_32 = arith.constant dense<0.000000e+00> : vector<8x8xf32>
    %56 = tpu.matmul %55, %54, %cst_32 {dimension_numbers = #tpu.dot_dimension_numbers<[1], [0], [0], [1], [0, 0, 1, 1], [], []>} : vector<8x32xbf16>, vector<32x8xbf16>, vector<8x8xf32> -> vector<8x8xf32>
    %c0_33 = arith.constant 0 : index
    %c0_34 = arith.constant 0 : index
    %c0_35 = arith.constant 0 : index
    %57 = vector.load %arg10[%c0_33, %c0_34, %c0_35] : memref<4x1x8xf32, #tpu.memory_space<vmem>>, vector<1x1x8xf32>
    %58 = vector.shape_cast %57 : vector<1x1x8xf32> to vector<1x8xf32>
    %59 = vector.broadcast %58 : vector<1x8xf32> to vector<8x8xf32>
    %60 = arith.addf %56, %59 : vector<8x8xf32>
    %61 = arith.truncf %44 : vector<8x8xf32> to vector<8x8xbf16>
    %62 = arith.truncf %52 : vector<8x8xf32> to vector<8x8xbf16>
    %cst_36 = arith.constant dense<0.000000e+00> : vector<8x8xf32>
    %63 = tpu.matmul %61, %62, %cst_36 {dimension_numbers = #tpu.dot_dimension_numbers<[1], [1], [0], [0], [0, 0, 1, 0], [], []>} : vector<8x8xbf16>, vector<8x8xbf16>, vector<8x8xf32> -> vector<8x8xf32>
    %cst_37 = arith.constant 0.353553385 : f32
    %64 = vector.broadcast %cst_37 : f32 to vector<8x8xf32>
    %65 = arith.mulf %63, %64 : vector<8x8xf32>
    %66 = arith.addf %65, %36 : vector<8x8xf32>
    %cst_38 = arith.constant dense<0xFF800000> : vector<8xf32>
    %67 = vector.multi_reduction <maximumf>, %66, %cst_38 [1] : vector<8x8xf32> to vector<8xf32>
    %68 = vector.shape_cast %67 : vector<8xf32> to vector<8x1xf32>
    %69 = vector.broadcast %68 : vector<8x1xf32> to vector<8x8xf32>
    %70 = arith.subf %66, %69 : vector<8x8xf32>
    %71 = math.exp %70 : vector<8x8xf32>
    %cst_39 = arith.constant dense<0.000000e+00> : vector<8xf32>
    %72 = vector.multi_reduction <add>, %71, %cst_39 [1] : vector<8x8xf32> to vector<8xf32>
    %73 = vector.shape_cast %72 : vector<8xf32> to vector<8x1xf32>
    %74 = tpu.reciprocal %73 {approx = true} : vector<8x1xf32> -> vector<8x1xf32>
    %75 = vector.broadcast %74 : vector<8x1xf32> to vector<8x8xf32>
    %76 = arith.mulf %71, %75 : vector<8x8xf32>
    %77 = arith.truncf %76 : vector<8x8xf32> to vector<8x8xbf16>
    %78 = arith.truncf %60 : vector<8x8xf32> to vector<8x8xbf16>
    %cst_40 = arith.constant dense<0.000000e+00> : vector<8x8xf32>
    %79 = tpu.matmul %77, %78, %cst_40 {dimension_numbers = #tpu.dot_dimension_numbers<[1], [0], [0], [1], [0, 0, 1, 1], [], []>} : vector<8x8xbf16>, vector<8x8xbf16>, vector<8x8xf32> -> vector<8x8xf32>
    %c0_41 = arith.constant 0 : index
    %c0_42 = arith.constant 0 : index
    %80 = vector.load %arg14[%c0_41, %c0_42] : memref<8x32xf32, #tpu.memory_space<vmem>>, vector<8x8xf32>
    tpu.vector_store %arg14[%c0_41, %c0_42], %79 {strides = array<i32>} : memref<8x32xf32, #tpu.memory_space<vmem>>, vector<8x8xf32>,
    %c1 = arith.constant 1 : index
    %c0_43 = arith.constant 0 : index
    %c0_44 = arith.constant 0 : index
    %81 = vector.load %arg5[%c1, %c0_43, %c0_44] : memref<4x32x8xbf16, #tpu.memory_space<vmem>>, vector<1x32x8xbf16>
    %82 = vector.shape_cast %81 : vector<1x32x8xbf16> to vector<32x8xbf16>
    %83 = arith.truncf %26 : vector<8x32xf32> to vector<8x32xbf16>
    %cst_45 = arith.constant dense<0.000000e+00> : vector<8x8xf32>
    %84 = tpu.matmul %83, %82, %cst_45 {dimension_numbers = #tpu.dot_dimension_numbers<[1], [0], [0], [1], [0, 0, 1, 1], [], []>} : vector<8x32xbf16>, vector<32x8xbf16>, vector<8x8xf32> -> vector<8x8xf32>
    %c1_46 = arith.constant 1 : index
    %c0_47 = arith.constant 0 : index
    %c0_48 = arith.constant 0 : index
    %85 = vector.load %arg6[%c1_46, %c0_47, %c0_48] : memref<4x1x8xf32, #tpu.memory_space<vmem>>, vector<1x1x8xf32>
    %86 = vector.shape_cast %85 : vector<1x1x8xf32> to vector<1x8xf32>
    %87 = vector.broadcast %86 : vector<1x8xf32> to vector<8x8xf32>
    %88 = arith.addf %84, %87 : vector<8x8xf32>
    %c1_49 = arith.constant 1 : index
    %c0_50 = arith.constant 0 : index
    %c0_51 = arith.constant 0 : index
    %89 = vector.load %arg7[%c1_49, %c0_50, %c0_51] : memref<4x32x8xbf16, #tpu.memory_space<vmem>>, vector<1x32x8xbf16>
    %90 = vector.shape_cast %89 : vector<1x32x8xbf16> to vector<32x8xbf16>
    %91 = arith.truncf %26 : vector<8x32xf32> to vector<8x32xbf16>
    %cst_52 = arith.constant dense<0.000000e+00> : vector<8x8xf32>
    %92 = tpu.matmul %91, %90, %cst_52 {dimension_numbers = #tpu.dot_dimension_numbers<[1], [0], [0], [1], [0, 0, 1, 1], [], []>} : vector<8x32xbf16>, vector<32x8xbf16>, vector<8x8xf32> -> vector<8x8xf32>
    %c1_53 = arith.constant 1 : index
    %c0_54 = arith.constant 0 : index
    %c0_55 = arith.constant 0 : index
    %93 = vector.load %arg8[%c1_53, %c0_54, %c0_55] : memref<4x1x8xf32, #tpu.memory_space<vmem>>, vector<1x1x8xf32>
    %94 = vector.shape_cast %93 : vector<1x1x8xf32> to vector<1x8xf32>
    %95 = vector.broadcast %94 : vector<1x8xf32> to vector<8x8xf32>
    %96 = arith.addf %92, %95 : vector<8x8xf32>
    %c1_56 = arith.constant 1 : index
    %c0_57 = arith.constant 0 : index
    %c0_58 = arith.constant 0 : index
    %97 = vector.load %arg9[%c1_56, %c0_57, %c0_58] : memref<4x32x8xbf16, #tpu.memory_space<vmem>>, vector<1x32x8xbf16>
    %98 = vector.shape_cast %97 : vector<1x32x8xbf16> to vector<32x8xbf16>
    %99 = arith.truncf %26 : vector<8x32xf32> to vector<8x32xbf16>
    %cst_59 = arith.constant dense<0.000000e+00> : vector<8x8xf32>
    %100 = tpu.matmul %99, %98, %cst_59 {dimension_numbers = #tpu.dot_dimension_numbers<[1], [0], [0], [1], [0, 0, 1, 1], [], []>} : vector<8x32xbf16>, vector<32x8xbf16>, vector<8x8xf32> -> vector<8x8xf32>
    %c1_60 = arith.constant 1 : index
    %c0_61 = arith.constant 0 : index
    %c0_62 = arith.constant 0 : index
    %101 = vector.load %arg10[%c1_60, %c0_61, %c0_62] : memref<4x1x8xf32, #tpu.memory_space<vmem>>, vector<1x1x8xf32>
    %102 = vector.shape_cast %101 : vector<1x1x8xf32> to vector<1x8xf32>
    %103 = vector.broadcast %102 : vector<1x8xf32> to vector<8x8xf32>
    %104 = arith.addf %100, %103 : vector<8x8xf32>
    %105 = arith.truncf %88 : vector<8x8xf32> to vector<8x8xbf16>
    %106 = arith.truncf %96 : vector<8x8xf32> to vector<8x8xbf16>
    %cst_63 = arith.constant dense<0.000000e+00> : vector<8x8xf32>
    %107 = tpu.matmul %105, %106, %cst_63 {dimension_numbers = #tpu.dot_dimension_numbers<[1], [1], [0], [0], [0, 0, 1, 0], [], []>} : vector<8x8xbf16>, vector<8x8xbf16>, vector<8x8xf32> -> vector<8x8xf32>
    %cst_64 = arith.constant 0.353553385 : f32
    %108 = vector.broadcast %cst_64 : f32 to vector<8x8xf32>
    %109 = arith.mulf %107, %108 : vector<8x8xf32>
    %110 = arith.addf %109, %36 : vector<8x8xf32>
    %cst_65 = arith.constant dense<0xFF800000> : vector<8xf32>
    %111 = vector.multi_reduction <maximumf>, %110, %cst_65 [1] : vector<8x8xf32> to vector<8xf32>
    %112 = vector.shape_cast %111 : vector<8xf32> to vector<8x1xf32>
    %113 = vector.broadcast %112 : vector<8x1xf32> to vector<8x8xf32>
    %114 = arith.subf %110, %113 : vector<8x8xf32>
    %115 = math.exp %114 : vector<8x8xf32>
    %cst_66 = arith.constant dense<0.000000e+00> : vector<8xf32>
    %116 = vector.multi_reduction <add>, %115, %cst_66 [1] : vector<8x8xf32> to vector<8xf32>
    %117 = vector.shape_cast %116 : vector<8xf32> to vector<8x1xf32>
    %118 = tpu.reciprocal %117 {approx = true} : vector<8x1xf32> -> vector<8x1xf32>
    %119 = vector.broadcast %118 : vector<8x1xf32> to vector<8x8xf32>
    %120 = arith.mulf %115, %119 : vector<8x8xf32>
    %121 = arith.truncf %120 : vector<8x8xf32> to vector<8x8xbf16>
    %122 = arith.truncf %104 : vector<8x8xf32> to vector<8x8xbf16>
    %cst_67 = arith.constant dense<0.000000e+00> : vector<8x8xf32>
    %123 = tpu.matmul %121, %122, %cst_67 {dimension_numbers = #tpu.dot_dimension_numbers<[1], [0], [0], [1], [0, 0, 1, 1], [], []>} : vector<8x8xbf16>, vector<8x8xbf16>, vector<8x8xf32> -> vector<8x8xf32>
    %c0_68 = arith.constant 0 : index
    %c8 = arith.constant 8 : index
    %124 = vector.load %arg14[%c0_68, %c8] : memref<8x32xf32, #tpu.memory_space<vmem>>, vector<8x8xf32>
    tpu.vector_store %arg14[%c0_68, %c8], %123 {strides = array<i32>} : memref<8x32xf32, #tpu.memory_space<vmem>>, vector<8x8xf32>,
    %c2 = arith.constant 2 : index
    %c0_69 = arith.constant 0 : index
    %c0_70 = arith.constant 0 : index
    %125 = vector.load %arg5[%c2, %c0_69, %c0_70] : memref<4x32x8xbf16, #tpu.memory_space<vmem>>, vector<1x32x8xbf16>
    %126 = vector.shape_cast %125 : vector<1x32x8xbf16> to vector<32x8xbf16>
    %127 = arith.truncf %26 : vector<8x32xf32> to vector<8x32xbf16>
    %cst_71 = arith.constant dense<0.000000e+00> : vector<8x8xf32>
    %128 = tpu.matmul %127, %126, %cst_71 {dimension_numbers = #tpu.dot_dimension_numbers<[1], [0], [0], [1], [0, 0, 1, 1], [], []>} : vector<8x32xbf16>, vector<32x8xbf16>, vector<8x8xf32> -> vector<8x8xf32>
    %c2_72 = arith.constant 2 : index
    %c0_73 = arith.constant 0 : index
    %c0_74 = arith.constant 0 : index
    %129 = vector.load %arg6[%c2_72, %c0_73, %c0_74] : memref<4x1x8xf32, #tpu.memory_space<vmem>>, vector<1x1x8xf32>
    %130 = vector.shape_cast %129 : vector<1x1x8xf32> to vector<1x8xf32>
    %131 = vector.broadcast %130 : vector<1x8xf32> to vector<8x8xf32>
    %132 = arith.addf %128, %131 : vector<8x8xf32>
    %c2_75 = arith.constant 2 : index
    %c0_76 = arith.constant 0 : index
    %c0_77 = arith.constant 0 : index
    %133 = vector.load %arg7[%c2_75, %c0_76, %c0_77] : memref<4x32x8xbf16, #tpu.memory_space<vmem>>, vector<1x32x8xbf16>
    %134 = vector.shape_cast %133 : vector<1x32x8xbf16> to vector<32x8xbf16>
    %135 = arith.truncf %26 : vector<8x32xf32> to vector<8x32xbf16>
    %cst_78 = arith.constant dense<0.000000e+00> : vector<8x8xf32>
    %136 = tpu.matmul %135, %134, %cst_78 {dimension_numbers = #tpu.dot_dimension_numbers<[1], [0], [0], [1], [0, 0, 1, 1], [], []>} : vector<8x32xbf16>, vector<32x8xbf16>, vector<8x8xf32> -> vector<8x8xf32>
    %c2_79 = arith.constant 2 : index
    %c0_80 = arith.constant 0 : index
    %c0_81 = arith.constant 0 : index
    %137 = vector.load %arg8[%c2_79, %c0_80, %c0_81] : memref<4x1x8xf32, #tpu.memory_space<vmem>>, vector<1x1x8xf32>
    %138 = vector.shape_cast %137 : vector<1x1x8xf32> to vector<1x8xf32>
    %139 = vector.broadcast %138 : vector<1x8xf32> to vector<8x8xf32>
    %140 = arith.addf %136, %139 : vector<8x8xf32>
    %c2_82 = arith.constant 2 : index
    %c0_83 = arith.constant 0 : index
    %c0_84 = arith.constant 0 : index
    %141 = vector.load %arg9[%c2_82, %c0_83, %c0_84] : memref<4x32x8xbf16, #tpu.memory_space<vmem>>, vector<1x32x8xbf16>
    %142 = vector.shape_cast %141 : vector<1x32x8xbf16> to vector<32x8xbf16>
    %143 = arith.truncf %26 : vector<8x32xf32> to vector<8x32xbf16>
    %cst_85 = arith.constant dense<0.000000e+00> : vector<8x8xf32>
    %144 = tpu.matmul %143, %142, %cst_85 {dimension_numbers = #tpu.dot_dimension_numbers<[1], [0], [0], [1], [0, 0, 1, 1], [], []>} : vector<8x32xbf16>, vector<32x8xbf16>, vector<8x8xf32> -> vector<8x8xf32>
    %c2_86 = arith.constant 2 : index
    %c0_87 = arith.constant 0 : index
    %c0_88 = arith.constant 0 : index
    %145 = vector.load %arg10[%c2_86, %c0_87, %c0_88] : memref<4x1x8xf32, #tpu.memory_space<vmem>>, vector<1x1x8xf32>
    %146 = vector.shape_cast %145 : vector<1x1x8xf32> to vector<1x8xf32>
    %147 = vector.broadcast %146 : vector<1x8xf32> to vector<8x8xf32>
    %148 = arith.addf %144, %147 : vector<8x8xf32>
    %149 = arith.truncf %132 : vector<8x8xf32> to vector<8x8xbf16>
    %150 = arith.truncf %140 : vector<8x8xf32> to vector<8x8xbf16>
    %cst_89 = arith.constant dense<0.000000e+00> : vector<8x8xf32>
    %151 = tpu.matmul %149, %150, %cst_89 {dimension_numbers = #tpu.dot_dimension_numbers<[1], [1], [0], [0], [0, 0, 1, 0], [], []>} : vector<8x8xbf16>, vector<8x8xbf16>, vector<8x8xf32> -> vector<8x8xf32>
    %cst_90 = arith.constant 0.353553385 : f32
    %152 = vector.broadcast %cst_90 : f32 to vector<8x8xf32>
    %153 = arith.mulf %151, %152 : vector<8x8xf32>
    %154 = arith.addf %153, %36 : vector<8x8xf32>
    %cst_91 = arith.constant dense<0xFF800000> : vector<8xf32>
    %155 = vector.multi_reduction <maximumf>, %154, %cst_91 [1] : vector<8x8xf32> to vector<8xf32>
    %156 = vector.shape_cast %155 : vector<8xf32> to vector<8x1xf32>
    %157 = vector.broadcast %156 : vector<8x1xf32> to vector<8x8xf32>
    %158 = arith.subf %154, %157 : vector<8x8xf32>
    %159 = math.exp %158 : vector<8x8xf32>
    %cst_92 = arith.constant dense<0.000000e+00> : vector<8xf32>
    %160 = vector.multi_reduction <add>, %159, %cst_92 [1] : vector<8x8xf32> to vector<8xf32>
    %161 = vector.shape_cast %160 : vector<8xf32> to vector<8x1xf32>
    %162 = tpu.reciprocal %161 {approx = true} : vector<8x1xf32> -> vector<8x1xf32>
    %163 = vector.broadcast %162 : vector<8x1xf32> to vector<8x8xf32>
    %164 = arith.mulf %159, %163 : vector<8x8xf32>
    %165 = arith.truncf %164 : vector<8x8xf32> to vector<8x8xbf16>
    %166 = arith.truncf %148 : vector<8x8xf32> to vector<8x8xbf16>
    %cst_93 = arith.constant dense<0.000000e+00> : vector<8x8xf32>
    %167 = tpu.matmul %165, %166, %cst_93 {dimension_numbers = #tpu.dot_dimension_numbers<[1], [0], [0], [1], [0, 0, 1, 1], [], []>} : vector<8x8xbf16>, vector<8x8xbf16>, vector<8x8xf32> -> vector<8x8xf32>
    %c0_94 = arith.constant 0 : index
    %c16 = arith.constant 16 : index
    %168 = vector.load %arg14[%c0_94, %c16] : memref<8x32xf32, #tpu.memory_space<vmem>>, vector<8x8xf32>
    tpu.vector_store %arg14[%c0_94, %c16], %167 {strides = array<i32>} : memref<8x32xf32, #tpu.memory_space<vmem>>, vector<8x8xf32>,
    %c3 = arith.constant 3 : index
    %c0_95 = arith.constant 0 : index
    %c0_96 = arith.constant 0 : index
    %169 = vector.load %arg5[%c3, %c0_95, %c0_96] : memref<4x32x8xbf16, #tpu.memory_space<vmem>>, vector<1x32x8xbf16>
    %170 = vector.shape_cast %169 : vector<1x32x8xbf16> to vector<32x8xbf16>
    %171 = arith.truncf %26 : vector<8x32xf32> to vector<8x32xbf16>
    %cst_97 = arith.constant dense<0.000000e+00> : vector<8x8xf32>
    %172 = tpu.matmul %171, %170, %cst_97 {dimension_numbers = #tpu.dot_dimension_numbers<[1], [0], [0], [1], [0, 0, 1, 1], [], []>} : vector<8x32xbf16>, vector<32x8xbf16>, vector<8x8xf32> -> vector<8x8xf32>
    %c3_98 = arith.constant 3 : index
    %c0_99 = arith.constant 0 : index
    %c0_100 = arith.constant 0 : index
    %173 = vector.load %arg6[%c3_98, %c0_99, %c0_100] : memref<4x1x8xf32, #tpu.memory_space<vmem>>, vector<1x1x8xf32>
    %174 = vector.shape_cast %173 : vector<1x1x8xf32> to vector<1x8xf32>
    %175 = vector.broadcast %174 : vector<1x8xf32> to vector<8x8xf32>
    %176 = arith.addf %172, %175 : vector<8x8xf32>
    %c3_101 = arith.constant 3 : index
    %c0_102 = arith.constant 0 : index
    %c0_103 = arith.constant 0 : index
    %177 = vector.load %arg7[%c3_101, %c0_102, %c0_103] : memref<4x32x8xbf16, #tpu.memory_space<vmem>>, vector<1x32x8xbf16>
    %178 = vector.shape_cast %177 : vector<1x32x8xbf16> to vector<32x8xbf16>
    %179 = arith.truncf %26 : vector<8x32xf32> to vector<8x32xbf16>
    %cst_104 = arith.constant dense<0.000000e+00> : vector<8x8xf32>
    %180 = tpu.matmul %179, %178, %cst_104 {dimension_numbers = #tpu.dot_dimension_numbers<[1], [0], [0], [1], [0, 0, 1, 1], [], []>} : vector<8x32xbf16>, vector<32x8xbf16>, vector<8x8xf32> -> vector<8x8xf32>
    %c3_105 = arith.constant 3 : index
    %c0_106 = arith.constant 0 : index
    %c0_107 = arith.constant 0 : index
    %181 = vector.load %arg8[%c3_105, %c0_106, %c0_107] : memref<4x1x8xf32, #tpu.memory_space<vmem>>, vector<1x1x8xf32>
    %182 = vector.shape_cast %181 : vector<1x1x8xf32> to vector<1x8xf32>
    %183 = vector.broadcast %182 : vector<1x8xf32> to vector<8x8xf32>
    %184 = arith.addf %180, %183 : vector<8x8xf32>
    %c3_108 = arith.constant 3 : index
    %c0_109 = arith.constant 0 : index
    %c0_110 = arith.constant 0 : index
    %185 = vector.load %arg9[%c3_108, %c0_109, %c0_110] : memref<4x32x8xbf16, #tpu.memory_space<vmem>>, vector<1x32x8xbf16>
    %186 = vector.shape_cast %185 : vector<1x32x8xbf16> to vector<32x8xbf16>
    %187 = arith.truncf %26 : vector<8x32xf32> to vector<8x32xbf16>
    %cst_111 = arith.constant dense<0.000000e+00> : vector<8x8xf32>
    %188 = tpu.matmul %187, %186, %cst_111 {dimension_numbers = #tpu.dot_dimension_numbers<[1], [0], [0], [1], [0, 0, 1, 1], [], []>} : vector<8x32xbf16>, vector<32x8xbf16>, vector<8x8xf32> -> vector<8x8xf32>
    %c3_112 = arith.constant 3 : index
    %c0_113 = arith.constant 0 : index
    %c0_114 = arith.constant 0 : index
    %189 = vector.load %arg10[%c3_112, %c0_113, %c0_114] : memref<4x1x8xf32, #tpu.memory_space<vmem>>, vector<1x1x8xf32>
    %190 = vector.shape_cast %189 : vector<1x1x8xf32> to vector<1x8xf32>
    %191 = vector.broadcast %190 : vector<1x8xf32> to vector<8x8xf32>
    %192 = arith.addf %188, %191 : vector<8x8xf32>
    %193 = arith.truncf %176 : vector<8x8xf32> to vector<8x8xbf16>
    %194 = arith.truncf %184 : vector<8x8xf32> to vector<8x8xbf16>
    %cst_115 = arith.constant dense<0.000000e+00> : vector<8x8xf32>
    %195 = tpu.matmul %193, %194, %cst_115 {dimension_numbers = #tpu.dot_dimension_numbers<[1], [1], [0], [0], [0, 0, 1, 0], [], []>} : vector<8x8xbf16>, vector<8x8xbf16>, vector<8x8xf32> -> vector<8x8xf32>
    %cst_116 = arith.constant 0.353553385 : f32
    %196 = vector.broadcast %cst_116 : f32 to vector<8x8xf32>
    %197 = arith.mulf %195, %196 : vector<8x8xf32>
    %198 = arith.addf %197, %36 : vector<8x8xf32>
    %cst_117 = arith.constant dense<0xFF800000> : vector<8xf32>
    %199 = vector.multi_reduction <maximumf>, %198, %cst_117 [1] : vector<8x8xf32> to vector<8xf32>
    %200 = vector.shape_cast %199 : vector<8xf32> to vector<8x1xf32>
    %201 = vector.broadcast %200 : vector<8x1xf32> to vector<8x8xf32>
    %202 = arith.subf %198, %201 : vector<8x8xf32>
    %203 = math.exp %202 : vector<8x8xf32>
    %cst_118 = arith.constant dense<0.000000e+00> : vector<8xf32>
    %204 = vector.multi_reduction <add>, %203, %cst_118 [1] : vector<8x8xf32> to vector<8xf32>
    %205 = vector.shape_cast %204 : vector<8xf32> to vector<8x1xf32>
    %206 = tpu.reciprocal %205 {approx = true} : vector<8x1xf32> -> vector<8x1xf32>
    %207 = vector.broadcast %206 : vector<8x1xf32> to vector<8x8xf32>
    %208 = arith.mulf %203, %207 : vector<8x8xf32>
    %209 = arith.truncf %208 : vector<8x8xf32> to vector<8x8xbf16>
    %210 = arith.truncf %192 : vector<8x8xf32> to vector<8x8xbf16>
    %cst_119 = arith.constant dense<0.000000e+00> : vector<8x8xf32>
    %211 = tpu.matmul %209, %210, %cst_119 {dimension_numbers = #tpu.dot_dimension_numbers<[1], [0], [0], [1], [0, 0, 1, 1], [], []>} : vector<8x8xbf16>, vector<8x8xbf16>, vector<8x8xf32> -> vector<8x8xf32>
    %c0_120 = arith.constant 0 : index
    %c24 = arith.constant 24 : index
    %212 = vector.load %arg14[%c0_120, %c24] : memref<8x32xf32, #tpu.memory_space<vmem>>, vector<8x8xf32>
    tpu.vector_store %arg14[%c0_120, %c24], %211 {strides = array<i32>} : memref<8x32xf32, #tpu.memory_space<vmem>>, vector<8x8xf32>,
    %c0_121 = arith.constant 0 : index
    %c0_122 = arith.constant 0 : index
    %213 = vector.load %arg14[%c0_121, %c0_122] : memref<8x32xf32, #tpu.memory_space<vmem>>, vector<8x32xf32>
    %c0_123 = arith.constant 0 : index
    %c0_124 = arith.constant 0 : index
    %214 = vector.load %arg11[%c0_123, %c0_124] : memref<32x32xbf16, #tpu.memory_space<vmem>>, vector<32x32xbf16>
    %215 = arith.truncf %213 : vector<8x32xf32> to vector<8x32xbf16>
    %cst_125 = arith.constant dense<0.000000e+00> : vector<8x32xf32>
    %216 = tpu.matmul %215, %214, %cst_125 {dimension_numbers = #tpu.dot_dimension_numbers<[1], [0], [0], [1], [0, 0, 1, 1], [], []>} : vector<8x32xbf16>, vector<32x32xbf16>, vector<8x32xf32> -> vector<8x32xf32>
    %217 = arith.addf %2, %216 : vector<8x32xf32>
    %c0_126 = arith.constant 0 : index
    %c0_127 = arith.constant 0 : index
    %218 = vector.load %arg12[%c0_126, %c0_127] : memref<1x32xf32, #tpu.memory_space<vmem>>, vector<1x32xf32>
    %219 = vector.broadcast %218 : vector<1x32xf32> to vector<8x32xf32>
    %220 = arith.addf %217, %219 : vector<8x32xf32>
    %221 = arith.truncf %220 : vector<8x32xf32> to vector<8x32xbf16>
    %c0_128 = arith.constant 0 : index
    %c0_129 = arith.constant 0 : index
    %c0_130 = arith.constant 0 : index
    %222 = vector.load %arg13[%c0_128, %c0_129, %c0_130] : memref<1x8x32xbf16, #tpu.memory_space<vmem>>, vector<1x8x32xbf16>
    %223 = vector.shape_cast %222 : vector<1x8x32xbf16> to vector<8x32xbf16>
    %224 = vector.shape_cast %221 : vector<8x32xbf16> to vector<1x8x32xbf16>
    tpu.vector_store %arg13[%c0_128, %c0_129, %c0_130], %224 {strides = array<i32>} : memref<1x8x32xbf16, #tpu.memory_space<vmem>>, vector<1x8x32xbf16>,
    return
  }
  func.func @transform_0(%arg0: i32) -> (i32, i32, i32) {
    %c0_i32 = arith.constant 0 : i32
    %c0_i32_0 = arith.constant 0 : i32
    %c0_i32_1 = arith.constant 0 : i32
    return %arg0, %c0_i32, %c0_i32_0 : i32, i32, i32
  }
  func.func @transform_1(%arg0: i32) -> (i32, i32, i32) {
    %c0_i32 = arith.constant 0 : i32
    %c0_i32_0 = arith.constant 0 : i32
    %c0_i32_1 = arith.constant 0 : i32
    return %arg0, %c0_i32, %c0_i32_0 : i32, i32, i32
  }
  func.func @transform_2(%arg0: i32) -> (i32, i32) {
    %c0_i32 = arith.constant 0 : i32
    %c0_i32_0 = arith.constant 0 : i32
    %c0_i32_1 = arith.constant 0 : i32
    return %c0_i32, %c0_i32_0 : i32, i32
  }
  func.func @transform_3(%arg0: i32) -> (i32, i32) {
    %c0_i32 = arith.constant 0 : i32
    %c0_i32_0 = arith.constant 0 : i32
    %c0_i32_1 = arith.constant 0 : i32
    return %c0_i32, %c0_i32_0 : i32, i32
  }
  func.func @transform_4(%arg0: i32) -> (i32, i32, i32) {
    %c0_i32 = arith.constant 0 : i32
    %c0_i32_0 = arith.constant 0 : i32
    %c0_i32_1 = arith.constant 0 : i32
    %c0_i32_2 = arith.constant 0 : i32
    return %c0_i32, %c0_i32_0, %c0_i32_1 : i32, i32, i32
  }
  func.func @transform_5(%arg0: i32) -> (i32, i32, i32) {
    %c0_i32 = arith.constant 0 : i32
    %c0_i32_0 = arith.constant 0 : i32
    %c0_i32_1 = arith.constant 0 : i32
    %c0_i32_2 = arith.constant 0 : i32
    return %c0_i32, %c0_i32_0, %c0_i32_1 : i32, i32, i32
  }
  func.func @transform_6(%arg0: i32) -> (i32, i32, i32) {
    %c0_i32 = arith.constant 0 : i32
    %c0_i32_0 = arith.constant 0 : i32
    %c0_i32_1 = arith.constant 0 : i32
    %c0_i32_2 = arith.constant 0 : i32
    return %c0_i32, %c0_i32_0, %c0_i32_1 : i32, i32, i32
  }
  func.func @transform_7(%arg0: i32) -> (i32, i32, i32) {
    %c0_i32 = arith.constant 0 : i32
    %c0_i32_0 = arith.constant 0 : i32
    %c0_i32_1 = arith.constant 0 : i32
    %c0_i32_2 = arith.constant 0 : i32
    return %c0_i32, %c0_i32_0, %c0_i32_1 : i32, i32, i32
  }
  func.func @transform_8(%arg0: i32) -> (i32, i32, i32) {
    %c0_i32 = arith.constant 0 : i32
    %c0_i32_0 = arith.constant 0 : i32
    %c0_i32_1 = arith.constant 0 : i32
    %c0_i32_2 = arith.constant 0 : i32
    return %c0_i32, %c0_i32_0, %c0_i32_1 : i32, i32, i32
  }
  func.func @transform_9(%arg0: i32) -> (i32, i32, i32) {
    %c0_i32 = arith.constant 0 : i32
    %c0_i32_0 = arith.constant 0 : i32
    %c0_i32_1 = arith.constant 0 : i32
    %c0_i32_2 = arith.constant 0 : i32
    return %c0_i32, %c0_i32_0, %c0_i32_1 : i32, i32, i32
  }
  func.func @transform_10(%arg0: i32) -> (i32, i32) {
    %c0_i32 = arith.constant 0 : i32
    %c0_i32_0 = arith.constant 0 : i32
    %c0_i32_1 = arith.constant 0 : i32
    return %c0_i32, %c0_i32_0 : i32, i32
  }
  func.func @transform_11(%arg0: i32) -> (i32, i32) {
    %c0_i32 = arith.constant 0 : i32
    %c0_i32_0 = arith.constant 0 : i32
    %c0_i32_1 = arith.constant 0 : i32
    return %c0_i32, %c0_i32_0 : i32, i32
  }
  func.func @transform_12(%arg0: i32) -> (i32, i32, i32) {
    %c0_i32 = arith.constant 0 : i32
    %c0_i32_0 = arith.constant 0 : i32
    %c0_i32_1 = arith.constant 0 : i32
    return %arg0, %c0_i32, %c0_i32_0 : i32, i32, i32
  }
}

module attributes {stable_mosaic.version = 11 : i64} {
  func.func @_attn_block_kernel(%arg0: i32, %arg1: memref<1x8x32xbf16, #tpu.memory_space<vmem>>, %arg2: memref<1x8x32xbf16, #tpu.memory_space<vmem>>, %arg3: memref<1x1x8xf32, #tpu.memory_space<vmem>>, %arg4: memref<1x32xf32, #tpu.memory_space<vmem>>, %arg5: memref<1x32xf32, #tpu.memory_space<vmem>>, %arg6: memref<4x32x8xbf16, #tpu.memory_space<vmem>>, %arg7: memref<4x1x8xf32, #tpu.memory_space<vmem>>, %arg8: memref<4x32x8xbf16, #tpu.memory_space<vmem>>, %arg9: memref<4x1x8xf32, #tpu.memory_space<vmem>>, %arg10: memref<4x32x8xbf16, #tpu.memory_space<vmem>>, %arg11: memref<4x1x8xf32, #tpu.memory_space<vmem>>, %arg12: memref<32x32xbf16, #tpu.memory_space<vmem>>, %arg13: memref<1x32xf32, #tpu.memory_space<vmem>>, %arg14: memref<1x8x32xbf16, #tpu.memory_space<vmem>>, %arg15: memref<8x32xf32, #tpu.memory_space<vmem>>) attributes {dimension_semantics = [#tpu.dimension_semantics<parallel>], iteration_bounds = array<i64: 2>, scalar_prefetch = 0 : i64, scratch_operands = 1 : i64, tpu.core_type = #tpu.core_type<tc>, window_params = [{transform_indices = @transform_0, window_bounds = array<i64: 1, 8, 32>}, {transform_indices = @transform_1, window_bounds = array<i64: 1, 8, 32>}, {transform_indices = @transform_2, window_bounds = array<i64: 1, 1, 8>}, {pipeline_mode = #tpu.pipeline_mode<synchronous>, transform_indices = @transform_3, window_bounds = array<i64: 1, 32>}, {pipeline_mode = #tpu.pipeline_mode<synchronous>, transform_indices = @transform_4, window_bounds = array<i64: 1, 32>}, {pipeline_mode = #tpu.pipeline_mode<synchronous>, transform_indices = @transform_5, window_bounds = array<i64: 4, 32, 8>}, {pipeline_mode = #tpu.pipeline_mode<synchronous>, transform_indices = @transform_6, window_bounds = array<i64: 4, 1, 8>}, {pipeline_mode = #tpu.pipeline_mode<synchronous>, transform_indices = @transform_7, window_bounds = array<i64: 4, 32, 8>}, {pipeline_mode = #tpu.pipeline_mode<synchronous>, transform_indices = @transform_8, window_bounds = array<i64: 4, 1, 8>}, {pipeline_mode = #tpu.pipeline_mode<synchronous>, transform_indices = @transform_9, window_bounds = array<i64: 4, 32, 8>}, {pipeline_mode = #tpu.pipeline_mode<synchronous>, transform_indices = @transform_10, window_bounds = array<i64: 4, 1, 8>}, {pipeline_mode = #tpu.pipeline_mode<synchronous>, transform_indices = @transform_11, window_bounds = array<i64: 32, 32>}, {pipeline_mode = #tpu.pipeline_mode<synchronous>, transform_indices = @transform_12, window_bounds = array<i64: 1, 32>}, {transform_indices = @transform_13, window_bounds = array<i64: 1, 8, 32>}]} {
    %c0 = arith.constant 0 : index
    %c0_0 = arith.constant 0 : index
    %c0_1 = arith.constant 0 : index
    %0 = vector.load %arg1[%c0, %c0_0, %c0_1] : memref<1x8x32xbf16, #tpu.memory_space<vmem>>, vector<1x8x32xbf16>
    %1 = vector.shape_cast %0 : vector<1x8x32xbf16> to vector<8x32xbf16>
    %2 = arith.extf %1 : vector<8x32xbf16> to vector<8x32xf32>
    %c0_2 = arith.constant 0 : index
    %c0_3 = arith.constant 0 : index
    %3 = vector.load %arg4[%c0_2, %c0_3] : memref<1x32xf32, #tpu.memory_space<vmem>>, vector<1x32xf32>
    %c0_4 = arith.constant 0 : index
    %c0_5 = arith.constant 0 : index
    %4 = vector.load %arg5[%c0_4, %c0_5] : memref<1x32xf32, #tpu.memory_space<vmem>>, vector<1x32xf32>
    %cst = arith.constant dense<0.000000e+00> : vector<8xf32>
    %5 = vector.multi_reduction <add>, %2, %cst [1] : vector<8x32xf32> to vector<8xf32>
    %6 = vector.shape_cast %5 : vector<8xf32> to vector<8x1xf32>
    %cst_6 = arith.constant 3.200000e+01 : f32
    %7 = vector.broadcast %cst_6 : f32 to vector<8x1xf32>
    %8 = arith.divf %6, %7 : vector<8x1xf32>
    %9 = vector.broadcast %8 : vector<8x1xf32> to vector<8x32xf32>
    %10 = arith.subf %2, %9 : vector<8x32xf32>
    %11 = arith.mulf %10, %10 : vector<8x32xf32>
    %cst_7 = arith.constant dense<0.000000e+00> : vector<8xf32>
    %12 = vector.multi_reduction <add>, %11, %cst_7 [1] : vector<8x32xf32> to vector<8xf32>
    %13 = vector.shape_cast %12 : vector<8xf32> to vector<8x1xf32>
    %cst_8 = arith.constant 3.200000e+01 : f32
    %14 = vector.broadcast %cst_8 : f32 to vector<8x1xf32>
    %15 = arith.divf %13, %14 : vector<8x1xf32>
    %16 = vector.broadcast %8 : vector<8x1xf32> to vector<8x32xf32>
    %17 = arith.subf %2, %16 : vector<8x32xf32>
    %cst_9 = arith.constant 9.99999974E-6 : f32
    %18 = vector.broadcast %cst_9 : f32 to vector<8x1xf32>
    %19 = arith.addf %15, %18 : vector<8x1xf32>
    %20 = math.rsqrt %19 : vector<8x1xf32>
    %21 = vector.broadcast %20 : vector<8x1xf32> to vector<8x32xf32>
    %22 = arith.mulf %17, %21 : vector<8x32xf32>
    %23 = vector.broadcast %3 : vector<1x32xf32> to vector<8x32xf32>
    %24 = arith.mulf %22, %23 : vector<8x32xf32>
    %25 = vector.broadcast %4 : vector<1x32xf32> to vector<8x32xf32>
    %26 = arith.addf %24, %25 : vector<8x32xf32>
    %c0_10 = arith.constant 0 : index
    %c0_11 = arith.constant 0 : index
    %c0_12 = arith.constant 0 : index
    %27 = vector.load %arg2[%c0_10, %c0_11, %c0_12] : memref<1x8x32xbf16, #tpu.memory_space<vmem>>, vector<1x8x32xbf16>
    %28 = vector.shape_cast %27 : vector<1x8x32xbf16> to vector<8x32xbf16>
    %29 = arith.extf %28 : vector<8x32xbf16> to vector<8x32xf32>
    %c0_13 = arith.constant 0 : index
    %c0_14 = arith.constant 0 : index
    %c0_15 = arith.constant 0 : index
    %30 = vector.load %arg3[%c0_13, %c0_14, %c0_15] : memref<1x1x8xf32, #tpu.memory_space<vmem>>, vector<1x1x8xf32>
    %31 = vector.shape_cast %30 : vector<1x1x8xf32> to vector<1x8xf32>
    %c0_16 = arith.constant 0 : index
    %c0_17 = arith.constant 0 : index
    %c0_18 = arith.constant 0 : index
    %32 = vector.load %arg6[%c0_16, %c0_17, %c0_18] : memref<4x32x8xbf16, #tpu.memory_space<vmem>>, vector<1x32x8xbf16>
    %33 = vector.shape_cast %32 : vector<1x32x8xbf16> to vector<32x8xbf16>
    %34 = arith.truncf %26 : vector<8x32xf32> to vector<8x32xbf16>
    %cst_19 = arith.constant dense<0.000000e+00> : vector<8x8xf32>
    %35 = tpu.matmul %34, %33, %cst_19 {dimension_numbers = #tpu.dot_dimension_numbers<[1], [0], [0], [1], [0, 0, 1, 1], [], []>} : vector<8x32xbf16>, vector<32x8xbf16>, vector<8x8xf32> -> vector<8x8xf32>
    %c0_20 = arith.constant 0 : index
    %c0_21 = arith.constant 0 : index
    %c0_22 = arith.constant 0 : index
    %36 = vector.load %arg7[%c0_20, %c0_21, %c0_22] : memref<4x1x8xf32, #tpu.memory_space<vmem>>, vector<1x1x8xf32>
    %37 = vector.shape_cast %36 : vector<1x1x8xf32> to vector<1x8xf32>
    %38 = vector.broadcast %37 : vector<1x8xf32> to vector<8x8xf32>
    %39 = arith.addf %35, %38 : vector<8x8xf32>
    %c0_23 = arith.constant 0 : index
    %c0_24 = arith.constant 0 : index
    %c0_25 = arith.constant 0 : index
    %40 = vector.load %arg8[%c0_23, %c0_24, %c0_25] : memref<4x32x8xbf16, #tpu.memory_space<vmem>>, vector<1x32x8xbf16>
    %41 = vector.shape_cast %40 : vector<1x32x8xbf16> to vector<32x8xbf16>
    %42 = arith.truncf %29 : vector<8x32xf32> to vector<8x32xbf16>
    %cst_26 = arith.constant dense<0.000000e+00> : vector<8x8xf32>
    %43 = tpu.matmul %42, %41, %cst_26 {dimension_numbers = #tpu.dot_dimension_numbers<[1], [0], [0], [1], [0, 0, 1, 1], [], []>} : vector<8x32xbf16>, vector<32x8xbf16>, vector<8x8xf32> -> vector<8x8xf32>
    %c0_27 = arith.constant 0 : index
    %c0_28 = arith.constant 0 : index
    %c0_29 = arith.constant 0 : index
    %44 = vector.load %arg9[%c0_27, %c0_28, %c0_29] : memref<4x1x8xf32, #tpu.memory_space<vmem>>, vector<1x1x8xf32>
    %45 = vector.shape_cast %44 : vector<1x1x8xf32> to vector<1x8xf32>
    %46 = vector.broadcast %45 : vector<1x8xf32> to vector<8x8xf32>
    %47 = arith.addf %43, %46 : vector<8x8xf32>
    %c0_30 = arith.constant 0 : index
    %c0_31 = arith.constant 0 : index
    %c0_32 = arith.constant 0 : index
    %48 = vector.load %arg10[%c0_30, %c0_31, %c0_32] : memref<4x32x8xbf16, #tpu.memory_space<vmem>>, vector<1x32x8xbf16>
    %49 = vector.shape_cast %48 : vector<1x32x8xbf16> to vector<32x8xbf16>
    %50 = arith.truncf %29 : vector<8x32xf32> to vector<8x32xbf16>
    %cst_33 = arith.constant dense<0.000000e+00> : vector<8x8xf32>
    %51 = tpu.matmul %50, %49, %cst_33 {dimension_numbers = #tpu.dot_dimension_numbers<[1], [0], [0], [1], [0, 0, 1, 1], [], []>} : vector<8x32xbf16>, vector<32x8xbf16>, vector<8x8xf32> -> vector<8x8xf32>
    %c0_34 = arith.constant 0 : index
    %c0_35 = arith.constant 0 : index
    %c0_36 = arith.constant 0 : index
    %52 = vector.load %arg11[%c0_34, %c0_35, %c0_36] : memref<4x1x8xf32, #tpu.memory_space<vmem>>, vector<1x1x8xf32>
    %53 = vector.shape_cast %52 : vector<1x1x8xf32> to vector<1x8xf32>
    %54 = vector.broadcast %53 : vector<1x8xf32> to vector<8x8xf32>
    %55 = arith.addf %51, %54 : vector<8x8xf32>
    %56 = arith.truncf %39 : vector<8x8xf32> to vector<8x8xbf16>
    %57 = arith.truncf %47 : vector<8x8xf32> to vector<8x8xbf16>
    %cst_37 = arith.constant dense<0.000000e+00> : vector<8x8xf32>
    %58 = tpu.matmul %56, %57, %cst_37 {dimension_numbers = #tpu.dot_dimension_numbers<[1], [1], [0], [0], [0, 0, 1, 0], [], []>} : vector<8x8xbf16>, vector<8x8xbf16>, vector<8x8xf32> -> vector<8x8xf32>
    %cst_38 = arith.constant 0.353553385 : f32
    %59 = vector.broadcast %cst_38 : f32 to vector<8x8xf32>
    %60 = arith.mulf %58, %59 : vector<8x8xf32>
    %61 = vector.broadcast %31 : vector<1x8xf32> to vector<8x8xf32>
    %62 = arith.addf %60, %61 : vector<8x8xf32>
    %cst_39 = arith.constant dense<0xFF800000> : vector<8xf32>
    %63 = vector.multi_reduction <maximumf>, %62, %cst_39 [1] : vector<8x8xf32> to vector<8xf32>
    %64 = vector.shape_cast %63 : vector<8xf32> to vector<8x1xf32>
    %65 = vector.broadcast %64 : vector<8x1xf32> to vector<8x8xf32>
    %66 = arith.subf %62, %65 : vector<8x8xf32>
    %67 = math.exp %66 : vector<8x8xf32>
    %cst_40 = arith.constant dense<0.000000e+00> : vector<8xf32>
    %68 = vector.multi_reduction <add>, %67, %cst_40 [1] : vector<8x8xf32> to vector<8xf32>
    %69 = vector.shape_cast %68 : vector<8xf32> to vector<8x1xf32>
    %70 = tpu.reciprocal %69 {approx = true} : vector<8x1xf32> -> vector<8x1xf32>
    %71 = vector.broadcast %70 : vector<8x1xf32> to vector<8x8xf32>
    %72 = arith.mulf %67, %71 : vector<8x8xf32>
    %73 = arith.truncf %72 : vector<8x8xf32> to vector<8x8xbf16>
    %74 = arith.truncf %55 : vector<8x8xf32> to vector<8x8xbf16>
    %cst_41 = arith.constant dense<0.000000e+00> : vector<8x8xf32>
    %75 = tpu.matmul %73, %74, %cst_41 {dimension_numbers = #tpu.dot_dimension_numbers<[1], [0], [0], [1], [0, 0, 1, 1], [], []>} : vector<8x8xbf16>, vector<8x8xbf16>, vector<8x8xf32> -> vector<8x8xf32>
    %c0_42 = arith.constant 0 : index
    %c0_43 = arith.constant 0 : index
    %76 = vector.load %arg15[%c0_42, %c0_43] : memref<8x32xf32, #tpu.memory_space<vmem>>, vector<8x8xf32>
    tpu.vector_store %arg15[%c0_42, %c0_43], %75 {strides = array<i32>} : memref<8x32xf32, #tpu.memory_space<vmem>>, vector<8x8xf32>,
    %c1 = arith.constant 1 : index
    %c0_44 = arith.constant 0 : index
    %c0_45 = arith.constant 0 : index
    %77 = vector.load %arg6[%c1, %c0_44, %c0_45] : memref<4x32x8xbf16, #tpu.memory_space<vmem>>, vector<1x32x8xbf16>
    %78 = vector.shape_cast %77 : vector<1x32x8xbf16> to vector<32x8xbf16>
    %79 = arith.truncf %26 : vector<8x32xf32> to vector<8x32xbf16>
    %cst_46 = arith.constant dense<0.000000e+00> : vector<8x8xf32>
    %80 = tpu.matmul %79, %78, %cst_46 {dimension_numbers = #tpu.dot_dimension_numbers<[1], [0], [0], [1], [0, 0, 1, 1], [], []>} : vector<8x32xbf16>, vector<32x8xbf16>, vector<8x8xf32> -> vector<8x8xf32>
    %c1_47 = arith.constant 1 : index
    %c0_48 = arith.constant 0 : index
    %c0_49 = arith.constant 0 : index
    %81 = vector.load %arg7[%c1_47, %c0_48, %c0_49] : memref<4x1x8xf32, #tpu.memory_space<vmem>>, vector<1x1x8xf32>
    %82 = vector.shape_cast %81 : vector<1x1x8xf32> to vector<1x8xf32>
    %83 = vector.broadcast %82 : vector<1x8xf32> to vector<8x8xf32>
    %84 = arith.addf %80, %83 : vector<8x8xf32>
    %c1_50 = arith.constant 1 : index
    %c0_51 = arith.constant 0 : index
    %c0_52 = arith.constant 0 : index
    %85 = vector.load %arg8[%c1_50, %c0_51, %c0_52] : memref<4x32x8xbf16, #tpu.memory_space<vmem>>, vector<1x32x8xbf16>
    %86 = vector.shape_cast %85 : vector<1x32x8xbf16> to vector<32x8xbf16>
    %87 = arith.truncf %29 : vector<8x32xf32> to vector<8x32xbf16>
    %cst_53 = arith.constant dense<0.000000e+00> : vector<8x8xf32>
    %88 = tpu.matmul %87, %86, %cst_53 {dimension_numbers = #tpu.dot_dimension_numbers<[1], [0], [0], [1], [0, 0, 1, 1], [], []>} : vector<8x32xbf16>, vector<32x8xbf16>, vector<8x8xf32> -> vector<8x8xf32>
    %c1_54 = arith.constant 1 : index
    %c0_55 = arith.constant 0 : index
    %c0_56 = arith.constant 0 : index
    %89 = vector.load %arg9[%c1_54, %c0_55, %c0_56] : memref<4x1x8xf32, #tpu.memory_space<vmem>>, vector<1x1x8xf32>
    %90 = vector.shape_cast %89 : vector<1x1x8xf32> to vector<1x8xf32>
    %91 = vector.broadcast %90 : vector<1x8xf32> to vector<8x8xf32>
    %92 = arith.addf %88, %91 : vector<8x8xf32>
    %c1_57 = arith.constant 1 : index
    %c0_58 = arith.constant 0 : index
    %c0_59 = arith.constant 0 : index
    %93 = vector.load %arg10[%c1_57, %c0_58, %c0_59] : memref<4x32x8xbf16, #tpu.memory_space<vmem>>, vector<1x32x8xbf16>
    %94 = vector.shape_cast %93 : vector<1x32x8xbf16> to vector<32x8xbf16>
    %95 = arith.truncf %29 : vector<8x32xf32> to vector<8x32xbf16>
    %cst_60 = arith.constant dense<0.000000e+00> : vector<8x8xf32>
    %96 = tpu.matmul %95, %94, %cst_60 {dimension_numbers = #tpu.dot_dimension_numbers<[1], [0], [0], [1], [0, 0, 1, 1], [], []>} : vector<8x32xbf16>, vector<32x8xbf16>, vector<8x8xf32> -> vector<8x8xf32>
    %c1_61 = arith.constant 1 : index
    %c0_62 = arith.constant 0 : index
    %c0_63 = arith.constant 0 : index
    %97 = vector.load %arg11[%c1_61, %c0_62, %c0_63] : memref<4x1x8xf32, #tpu.memory_space<vmem>>, vector<1x1x8xf32>
    %98 = vector.shape_cast %97 : vector<1x1x8xf32> to vector<1x8xf32>
    %99 = vector.broadcast %98 : vector<1x8xf32> to vector<8x8xf32>
    %100 = arith.addf %96, %99 : vector<8x8xf32>
    %101 = arith.truncf %84 : vector<8x8xf32> to vector<8x8xbf16>
    %102 = arith.truncf %92 : vector<8x8xf32> to vector<8x8xbf16>
    %cst_64 = arith.constant dense<0.000000e+00> : vector<8x8xf32>
    %103 = tpu.matmul %101, %102, %cst_64 {dimension_numbers = #tpu.dot_dimension_numbers<[1], [1], [0], [0], [0, 0, 1, 0], [], []>} : vector<8x8xbf16>, vector<8x8xbf16>, vector<8x8xf32> -> vector<8x8xf32>
    %cst_65 = arith.constant 0.353553385 : f32
    %104 = vector.broadcast %cst_65 : f32 to vector<8x8xf32>
    %105 = arith.mulf %103, %104 : vector<8x8xf32>
    %106 = vector.broadcast %31 : vector<1x8xf32> to vector<8x8xf32>
    %107 = arith.addf %105, %106 : vector<8x8xf32>
    %cst_66 = arith.constant dense<0xFF800000> : vector<8xf32>
    %108 = vector.multi_reduction <maximumf>, %107, %cst_66 [1] : vector<8x8xf32> to vector<8xf32>
    %109 = vector.shape_cast %108 : vector<8xf32> to vector<8x1xf32>
    %110 = vector.broadcast %109 : vector<8x1xf32> to vector<8x8xf32>
    %111 = arith.subf %107, %110 : vector<8x8xf32>
    %112 = math.exp %111 : vector<8x8xf32>
    %cst_67 = arith.constant dense<0.000000e+00> : vector<8xf32>
    %113 = vector.multi_reduction <add>, %112, %cst_67 [1] : vector<8x8xf32> to vector<8xf32>
    %114 = vector.shape_cast %113 : vector<8xf32> to vector<8x1xf32>
    %115 = tpu.reciprocal %114 {approx = true} : vector<8x1xf32> -> vector<8x1xf32>
    %116 = vector.broadcast %115 : vector<8x1xf32> to vector<8x8xf32>
    %117 = arith.mulf %112, %116 : vector<8x8xf32>
    %118 = arith.truncf %117 : vector<8x8xf32> to vector<8x8xbf16>
    %119 = arith.truncf %100 : vector<8x8xf32> to vector<8x8xbf16>
    %cst_68 = arith.constant dense<0.000000e+00> : vector<8x8xf32>
    %120 = tpu.matmul %118, %119, %cst_68 {dimension_numbers = #tpu.dot_dimension_numbers<[1], [0], [0], [1], [0, 0, 1, 1], [], []>} : vector<8x8xbf16>, vector<8x8xbf16>, vector<8x8xf32> -> vector<8x8xf32>
    %c0_69 = arith.constant 0 : index
    %c8 = arith.constant 8 : index
    %121 = vector.load %arg15[%c0_69, %c8] : memref<8x32xf32, #tpu.memory_space<vmem>>, vector<8x8xf32>
    tpu.vector_store %arg15[%c0_69, %c8], %120 {strides = array<i32>} : memref<8x32xf32, #tpu.memory_space<vmem>>, vector<8x8xf32>,
    %c2 = arith.constant 2 : index
    %c0_70 = arith.constant 0 : index
    %c0_71 = arith.constant 0 : index
    %122 = vector.load %arg6[%c2, %c0_70, %c0_71] : memref<4x32x8xbf16, #tpu.memory_space<vmem>>, vector<1x32x8xbf16>
    %123 = vector.shape_cast %122 : vector<1x32x8xbf16> to vector<32x8xbf16>
    %124 = arith.truncf %26 : vector<8x32xf32> to vector<8x32xbf16>
    %cst_72 = arith.constant dense<0.000000e+00> : vector<8x8xf32>
    %125 = tpu.matmul %124, %123, %cst_72 {dimension_numbers = #tpu.dot_dimension_numbers<[1], [0], [0], [1], [0, 0, 1, 1], [], []>} : vector<8x32xbf16>, vector<32x8xbf16>, vector<8x8xf32> -> vector<8x8xf32>
    %c2_73 = arith.constant 2 : index
    %c0_74 = arith.constant 0 : index
    %c0_75 = arith.constant 0 : index
    %126 = vector.load %arg7[%c2_73, %c0_74, %c0_75] : memref<4x1x8xf32, #tpu.memory_space<vmem>>, vector<1x1x8xf32>
    %127 = vector.shape_cast %126 : vector<1x1x8xf32> to vector<1x8xf32>
    %128 = vector.broadcast %127 : vector<1x8xf32> to vector<8x8xf32>
    %129 = arith.addf %125, %128 : vector<8x8xf32>
    %c2_76 = arith.constant 2 : index
    %c0_77 = arith.constant 0 : index
    %c0_78 = arith.constant 0 : index
    %130 = vector.load %arg8[%c2_76, %c0_77, %c0_78] : memref<4x32x8xbf16, #tpu.memory_space<vmem>>, vector<1x32x8xbf16>
    %131 = vector.shape_cast %130 : vector<1x32x8xbf16> to vector<32x8xbf16>
    %132 = arith.truncf %29 : vector<8x32xf32> to vector<8x32xbf16>
    %cst_79 = arith.constant dense<0.000000e+00> : vector<8x8xf32>
    %133 = tpu.matmul %132, %131, %cst_79 {dimension_numbers = #tpu.dot_dimension_numbers<[1], [0], [0], [1], [0, 0, 1, 1], [], []>} : vector<8x32xbf16>, vector<32x8xbf16>, vector<8x8xf32> -> vector<8x8xf32>
    %c2_80 = arith.constant 2 : index
    %c0_81 = arith.constant 0 : index
    %c0_82 = arith.constant 0 : index
    %134 = vector.load %arg9[%c2_80, %c0_81, %c0_82] : memref<4x1x8xf32, #tpu.memory_space<vmem>>, vector<1x1x8xf32>
    %135 = vector.shape_cast %134 : vector<1x1x8xf32> to vector<1x8xf32>
    %136 = vector.broadcast %135 : vector<1x8xf32> to vector<8x8xf32>
    %137 = arith.addf %133, %136 : vector<8x8xf32>
    %c2_83 = arith.constant 2 : index
    %c0_84 = arith.constant 0 : index
    %c0_85 = arith.constant 0 : index
    %138 = vector.load %arg10[%c2_83, %c0_84, %c0_85] : memref<4x32x8xbf16, #tpu.memory_space<vmem>>, vector<1x32x8xbf16>
    %139 = vector.shape_cast %138 : vector<1x32x8xbf16> to vector<32x8xbf16>
    %140 = arith.truncf %29 : vector<8x32xf32> to vector<8x32xbf16>
    %cst_86 = arith.constant dense<0.000000e+00> : vector<8x8xf32>
    %141 = tpu.matmul %140, %139, %cst_86 {dimension_numbers = #tpu.dot_dimension_numbers<[1], [0], [0], [1], [0, 0, 1, 1], [], []>} : vector<8x32xbf16>, vector<32x8xbf16>, vector<8x8xf32> -> vector<8x8xf32>
    %c2_87 = arith.constant 2 : index
    %c0_88 = arith.constant 0 : index
    %c0_89 = arith.constant 0 : index
    %142 = vector.load %arg11[%c2_87, %c0_88, %c0_89] : memref<4x1x8xf32, #tpu.memory_space<vmem>>, vector<1x1x8xf32>
    %143 = vector.shape_cast %142 : vector<1x1x8xf32> to vector<1x8xf32>
    %144 = vector.broadcast %143 : vector<1x8xf32> to vector<8x8xf32>
    %145 = arith.addf %141, %144 : vector<8x8xf32>
    %146 = arith.truncf %129 : vector<8x8xf32> to vector<8x8xbf16>
    %147 = arith.truncf %137 : vector<8x8xf32> to vector<8x8xbf16>
    %cst_90 = arith.constant dense<0.000000e+00> : vector<8x8xf32>
    %148 = tpu.matmul %146, %147, %cst_90 {dimension_numbers = #tpu.dot_dimension_numbers<[1], [1], [0], [0], [0, 0, 1, 0], [], []>} : vector<8x8xbf16>, vector<8x8xbf16>, vector<8x8xf32> -> vector<8x8xf32>
    %cst_91 = arith.constant 0.353553385 : f32
    %149 = vector.broadcast %cst_91 : f32 to vector<8x8xf32>
    %150 = arith.mulf %148, %149 : vector<8x8xf32>
    %151 = vector.broadcast %31 : vector<1x8xf32> to vector<8x8xf32>
    %152 = arith.addf %150, %151 : vector<8x8xf32>
    %cst_92 = arith.constant dense<0xFF800000> : vector<8xf32>
    %153 = vector.multi_reduction <maximumf>, %152, %cst_92 [1] : vector<8x8xf32> to vector<8xf32>
    %154 = vector.shape_cast %153 : vector<8xf32> to vector<8x1xf32>
    %155 = vector.broadcast %154 : vector<8x1xf32> to vector<8x8xf32>
    %156 = arith.subf %152, %155 : vector<8x8xf32>
    %157 = math.exp %156 : vector<8x8xf32>
    %cst_93 = arith.constant dense<0.000000e+00> : vector<8xf32>
    %158 = vector.multi_reduction <add>, %157, %cst_93 [1] : vector<8x8xf32> to vector<8xf32>
    %159 = vector.shape_cast %158 : vector<8xf32> to vector<8x1xf32>
    %160 = tpu.reciprocal %159 {approx = true} : vector<8x1xf32> -> vector<8x1xf32>
    %161 = vector.broadcast %160 : vector<8x1xf32> to vector<8x8xf32>
    %162 = arith.mulf %157, %161 : vector<8x8xf32>
    %163 = arith.truncf %162 : vector<8x8xf32> to vector<8x8xbf16>
    %164 = arith.truncf %145 : vector<8x8xf32> to vector<8x8xbf16>
    %cst_94 = arith.constant dense<0.000000e+00> : vector<8x8xf32>
    %165 = tpu.matmul %163, %164, %cst_94 {dimension_numbers = #tpu.dot_dimension_numbers<[1], [0], [0], [1], [0, 0, 1, 1], [], []>} : vector<8x8xbf16>, vector<8x8xbf16>, vector<8x8xf32> -> vector<8x8xf32>
    %c0_95 = arith.constant 0 : index
    %c16 = arith.constant 16 : index
    %166 = vector.load %arg15[%c0_95, %c16] : memref<8x32xf32, #tpu.memory_space<vmem>>, vector<8x8xf32>
    tpu.vector_store %arg15[%c0_95, %c16], %165 {strides = array<i32>} : memref<8x32xf32, #tpu.memory_space<vmem>>, vector<8x8xf32>,
    %c3 = arith.constant 3 : index
    %c0_96 = arith.constant 0 : index
    %c0_97 = arith.constant 0 : index
    %167 = vector.load %arg6[%c3, %c0_96, %c0_97] : memref<4x32x8xbf16, #tpu.memory_space<vmem>>, vector<1x32x8xbf16>
    %168 = vector.shape_cast %167 : vector<1x32x8xbf16> to vector<32x8xbf16>
    %169 = arith.truncf %26 : vector<8x32xf32> to vector<8x32xbf16>
    %cst_98 = arith.constant dense<0.000000e+00> : vector<8x8xf32>
    %170 = tpu.matmul %169, %168, %cst_98 {dimension_numbers = #tpu.dot_dimension_numbers<[1], [0], [0], [1], [0, 0, 1, 1], [], []>} : vector<8x32xbf16>, vector<32x8xbf16>, vector<8x8xf32> -> vector<8x8xf32>
    %c3_99 = arith.constant 3 : index
    %c0_100 = arith.constant 0 : index
    %c0_101 = arith.constant 0 : index
    %171 = vector.load %arg7[%c3_99, %c0_100, %c0_101] : memref<4x1x8xf32, #tpu.memory_space<vmem>>, vector<1x1x8xf32>
    %172 = vector.shape_cast %171 : vector<1x1x8xf32> to vector<1x8xf32>
    %173 = vector.broadcast %172 : vector<1x8xf32> to vector<8x8xf32>
    %174 = arith.addf %170, %173 : vector<8x8xf32>
    %c3_102 = arith.constant 3 : index
    %c0_103 = arith.constant 0 : index
    %c0_104 = arith.constant 0 : index
    %175 = vector.load %arg8[%c3_102, %c0_103, %c0_104] : memref<4x32x8xbf16, #tpu.memory_space<vmem>>, vector<1x32x8xbf16>
    %176 = vector.shape_cast %175 : vector<1x32x8xbf16> to vector<32x8xbf16>
    %177 = arith.truncf %29 : vector<8x32xf32> to vector<8x32xbf16>
    %cst_105 = arith.constant dense<0.000000e+00> : vector<8x8xf32>
    %178 = tpu.matmul %177, %176, %cst_105 {dimension_numbers = #tpu.dot_dimension_numbers<[1], [0], [0], [1], [0, 0, 1, 1], [], []>} : vector<8x32xbf16>, vector<32x8xbf16>, vector<8x8xf32> -> vector<8x8xf32>
    %c3_106 = arith.constant 3 : index
    %c0_107 = arith.constant 0 : index
    %c0_108 = arith.constant 0 : index
    %179 = vector.load %arg9[%c3_106, %c0_107, %c0_108] : memref<4x1x8xf32, #tpu.memory_space<vmem>>, vector<1x1x8xf32>
    %180 = vector.shape_cast %179 : vector<1x1x8xf32> to vector<1x8xf32>
    %181 = vector.broadcast %180 : vector<1x8xf32> to vector<8x8xf32>
    %182 = arith.addf %178, %181 : vector<8x8xf32>
    %c3_109 = arith.constant 3 : index
    %c0_110 = arith.constant 0 : index
    %c0_111 = arith.constant 0 : index
    %183 = vector.load %arg10[%c3_109, %c0_110, %c0_111] : memref<4x32x8xbf16, #tpu.memory_space<vmem>>, vector<1x32x8xbf16>
    %184 = vector.shape_cast %183 : vector<1x32x8xbf16> to vector<32x8xbf16>
    %185 = arith.truncf %29 : vector<8x32xf32> to vector<8x32xbf16>
    %cst_112 = arith.constant dense<0.000000e+00> : vector<8x8xf32>
    %186 = tpu.matmul %185, %184, %cst_112 {dimension_numbers = #tpu.dot_dimension_numbers<[1], [0], [0], [1], [0, 0, 1, 1], [], []>} : vector<8x32xbf16>, vector<32x8xbf16>, vector<8x8xf32> -> vector<8x8xf32>
    %c3_113 = arith.constant 3 : index
    %c0_114 = arith.constant 0 : index
    %c0_115 = arith.constant 0 : index
    %187 = vector.load %arg11[%c3_113, %c0_114, %c0_115] : memref<4x1x8xf32, #tpu.memory_space<vmem>>, vector<1x1x8xf32>
    %188 = vector.shape_cast %187 : vector<1x1x8xf32> to vector<1x8xf32>
    %189 = vector.broadcast %188 : vector<1x8xf32> to vector<8x8xf32>
    %190 = arith.addf %186, %189 : vector<8x8xf32>
    %191 = arith.truncf %174 : vector<8x8xf32> to vector<8x8xbf16>
    %192 = arith.truncf %182 : vector<8x8xf32> to vector<8x8xbf16>
    %cst_116 = arith.constant dense<0.000000e+00> : vector<8x8xf32>
    %193 = tpu.matmul %191, %192, %cst_116 {dimension_numbers = #tpu.dot_dimension_numbers<[1], [1], [0], [0], [0, 0, 1, 0], [], []>} : vector<8x8xbf16>, vector<8x8xbf16>, vector<8x8xf32> -> vector<8x8xf32>
    %cst_117 = arith.constant 0.353553385 : f32
    %194 = vector.broadcast %cst_117 : f32 to vector<8x8xf32>
    %195 = arith.mulf %193, %194 : vector<8x8xf32>
    %196 = vector.broadcast %31 : vector<1x8xf32> to vector<8x8xf32>
    %197 = arith.addf %195, %196 : vector<8x8xf32>
    %cst_118 = arith.constant dense<0xFF800000> : vector<8xf32>
    %198 = vector.multi_reduction <maximumf>, %197, %cst_118 [1] : vector<8x8xf32> to vector<8xf32>
    %199 = vector.shape_cast %198 : vector<8xf32> to vector<8x1xf32>
    %200 = vector.broadcast %199 : vector<8x1xf32> to vector<8x8xf32>
    %201 = arith.subf %197, %200 : vector<8x8xf32>
    %202 = math.exp %201 : vector<8x8xf32>
    %cst_119 = arith.constant dense<0.000000e+00> : vector<8xf32>
    %203 = vector.multi_reduction <add>, %202, %cst_119 [1] : vector<8x8xf32> to vector<8xf32>
    %204 = vector.shape_cast %203 : vector<8xf32> to vector<8x1xf32>
    %205 = tpu.reciprocal %204 {approx = true} : vector<8x1xf32> -> vector<8x1xf32>
    %206 = vector.broadcast %205 : vector<8x1xf32> to vector<8x8xf32>
    %207 = arith.mulf %202, %206 : vector<8x8xf32>
    %208 = arith.truncf %207 : vector<8x8xf32> to vector<8x8xbf16>
    %209 = arith.truncf %190 : vector<8x8xf32> to vector<8x8xbf16>
    %cst_120 = arith.constant dense<0.000000e+00> : vector<8x8xf32>
    %210 = tpu.matmul %208, %209, %cst_120 {dimension_numbers = #tpu.dot_dimension_numbers<[1], [0], [0], [1], [0, 0, 1, 1], [], []>} : vector<8x8xbf16>, vector<8x8xbf16>, vector<8x8xf32> -> vector<8x8xf32>
    %c0_121 = arith.constant 0 : index
    %c24 = arith.constant 24 : index
    %211 = vector.load %arg15[%c0_121, %c24] : memref<8x32xf32, #tpu.memory_space<vmem>>, vector<8x8xf32>
    tpu.vector_store %arg15[%c0_121, %c24], %210 {strides = array<i32>} : memref<8x32xf32, #tpu.memory_space<vmem>>, vector<8x8xf32>,
    %c0_122 = arith.constant 0 : index
    %c0_123 = arith.constant 0 : index
    %212 = vector.load %arg15[%c0_122, %c0_123] : memref<8x32xf32, #tpu.memory_space<vmem>>, vector<8x32xf32>
    %c0_124 = arith.constant 0 : index
    %c0_125 = arith.constant 0 : index
    %213 = vector.load %arg12[%c0_124, %c0_125] : memref<32x32xbf16, #tpu.memory_space<vmem>>, vector<32x32xbf16>
    %214 = arith.truncf %212 : vector<8x32xf32> to vector<8x32xbf16>
    %cst_126 = arith.constant dense<0.000000e+00> : vector<8x32xf32>
    %215 = tpu.matmul %214, %213, %cst_126 {dimension_numbers = #tpu.dot_dimension_numbers<[1], [0], [0], [1], [0, 0, 1, 1], [], []>} : vector<8x32xbf16>, vector<32x32xbf16>, vector<8x32xf32> -> vector<8x32xf32>
    %216 = arith.addf %2, %215 : vector<8x32xf32>
    %c0_127 = arith.constant 0 : index
    %c0_128 = arith.constant 0 : index
    %217 = vector.load %arg13[%c0_127, %c0_128] : memref<1x32xf32, #tpu.memory_space<vmem>>, vector<1x32xf32>
    %218 = vector.broadcast %217 : vector<1x32xf32> to vector<8x32xf32>
    %219 = arith.addf %216, %218 : vector<8x32xf32>
    %220 = arith.truncf %219 : vector<8x32xf32> to vector<8x32xbf16>
    %c0_129 = arith.constant 0 : index
    %c0_130 = arith.constant 0 : index
    %c0_131 = arith.constant 0 : index
    %221 = vector.load %arg14[%c0_129, %c0_130, %c0_131] : memref<1x8x32xbf16, #tpu.memory_space<vmem>>, vector<1x8x32xbf16>
    %222 = vector.shape_cast %221 : vector<1x8x32xbf16> to vector<8x32xbf16>
    %223 = vector.shape_cast %220 : vector<8x32xbf16> to vector<1x8x32xbf16>
    tpu.vector_store %arg14[%c0_129, %c0_130, %c0_131], %223 {strides = array<i32>} : memref<1x8x32xbf16, #tpu.memory_space<vmem>>, vector<1x8x32xbf16>,
    return
  }
  func.func @transform_0(%arg0: i32) -> (i32, i32, i32) {
    %c0_i32 = arith.constant 0 : i32
    %c0_i32_0 = arith.constant 0 : i32
    %c0_i32_1 = arith.constant 0 : i32
    return %arg0, %c0_i32, %c0_i32_0 : i32, i32, i32
  }
  func.func @transform_1(%arg0: i32) -> (i32, i32, i32) {
    %c0_i32 = arith.constant 0 : i32
    %c0_i32_0 = arith.constant 0 : i32
    %c0_i32_1 = arith.constant 0 : i32
    return %arg0, %c0_i32, %c0_i32_0 : i32, i32, i32
  }
  func.func @transform_2(%arg0: i32) -> (i32, i32, i32) {
    %c0_i32 = arith.constant 0 : i32
    %c0_i32_0 = arith.constant 0 : i32
    %c0_i32_1 = arith.constant 0 : i32
    return %arg0, %c0_i32, %c0_i32_0 : i32, i32, i32
  }
  func.func @transform_3(%arg0: i32) -> (i32, i32) {
    %c0_i32 = arith.constant 0 : i32
    %c0_i32_0 = arith.constant 0 : i32
    %c0_i32_1 = arith.constant 0 : i32
    return %c0_i32, %c0_i32_0 : i32, i32
  }
  func.func @transform_4(%arg0: i32) -> (i32, i32) {
    %c0_i32 = arith.constant 0 : i32
    %c0_i32_0 = arith.constant 0 : i32
    %c0_i32_1 = arith.constant 0 : i32
    return %c0_i32, %c0_i32_0 : i32, i32
  }
  func.func @transform_5(%arg0: i32) -> (i32, i32, i32) {
    %c0_i32 = arith.constant 0 : i32
    %c0_i32_0 = arith.constant 0 : i32
    %c0_i32_1 = arith.constant 0 : i32
    %c0_i32_2 = arith.constant 0 : i32
    return %c0_i32, %c0_i32_0, %c0_i32_1 : i32, i32, i32
  }
  func.func @transform_6(%arg0: i32) -> (i32, i32, i32) {
    %c0_i32 = arith.constant 0 : i32
    %c0_i32_0 = arith.constant 0 : i32
    %c0_i32_1 = arith.constant 0 : i32
    %c0_i32_2 = arith.constant 0 : i32
    return %c0_i32, %c0_i32_0, %c0_i32_1 : i32, i32, i32
  }
  func.func @transform_7(%arg0: i32) -> (i32, i32, i32) {
    %c0_i32 = arith.constant 0 : i32
    %c0_i32_0 = arith.constant 0 : i32
    %c0_i32_1 = arith.constant 0 : i32
    %c0_i32_2 = arith.constant 0 : i32
    return %c0_i32, %c0_i32_0, %c0_i32_1 : i32, i32, i32
  }
  func.func @transform_8(%arg0: i32) -> (i32, i32, i32) {
    %c0_i32 = arith.constant 0 : i32
    %c0_i32_0 = arith.constant 0 : i32
    %c0_i32_1 = arith.constant 0 : i32
    %c0_i32_2 = arith.constant 0 : i32
    return %c0_i32, %c0_i32_0, %c0_i32_1 : i32, i32, i32
  }
  func.func @transform_9(%arg0: i32) -> (i32, i32, i32) {
    %c0_i32 = arith.constant 0 : i32
    %c0_i32_0 = arith.constant 0 : i32
    %c0_i32_1 = arith.constant 0 : i32
    %c0_i32_2 = arith.constant 0 : i32
    return %c0_i32, %c0_i32_0, %c0_i32_1 : i32, i32, i32
  }
  func.func @transform_10(%arg0: i32) -> (i32, i32, i32) {
    %c0_i32 = arith.constant 0 : i32
    %c0_i32_0 = arith.constant 0 : i32
    %c0_i32_1 = arith.constant 0 : i32
    %c0_i32_2 = arith.constant 0 : i32
    return %c0_i32, %c0_i32_0, %c0_i32_1 : i32, i32, i32
  }
  func.func @transform_11(%arg0: i32) -> (i32, i32) {
    %c0_i32 = arith.constant 0 : i32
    %c0_i32_0 = arith.constant 0 : i32
    %c0_i32_1 = arith.constant 0 : i32
    return %c0_i32, %c0_i32_0 : i32, i32
  }
  func.func @transform_12(%arg0: i32) -> (i32, i32) {
    %c0_i32 = arith.constant 0 : i32
    %c0_i32_0 = arith.constant 0 : i32
    %c0_i32_1 = arith.constant 0 : i32
    return %c0_i32, %c0_i32_0 : i32, i32
  }
  func.func @transform_13(%arg0: i32) -> (i32, i32, i32) {
    %c0_i32 = arith.constant 0 : i32
    %c0_i32_0 = arith.constant 0 : i32
    %c0_i32_1 = arith.constant 0 : i32
    return %arg0, %c0_i32, %c0_i32_0 : i32, i32, i32
  }
}

module attributes {stable_mosaic.version = 11 : i64} {
  func.func @_logits_kernel(%arg0: i32, %arg1: i32, %arg2: memref<16x32xbf16, #tpu.memory_space<vmem>>, %arg3: memref<1x32xf32, #tpu.memory_space<vmem>>, %arg4: memref<1x32xf32, #tpu.memory_space<vmem>>, %arg5: memref<48x32xbf16, #tpu.memory_space<vmem>>, %arg6: memref<16x48xf32, #tpu.memory_space<vmem>>, %arg7: memref<16x32xf32, #tpu.memory_space<vmem>>) attributes {dimension_semantics = [#tpu.dimension_semantics<parallel>, #tpu.dimension_semantics<arbitrary>], iteration_bounds = array<i64: 1, 1>, scalar_prefetch = 0 : i64, scratch_operands = 1 : i64, tpu.core_type = #tpu.core_type<tc>, window_params = [{transform_indices = @transform_0, window_bounds = array<i64: 16, 32>}, {pipeline_mode = #tpu.pipeline_mode<synchronous>, transform_indices = @transform_1, window_bounds = array<i64: 1, 32>}, {pipeline_mode = #tpu.pipeline_mode<synchronous>, transform_indices = @transform_2, window_bounds = array<i64: 1, 32>}, {transform_indices = @transform_3, window_bounds = array<i64: 48, 32>}, {transform_indices = @transform_4, window_bounds = array<i64: 16, 48>}]} {
    %c0_i32 = arith.constant 0 : i32
    %0 = arith.cmpi eq, %arg1, %c0_i32 : i32
    %1 = arith.extui %0 : i1 to i32
    %c0_i32_0 = arith.constant 0 : i32
    %2 = arith.cmpi ne, %1, %c0_i32_0 : i32
    scf.if %2 {
      %c0_6 = arith.constant 0 : index
      %c0_7 = arith.constant 0 : index
      %8 = vector.load %arg2[%c0_6, %c0_7] : memref<16x32xbf16, #tpu.memory_space<vmem>>, vector<16x32xbf16>
      %9 = arith.extf %8 : vector<16x32xbf16> to vector<16x32xf32>
      %c0_8 = arith.constant 0 : index
      %c0_9 = arith.constant 0 : index
      %10 = vector.load %arg3[%c0_8, %c0_9] : memref<1x32xf32, #tpu.memory_space<vmem>>, vector<1x32xf32>
      %c0_10 = arith.constant 0 : index
      %c0_11 = arith.constant 0 : index
      %11 = vector.load %arg4[%c0_10, %c0_11] : memref<1x32xf32, #tpu.memory_space<vmem>>, vector<1x32xf32>
      %cst_12 = arith.constant dense<0.000000e+00> : vector<16xf32>
      %12 = vector.multi_reduction <add>, %9, %cst_12 [1] : vector<16x32xf32> to vector<16xf32>
      %13 = vector.shape_cast %12 : vector<16xf32> to vector<16x1xf32>
      %cst_13 = arith.constant 3.200000e+01 : f32
      %14 = vector.broadcast %cst_13 : f32 to vector<16x1xf32>
      %15 = arith.divf %13, %14 : vector<16x1xf32>
      %16 = vector.broadcast %15 : vector<16x1xf32> to vector<16x32xf32>
      %17 = arith.subf %9, %16 : vector<16x32xf32>
      %18 = arith.mulf %17, %17 : vector<16x32xf32>
      %cst_14 = arith.constant dense<0.000000e+00> : vector<16xf32>
      %19 = vector.multi_reduction <add>, %18, %cst_14 [1] : vector<16x32xf32> to vector<16xf32>
      %20 = vector.shape_cast %19 : vector<16xf32> to vector<16x1xf32>
      %cst_15 = arith.constant 3.200000e+01 : f32
      %21 = vector.broadcast %cst_15 : f32 to vector<16x1xf32>
      %22 = arith.divf %20, %21 : vector<16x1xf32>
      %23 = vector.broadcast %15 : vector<16x1xf32> to vector<16x32xf32>
      %24 = arith.subf %9, %23 : vector<16x32xf32>
      %cst_16 = arith.constant 9.99999974E-6 : f32
      %25 = vector.broadcast %cst_16 : f32 to vector<16x1xf32>
      %26 = arith.addf %22, %25 : vector<16x1xf32>
      %27 = math.rsqrt %26 : vector<16x1xf32>
      %28 = vector.broadcast %27 : vector<16x1xf32> to vector<16x32xf32>
      %29 = arith.mulf %24, %28 : vector<16x32xf32>
      %30 = vector.broadcast %10 : vector<1x32xf32> to vector<16x32xf32>
      %31 = arith.mulf %29, %30 : vector<16x32xf32>
      %32 = vector.broadcast %11 : vector<1x32xf32> to vector<16x32xf32>
      %33 = arith.addf %31, %32 : vector<16x32xf32>
      %c0_17 = arith.constant 0 : index
      %c0_18 = arith.constant 0 : index
      %34 = vector.load %arg7[%c0_17, %c0_18] : memref<16x32xf32, #tpu.memory_space<vmem>>, vector<16x32xf32>
      tpu.vector_store %arg7[%c0_17, %c0_18], %33 {strides = array<i32>} : memref<16x32xf32, #tpu.memory_space<vmem>>, vector<16x32xf32>,
    } else {
    }
    %c0 = arith.constant 0 : index
    %c0_1 = arith.constant 0 : index
    %3 = vector.load %arg7[%c0, %c0_1] : memref<16x32xf32, #tpu.memory_space<vmem>>, vector<16x32xf32>
    %c0_2 = arith.constant 0 : index
    %c0_3 = arith.constant 0 : index
    %4 = vector.load %arg5[%c0_2, %c0_3] : memref<48x32xbf16, #tpu.memory_space<vmem>>, vector<48x32xbf16>
    %5 = arith.truncf %3 : vector<16x32xf32> to vector<16x32xbf16>
    %cst = arith.constant dense<0.000000e+00> : vector<16x48xf32>
    %6 = tpu.matmul %5, %4, %cst {dimension_numbers = #tpu.dot_dimension_numbers<[1], [1], [0], [0], [0, 0, 1, 0], [], []>} : vector<16x32xbf16>, vector<48x32xbf16>, vector<16x48xf32> -> vector<16x48xf32>
    %c0_4 = arith.constant 0 : index
    %c0_5 = arith.constant 0 : index
    %7 = vector.load %arg6[%c0_4, %c0_5] : memref<16x48xf32, #tpu.memory_space<vmem>>, vector<16x48xf32>
    tpu.vector_store %arg6[%c0_4, %c0_5], %6 {strides = array<i32>} : memref<16x48xf32, #tpu.memory_space<vmem>>, vector<16x48xf32>,
    return
  }
  func.func @transform_0(%arg0: i32, %arg1: i32) -> (i32, i32) {
    %c0_i32 = arith.constant 0 : i32
    %c0_i32_0 = arith.constant 0 : i32
    return %arg0, %c0_i32 : i32, i32
  }
  func.func @transform_1(%arg0: i32, %arg1: i32) -> (i32, i32) {
    %c0_i32 = arith.constant 0 : i32
    %c0_i32_0 = arith.constant 0 : i32
    %c0_i32_1 = arith.constant 0 : i32
    return %c0_i32, %c0_i32_0 : i32, i32
  }
  func.func @transform_2(%arg0: i32, %arg1: i32) -> (i32, i32) {
    %c0_i32 = arith.constant 0 : i32
    %c0_i32_0 = arith.constant 0 : i32
    %c0_i32_1 = arith.constant 0 : i32
    return %c0_i32, %c0_i32_0 : i32, i32
  }
  func.func @transform_3(%arg0: i32, %arg1: i32) -> (i32, i32) {
    %c0_i32 = arith.constant 0 : i32
    %c0_i32_0 = arith.constant 0 : i32
    return %arg1, %c0_i32 : i32, i32
  }
  func.func @transform_4(%arg0: i32, %arg1: i32) -> (i32, i32) {
    %c0_i32 = arith.constant 0 : i32
    return %arg0, %arg1 : i32, i32
  }
}

</mosaic_0001>

<bundles_post_ra>
// kernel: _lambda_.16
= control target key start
LH: loop header
LB: loop body
LE: loop exit
PB: predicated region body
PF: predicated region fallthrough
CT: control target
= control target key end

     0   :  { %vm20_vm0 = vcmask 261120   ;;  %vm72_vm1 = vcmask 257024   ;;  %s132_s0 = inlined_call_operand.vmem [shape: bf16[16,32], index: 0, kind: input, shape index: {}]   ;;  %s133_s1 = inlined_call_operand.vmem [shape: f32[1,32], index: 1, kind: input, shape index: {}]   ;;  %s134_s2 = inlined_call_operand.vmem [shape: f32[1,32], index: 2, kind: input, shape index: {}]   ;;  %s135_s3 = inlined_call_operand.vmem [shape: bf16[16,32], index: 3, kind: output, shape index: {}]  }
   0x1   :  { %v86_v0 = vld [vmem:[%s132_s0] sm:$0xff]  }
   0x2   :  { %v87_v1 = vunpack.c.l.bf16 %v86_v0  ;;  %v88_v2 = vunpack.c.h.bf16 %v86_v0  ;;  %v79_v22 = vld [vmem:[%s133_s1] ss:$0 sm:$0xff] }
   0x3   :  { %v80_v24 = vld [vmem:[%s134_s2] ss:$0 sm:$0xff] }
   0x4   :  { %v21_v3 = vsel %vm20_vm0, %v87_v1, 0.0  ;;  %v24_v4 = vsel %vm20_vm0, %v88_v2, 0.0 }
   0x5   :  { %22 = vadd.xlane.f32.xlu0 %v21_v3 }
   0x9   :  { %25 = vadd.xlane.f32.xlu0 %v24_v4 }
  0x92   :  { %v23_v5 = vpop.xlane.xlu0 %22 }
  0x93   :  { %v28_v6 = vmul.f32 0.03125, %v23_v5 }
  0x95   :  { %v30_v7 = vsub.f32 %v87_v1, %v28_v6 }
  0x96   :  { %v26_v8 = vpop.xlane.xlu0 %25 }
  0x97   :  { %v29_v9 = vmul.f32 0.03125, %v26_v8  ;;  %v32_v10 = vmul.f32 %v30_v7, %v30_v7 }
  0x99   :  { %v31_v11 = vsub.f32 %v88_v2, %v29_v9  ;;  %v34_v12 = vsel %vm20_vm0, %v32_v10, 0.0 }
  0x9a   :  { %35 = vadd.xlane.f32.xlu1 %v34_v12 }
  0x9b   :  { %v33_v13 = vmul.f32 %v31_v11, %v31_v11 }
  0x9d   :  { %v37_v14 = vsel %vm20_vm0, %v33_v13, 0.0 }
  0x9e   :  { %38 = vadd.xlane.f32.xlu1 %v37_v14 }
 0x127   :  { %v36_v15 = vpop.xlane.xlu1 %35 }
 0x128   :  { %v40_v16 = vmul.f32 0.03125, %v36_v15 }
 0x12a   :  { %v42_v17 = vadd.f32 1e-05, %v40_v16 }
 0x12b   :  { %v39_v18 = vpop.xlane.xlu1 %38 }
 0x12c   :  { %89 = vrsqrt.f32 %v42_v17  ;;  %v41_v19 = vmul.f32 0.03125, %v39_v18 }
 0x12e   :  { %v43_v20 = vadd.f32 1e-05, %v41_v19 }
 0x130   :  { %91 = vrsqrt.f32 %v43_v20 }
 0x136   :  { %v90_v21 = vpop.eup %89 }
 0x137   :  { %v46_v23 = vmul.f32 %v90_v21, %v30_v7 }
 0x139   :  { %v54_v25 = vmul.f32 %v79_v22, %v46_v23 }
 0x13a   :  { %v92_v26 = vpop.eup %91 }
 0x13b   :  { %v62_v27 = vadd.f32 %v80_v24, %v54_v25  ;;  %v47_v28 = vmul.f32 %v92_v26, %v31_v11 }
 0x13d   :  { %v83_v29 = vpack.c.bf16 %v62_v27, %v62_v27  ;;  %v55_v30 = vmul.f32 %v79_v22, %v47_v28 }
 0x13f   :  { %73 = vst.msk [vmem:[%s135_s3] sm:$0xf] %vm72_vm1, %v83_v29  ;;  %v63_v31 = vadd.f32 %v80_v24, %v55_v30 }
 0x141   :  { %v84_v32 = vpack.c.bf16 %v63_v31, %v63_v31 }
 0x143   :  { %74 = vst.msk [vmem:[%s135_s3 + $0x4] sm:$0xf] %vm72_vm1, %v84_v32 }

// kernel: _lambda_.13
= control target key start
LH: loop header
LB: loop body
LE: loop exit
PB: predicated region body
PF: predicated region fallthrough
CT: control target
= control target key end

     0   :  { %vm37_vm0 = vcmask 261120   ;;  %v341_v15 = vmov 0.0   ;;  %vm342_vm1 = vmmov 0   ;;  %vm193_vm2 = vcmask 523264   ;;  %s443_s0 = inlined_call_operand.vmem [shape: bf16[16,32], index: 0, kind: input, shape index: {}]   ;;  %s444_s3 = inlined_call_operand.vmem [shape: bf16[32,64], index: 3, kind: input, shape index: {}]   ;;  %s445_s5 = inlined_call_operand.vmem [shape: bf16[64,32], index: 5, kind: input, shape index: {}]   ;;  %s446_s1 = inlined_call_operand.vmem [shape: f32[1,32], index: 1, kind: input, shape index: {}]   ;;  %s447_s2 = inlined_call_operand.vmem [shape: f32[1,32], index: 2, kind: input, shape index: {}]   ;;  %s448_s4 = inlined_call_operand.vmem [shape: f32[1,64], index: 4, kind: input, shape index: {}]   ;;  %s449_s6 = inlined_call_operand.vmem [shape: f32[1,32], index: 6, kind: input, shape index: {}]   ;;  %s450_s7 = inlined_call_operand.vmem [shape: bf16[16,32], index: 7, kind: output, shape index: {}]  }
   0x1   :  { %v294_v0 = vld [vmem:[%s443_s0] sm:$0xff]   ;;  %309 = vmatprep.subr.bf16.mxu0 %v341_v15  ;;  %83 = vst.msk [vmem:[#allocation3] sm:$0xff] %vm37_vm0, %v341_v15  ;;  %84 = vst.msk [vmem:[#allocation3 + $0x8] sm:$0xff] %vm37_vm0, %v341_v15  ;;  %313 = vmatprep.mubr.msk.bf16.mxu0 %vm342_vm1, %v341_v15  ;;  %v332_v17 = vld [vmem:[%s444_s3 + $0x8] sm:$0xff]   ;;  %vm270_vm3 = vcmask 257024  }
   0x2   :  { %v386_v1 = vunpack.c.l.bf16 %v294_v0  ;;  %v388_v2 = vunpack.c.h.bf16 %v294_v0  ;;  %v331_v16 = vld [vmem:[%s444_s3] sm:$0xff]   ;;  %317 = vmatprep.subr.bf16.mxu1 %v341_v15  ;;  %325 = vmatprep.mubr.msk.bf16.mxu1 %vm342_vm1, %v341_v15  ;;  %v334_v19 = vld [vmem:[%s445_s5 + $0x8] sm:$0xff]   ;;  %v335_v39 = vld [vmem:[%s445_s5 + $0x10] sm:$0xff]  }
   0x3   :  { %310 = vmatpush3.bf16.msra.mxu0 %v331_v16  ;;  %v333_v18 = vld [vmem:[%s445_s5] sm:$0xff]   ;;  %v336_v40 = vld [vmem:[%s445_s5 + $0x18] sm:$0xff]  }
   0x4   :  { %v38_v3 = vsel %vm37_vm0, %v386_v1, 0.0  ;;  %v41_v4 = vsel %vm37_vm0, %v388_v2, 0.0  ;;  %311 = vmatprep.subr.bf16.mxu0 %v341_v15  ;;  %318 = vmatpush3.bf16.msra.mxu1 %v333_v18  ;;  %v277_v27 = vld [vmem:[%s446_s1] ss:$0 sm:$0xff] }
   0x5   :  { %39 = vadd.xlane.f32.xlu0 %v38_v3  ;;  %319 = vmatprep.subr.bf16.mxu1 %v341_v15  ;;  %v278_v29 = vld [vmem:[%s447_s2] ss:$0 sm:$0xff] }
   0x6   :  { %v279_v41 = vld [vmem:[%s448_s4] ss:$0 sm:$0xff] }
   0x7   :  { %312 = vmatpush3.bf16.msra.mxu0 %v332_v17  ;;  %v288_v60 = vld [vmem:[%s449_s6] ss:$0 sm:$0xff] }
   0x8   :  { %320 = vmatpush3.bf16.msra.mxu1 %v334_v19  ;;  %v158_v51 = vld [vmem:[#allocation3] sm:$0xff]  ;;  %v159_v53 = vld [vmem:[#allocation3 + $0x8] sm:$0xff] }
   0x9   :  { %42 = vadd.xlane.f32.xlu0 %v41_v4  ;;  %321 = vmatprep.subr.bf16.mxu1 %v341_v15 }
   0xc   :  { %322 = vmatpush3.bf16.msra.mxu1 %v335_v39 }
   0xd   :  { %323 = vmatprep.subr.bf16.mxu1 %v341_v15 }
  0x10   :  { %324 = vmatpush3.bf16.msra.mxu1 %v336_v40 }
  0x92   :  { %v40_v5 = vpop.xlane.xlu0 %39 }
  0x93   :  { %v45_v6 = vmul.f32 0.03125, %v40_v5 }
  0x95   :  { %v47_v7 = vsub.f32 %v386_v1, %v45_v6 }
  0x96   :  { %v43_v8 = vpop.xlane.xlu0 %42 }
  0x97   :  { %v46_v9 = vmul.f32 0.03125, %v43_v8  ;;  %v49_v10 = vmul.f32 %v47_v7, %v47_v7 }
  0x99   :  { %v48_v11 = vsub.f32 %v388_v2, %v46_v9  ;;  %v51_v12 = vsel %vm37_vm0, %v49_v10, 0.0 }
  0x9a   :  { %52 = vadd.xlane.f32.xlu1 %v51_v12 }
  0x9b   :  { %v50_v13 = vmul.f32 %v48_v11, %v48_v11 }
  0x9d   :  { %v54_v14 = vsel %vm37_vm0, %v50_v13, 0.0 }
  0x9e   :  { %55 = vadd.xlane.f32.xlu1 %v54_v14 }
 0x127   :  { %v53_v20 = vpop.xlane.xlu1 %52 }
 0x128   :  { %v57_v21 = vmul.f32 0.03125, %v53_v20 }
 0x12a   :  { %v59_v22 = vadd.f32 1e-05, %v57_v21 }
 0x12b   :  { %v56_v23 = vpop.xlane.xlu1 %55 }
 0x12c   :  { %337 = vrsqrt.f32 %v59_v22  ;;  %v58_v24 = vmul.f32 0.03125, %v56_v23 }
 0x12e   :  { %v60_v25 = vadd.f32 1e-05, %v58_v24 }
 0x130   :  { %339 = vrsqrt.f32 %v60_v25 }
 0x136   :  { %v338_v26 = vpop.eup %337 }
 0x137   :  { %v63_v28 = vmul.f32 %v338_v26, %v47_v7 }
 0x139   :  { %v71_v30 = vmul.f32 %v277_v27, %v63_v28 }
 0x13a   :  { %v340_v31 = vpop.eup %339 }
 0x13b   :  { %v79_v32 = vadd.f32 %v278_v29, %v71_v30  ;;  %v64_v33 = vmul.f32 %v340_v31, %v48_v11 }
 0x13d   :  { %81 = vst.msk [vmem:[#allocation2] sm:$0xff] %vm37_vm0, %v79_v32  ;;  %v72_v34 = vmul.f32 %v277_v27, %v64_v33 }
 0x13f   :  { %v80_v35 = vadd.f32 %v278_v29, %v72_v34 }
 0x141   :  { %82 = vst.msk [vmem:[#allocation2 + $0x8] sm:$0xff] %vm37_vm0, %v80_v35 }
 0x144   :  { %v85_v36 = vld [vmem:[#allocation2] sm:$0xff] }
 0x148   :  { %v86_v37 = vld [vmem:[#allocation2 + $0x8] sm:$0xff] }
 0x149   :  { %v91_v38 = vpack.c.bf16 %v86_v37, %v85_v36 }
 0x14b   :  { %314 = vmatmul.mubr.msk.bf16.vlgmr.msra.gmra.mrb[0].mxu0 %vm37_vm0, %v91_v38 }
 0x21e   :  { %v149_v42 = vpop.f32.mrb[0].mxu0 }
 0x21f   :  { %v150_v43 = vadd.f32 %v279_v41, %v149_v42  ;;  %v315_v44 = vpop.f32.mrb[1].mxu0 }
 0x220   :  { %v152_v45 = vpop.f32.mrb[2].mxu0 }
 0x221   :  { %v153_v46 = vadd.f32 %v279_v41, %v152_v45  ;;  %v316_v47 = vpop.f32.mrb[3].mxu0  ;;  %v156_v48 = vmax.f32 %v150_v43, 0.0 }
 0x223   :  { %v157_v49 = vmax.f32 %v153_v46, 0.0 }
 0x225   :  { %v168_v50 = vpack.c.bf16 %v157_v49, %v156_v48 }
 0x227   :  { %326 = vmatmul.mubr.msk.bf16.vlgmr.msra.gmra.mrb[0].mxu1 %vm193_vm2, %v168_v50 }
 0x2fa   :  { %v231_v52 = vpop.f32.mrb[0].mxu1 }
 0x2fb   :  { %v238_v54 = vadd.f32 %v231_v52, %v158_v51  ;;  %v327_v55 = vpop.f32.mrb[1].mxu1 }
 0x2fc   :  { %v234_v56 = vpop.f32.mrb[2].mxu1 }
 0x2fd   :  { %240 = vst.msk [vmem:[#allocation3] sm:$0xff] %vm37_vm0, %v238_v54  ;;  %v239_v57 = vadd.f32 %v234_v56, %v159_v53  ;;  %v328_v58 = vpop.f32.mrb[3].mxu1 }
 0x2ff   :  { %241 = vst.msk [vmem:[#allocation3 + $0x8] sm:$0xff] %vm37_vm0, %v239_v57 }
 0x304   :  { %v249_v59 = vld [vmem:[#allocation3] sm:$0xff] }
 0x305   :  { %v251_v61 = vadd.f32 %v386_v1, %v249_v59 }
 0x306   :  { %v250_v62 = vld [vmem:[#allocation3 + $0x8] sm:$0xff] }
 0x307   :  { %v260_v63 = vadd.f32 %v288_v60, %v251_v61  ;;  %v252_v0 = vadd.f32 %v388_v2, %v250_v62 }
 0x309   :  { %v291_v3 = vpack.c.bf16 %v260_v63, %v260_v63  ;;  %v261_v4 = vadd.f32 %v288_v60, %v252_v0 }
 0x30b   :  { %271 = vst.msk [vmem:[%s450_s7] sm:$0xf] %vm270_vm3, %v291_v3  ;;  %v292_v5 = vpack.c.bf16 %v261_v4, %v261_v4 }
 0x30d   :  { %272 = vst.msk [vmem:[%s450_s7 + $0x4] sm:$0xf] %vm270_vm3, %v292_v5 }

// kernel: _lambda_.18
= control target key start
LH: loop header
LB: loop body
LE: loop exit
PB: predicated region body
PF: predicated region fallthrough
CT: control target
= control target key end

     0   :  { %s2359_s25 = smov 0   ;;  %s2660_s0 = inlined_call_operand.vmem [shape: bf16[2,8,32], index: 0, kind: input, shape index: {}]   ;;  %s2661_s1 = inlined_call_operand.vmem [shape: bf16[2,8,32], index: 1, kind: input, shape index: {}]   ;;  %s2662_s2 = inlined_call_operand.vmem [shape: f32[2,1,8], index: 2, kind: input, shape index: {}]   ;;  %s2663_s3 = inlined_call_operand.vmem [shape: f32[1,32], index: 3, kind: input, shape index: {}]   ;;  %s2664_s4 = inlined_call_operand.vmem [shape: f32[1,32], index: 4, kind: input, shape index: {}]   ;;  %s2665_s5 = inlined_call_operand.vmem [shape: bf16[4,32,8], index: 5, kind: input, shape index: {}]   ;;  %s2666_s6 = inlined_call_operand.vmem [shape: f32[4,1,8], index: 6, kind: input, shape index: {}]   ;;  %s2667_s7 = inlined_call_operand.vmem [shape: bf16[4,32,8], index: 7, kind: input, shape index: {}]   ;;  %s2668_s8 = inlined_call_operand.vmem [shape: f32[4,1,8], index: 8, kind: input, shape index: {}]   ;;  %s2669_s9 = inlined_call_operand.vmem [shape: bf16[4,32,8], index: 9, kind: input, shape index: {}]   ;;  %s2670_s10 = inlined_call_operand.vmem [shape: f32[4,1,8], index: 10, kind: input, shape index: {}]   ;;  %s2671_s11 = inlined_call_operand.vmem [shape: bf16[32,32], index: 11, kind: input, shape index: {}]   ;;  %s2672_s12 = inlined_call_operand.vmem [shape: f32[1,32], index: 12, kind: input, shape index: {}]   ;;  %s2673_s13 = inlined_call_operand.vmem [shape: bf16[2,8,32], index: 13, kind: output, shape index: {}]  }
   0x1 LB: > { %s1894_s26 = sadd.s32 4294967295, %s2282_s25   ;;  %p1898_p0 = scmp.ge.s32.totalorder %s2282_s25, 1  ;;  %s2282_s25 = sphi %s2359_s25, %s23_s25  }
   0x2   : > { %p403_p1 = scmp.lt.s32.totalorder %s2282_s25, 3 }
   0x4   : > { %p404_p2 = pnand %p1898_p0, %p403_p1 }
   0x5   : > { %p452_p3 = scmp.lt.s32.totalorder (!%p404_p2), %s1894_s26, 1  ;;  %vm472_vm0 = vcmask (!%p404_p2), 261120   ;;  %v2232_v8 = vld [vmem:[%s2667_s7] sm:$0xff] (!%p404_p2)   ;;  %v2284_v9 = vmov (!%p404_p2), 0.0   ;;  %v2233_v11 = vld [vmem:[%s2667_s7 + $0x8] sm:$0xff] (!%p404_p2)   ;;  %vm2285_vm1 = vmmov (!%p404_p2), 0  }
   0x6   : > { %407 = sbr.rel (%p404_p2) target bundleno = 3930 (0xf5a), region = 72  ;;  %2075 = vmatprep.subr.bf16.mxu1 (!%p404_p2), %v2284_v9  ;;  %2067 = vmatprep.subr.bf16.mxu0 (!%p404_p2), %v2284_v9  ;;  %v2234_v10 = vld [vmem:[%s2665_s5] sm:$0xff] (!%p404_p2)   ;;  %v2235_v12 = vld [vmem:[%s2665_s5 + $0x8] sm:$0xff] (!%p404_p2)   ;;  %vm701_vm2 = vcmask (!%p404_p2), 64512   ;;  %v2236_v37 = vld [vmem:[%s2665_s5 + $0x10] sm:$0xff] (!%p404_p2)   ;;  %vm772_vm3 = vcmask (!%p404_p2), 1043456  }
   0x7   : > { %2076 = vmatpush3.bf16.msra.mxu1 (!%p404_p2), %v2232_v8  ;;  %2079 = vmatprep.mubr.msk.bf16.mxu1 (!%p404_p2), %vm2285_vm1, %v2284_v9  ;;  %v1902_v18 = vld [vmem:[%s2663_s3] ss:$0 sm:$0xff] (!%p404_p2)  ;;  %v2237_v40 = vld [vmem:[%s2665_s5 + $0x18] sm:$0xff] (!%p404_p2)   ;;  %v2239_v42 = vld [vmem:[%s2669_s9 + $0x8] sm:$0xff] (!%p404_p2)   ;;  %s2286_s20 = smov (!%p404_p2), 8   ;;  %vm1125_vm4 = vcmask (!%p404_p2), 130112  }
   0x8   : > { %2077 = vmatprep.subr.bf16.mxu1 (!%p404_p2), %v2284_v9  ;;  %2068 = vmatpush3.bf16.msra.mxu0 (!%p404_p2), %v2234_v10  ;;  %v1903_v20 = vld [vmem:[%s2664_s4] ss:$0 sm:$0xff] (!%p404_p2)  ;;  %v2240_v8 = vld [vmem:[%s2667_s7 + $0x10] sm:$0xff] (!%p404_p2)   ;;  %s2287_s23 = smov (!%p404_p2), 16   ;;  %vm1435_vm5 = vcmask (!%p404_p2), 195712   ;;  %s2288_s14 = smov (!%p404_p2), 24  }
   0x9   : > { %2069 = vmatprep.subr.bf16.mxu0 (!%p404_p2), %v2284_v9  ;;  %2071 = vmatprep.mubr.msk.bf16.mxu0 (!%p404_p2), %vm2285_vm1, %v2284_v9  ;;  %v1908_v24 = vld [vmem:[%s2668_s8] ss:$0 sm:$0xff] (!%p404_p2)  ;;  %vm1745_vm6 = vcmask (!%p404_p2), 261312   ;;  %vm1818_vm7 = vcmask (!%p404_p2), 257024  }
   0xa   : > { %v1904_v32 = vld [vmem:[%s2666_s6] ss:$0 sm:$0xff] (!%p404_p2) }
   0xb   : > { %2078 = vmatpush3.bf16.msra.mxu1 (!%p404_p2), %v2233_v11  ;;  %v2238_v41 = vld [vmem:[%s2669_s9] sm:$0xff] (!%p404_p2)   ;;  %v2241_v11 = vld [vmem:[%s2667_s7 + $0x18] sm:$0xff] (!%p404_p2)  }
   0xc   : > { %2070 = vmatpush3.bf16.msra.mxu0 (!%p404_p2), %v2235_v12  ;;  %2091 = vmatprep.subr.bf16.mxu1 (!%p404_p2), %v2284_v9  ;;  %v1912_v63 = vld [vmem:[%s2670_s10] ss:$0 sm:$0xff] (!%p404_p2) }
   0xd   : > { %s2675_s26 = smov (!%p452_p3, %s1894_s26), 1  ;;  %2083 = vmatprep.subr.bf16.mxu0 %v2284_v9 }
   0xe   : > { %s2370_s27 = sshll.u32 %s2675_s26, 2  ;;  %s462_s15 = scalar_lea.vmem %s2662_s2, %s2675_s26 }
   0xf   : > { %s455_s30 = scalar_lea.vmem %s2660_s0, %s2370_s27  ;;  %s459_s22 = scalar_lea.vmem %s2661_s1, %s2370_s27  ;;  %v2465_v44 = vld [vmem:[%s462_s15] ss:$0 sm:$0xff] }
  0x10   : > { %v468_v0 = vld [vmem:[%s455_s30] sm:$0xf]  ;;  %s466_s18 = scalar_lea.vmem %s2673_s13, %s2370_s27 }
  0x11   : > { %v2376_v1 = vunpack.c.l.bf16 %v468_v0  ;;  %v2406_v13 = vld [vmem:[%s459_s22] sm:$0xf] }
  0x12   : > { %2080 = vmatmul.mubr.msk.bf16.vlgmr.msra.gmra.mrb[0].mxu1 %vm472_vm0, %v2406_v13 }
  0x13   : > { %v473_v2 = vsel %vm472_vm0, %v2376_v1, 0.0  ;;  %2093 = vmatprep.mubr.msk.bf16.mxu1 %vm2285_vm1, %v2284_v9 }
  0x14   : > { %474 = vadd.xlane.f32.xlu0 %v473_v2 }
  0xa1   : > { %v475_v3 = vpop.xlane.xlu0 %474 }
  0xa2   : > { %v477_v4 = vmul.f32 0.03125, %v475_v3 }
  0xa4   : > { %v478_v5 = vsub.f32 %v2376_v1, %v477_v4 }
  0xa6   : > { %v479_v6 = vmul.f32 %v478_v5, %v478_v5 }
  0xa8   : > { %v480_v7 = vsel %vm472_vm0, %v479_v6, 0.0 }
  0xa9   : > { %481 = vadd.xlane.f32.xlu0 %v480_v7 }
  0xe5   : > { %v630_v25 = vpop.f32.mrb[0].mxu1 }
  0xe6   : > { %v631_v26 = vadd.f32 %v1908_v24, %v630_v25  ;;  %v2081_v27 = vpop.f32.mrb[1].mxu1  ;;  %v1924_v25 = vld [vmem:[%s2666_s6 + $0x1] ss:$0 sm:$0xff] }
  0xe7   : > { %v633_v28 = vpop.f32.mrb[2].mxu1 }
  0xe8   : > { %v700_v29 = vpack.c.bf16 %v631_v26, %v631_v26  ;;  %v2082_v30 = vpop.f32.mrb[3].mxu1  ;;  %v2242_v28 = vld [vmem:[%s2665_s5 + $0x20] sm:$0xff]  }
  0xe9   : > { %v2243_v30 = vld [vmem:[%s2665_s5 + $0x28] sm:$0xff]  }
  0xea   : > { %v706_v31 = vsel %vm701_vm2, %v700_v29, 0 }
  0xeb   : > { %2092 = vmatpush3.bf16.xpose.msra.mxu1 %v706_v31  ;;  %v2244_v31 = vld [vmem:[%s2669_s9 + $0x10] sm:$0xff]  }
  0xec   : > { %2103 = vmatprep.subr.bf16.mxu1 %v2284_v9 }
 0x136   : > { %v482_v14 = vpop.xlane.xlu0 %481 }
 0x137   : > { %v483_v15 = vmul.f32 0.03125, %v482_v14 }
 0x139   : > { %v484_v16 = vadd.f32 1e-05, %v483_v15 }
 0x13b   : > { %2258 = vrsqrt.f32 %v484_v16 }
 0x145   : > { %v2259_v17 = vpop.eup %2258 }
 0x146   : > { %v486_v19 = vmul.f32 %v2259_v17, %v478_v5  ;;  %v1933_v17 = vld [vmem:[%s2668_s8 + $0x1] ss:$0 sm:$0xff] }
 0x148   : > { %v493_v21 = vmul.f32 %v1902_v18, %v486_v19 }
 0x14a   : > { %v500_v22 = vadd.f32 %v1903_v20, %v493_v21 }
 0x14c   : > { %v2420_v23 = vpack.c.bf16 %v500_v22, %v500_v22 }
 0x14e   : > { %2072 = vmatmul.mubr.msk.bf16.vlgmr.msra.gmra.mrb[0].mxu0 %vm472_vm0, %v2420_v23 }
 0x14f   : > { %2087 = vmatprep.mubr.msk.bf16.mxu0 %vm2285_vm1, %v2284_v9  ;;  %2084 = vmatpush3.bf16.msra.mxu0 %v2238_v41 }
 0x150   : > { %2085 = vmatprep.subr.bf16.mxu0 %v2284_v9 }
 0x153   : > { %2086 = vmatpush3.bf16.msra.mxu0 %v2239_v42 }
 0x154   : > { %2097 = vmatprep.subr.bf16.mxu0 %v2284_v9 }
 0x156   : > { %2088 = vmatmul.mubr.msk.bf16.vlgmr.msra.gmra.mrb[4].mxu0 %vm472_vm0, %v2406_v13 }
 0x157   : > { %2099 = vmatprep.mubr.msk.bf16.mxu0 %vm2285_vm1, %v2284_v9 }
 0x221   : > { %v564_v33 = vpop.f32.mrb[0].mxu0 }
 0x222   : > { %v565_v34 = vadd.f32 %v1904_v32, %v564_v33  ;;  %v2073_v35 = vpop.f32.mrb[1].mxu0  ;;  %v2245_v32 = vld [vmem:[%s2669_s9 + $0x18] sm:$0xff]  }
 0x223   : > { %v567_v36 = vpop.f32.mrb[2].mxu0 }
 0x224   : > { %v699_v38 = vpack.c.bf16 %v565_v34, %v565_v34  ;;  %v2074_v39 = vpop.f32.mrb[3].mxu0 }
 0x226   : > { %2094 = vmatmul.mubr.msk.bf16.vlgmr.msra.gmra.mrb[4].mxu1 %vm701_vm2, %v699_v38 }
 0x227   : > { %2104 = vmatpush3.bf16.msra.mxu1 %v2236_v37  ;;  %2107 = vmatprep.mubr.msk.bf16.mxu1 %vm2285_vm1, %v2284_v9 }
 0x228   : > { %2105 = vmatprep.subr.bf16.mxu1 %v2284_v9 }
 0x229   : > { %v693_v60 = vpop.f32.mrb[4].mxu0 }
 0x22a   : > { %v2089_v61 = vpop.f32.mrb[5].mxu0  ;;  %v694_v2 = vadd.f32 %v1912_v63, %v693_v60  ;;  %v2247_v63 = vld [vmem:[%s2667_s7 + $0x28] sm:$0xff]  }
 0x22b   : > { %2106 = vmatpush3.bf16.msra.mxu1 %v2237_v40  ;;  %v696_v62 = vpop.f32.mrb[6].mxu0  ;;  %v2246_v61 = vld [vmem:[%s2667_s7 + $0x20] sm:$0xff]  }
 0x22c   : > { %2119 = vmatprep.subr.bf16.mxu1 %v2284_v9  ;;  %v2090_v0 = vpop.f32.mrb[7].mxu0  ;;  %v768_v3 = vpack.c.bf16 %v694_v2, %v694_v2 }
 0x22e   : > { %2108 = vmatmul.mubr.msk.bf16.vlgmr.msra.gmra.mrb[8].mxu1 %vm472_vm0, %v2420_v23  ;;  %v774_v4 = vsel %vm772_vm3, %v768_v3, 0 }
 0x22f   : > { %2123 = vmatprep.mubr.msk.bf16.mxu1 %vm2285_vm1, %v2284_v9  ;;  %2098 = vmatpush3.bf16.msra.mxu0 %v774_v4 }
 0x230   : > { %2111 = vmatprep.subr.bf16.mxu0 %v2284_v9  ;;  %2120 = vmatpush3.bf16.msra.mxu1 %v2244_v31 }
 0x231   : > { %2121 = vmatprep.subr.bf16.mxu1 %v2284_v9 }
 0x234   : > { %2122 = vmatpush3.bf16.msra.mxu1 %v2245_v32 }
 0x235   : > { %2133 = vmatprep.subr.bf16.mxu1 %v2284_v9 }
 0x237   : > { %2124 = vmatmul.mubr.msk.bf16.vlgmr.msra.gmra.mrb[12].mxu1 %vm472_vm0, %v2406_v13 }
 0x238   : > { %2135 = vmatprep.mubr.msk.bf16.mxu1 %vm2285_vm1, %v2284_v9 }
 0x2f9   : > { %v742_v43 = vpop.f32.mrb[4].mxu1 }
 0x2fa   : > { %v748_v45 = vmul.f32 0.35355338, %v742_v43  ;;  %v2095_v46 = vpop.f32.mrb[5].mxu1 }
 0x2fb   : > { %v745_v47 = vpop.f32.mrb[6].mxu1 }
 0x2fc   : > { %v2096_v48 = vpop.f32.mrb[7].mxu1  ;;  %v755_v49 = vadd.f32 %v2465_v44, %v748_v45  ;;  %v1942_v45 = vld [vmem:[%s2670_s10 + $0x1] ss:$0 sm:$0xff] }
 0x2fe   : > { %v756_v50 = vsel %vm701_vm2, %v755_v49, -inf }
 0x2ff   : > { %757 = vmax.xlane.f32.xlu1 %v756_v50 }
 0x301   : > { %v876_v51 = vpop.f32.mrb[8].mxu1 }
 0x302   : > { %v2109_v52 = vpop.f32.mrb[9].mxu1  ;;  %v877_v27 = vadd.f32 %v1924_v25, %v876_v51 }
 0x303   : > { %v879_v53 = vpop.f32.mrb[10].mxu1 }
 0x304   : > { %v2110_v54 = vpop.f32.mrb[11].mxu1  ;;  %v1012_v29 = vpack.c.bf16 %v877_v27, %v877_v27 }
 0x30a   : > { %v1006_v46 = vpop.f32.mrb[12].mxu1 }
 0x30b   : > { %v1007_v47 = vadd.f32 %v1942_v45, %v1006_v46  ;;  %v2125_v48 = vpop.f32.mrb[13].mxu1 }
 0x30d   : > { %v1074_v50 = vpack.c.bf16 %v1007_v47, %v1007_v47 }
 0x30f   : > { %v1079_v52 = vsel %vm772_vm3, %v1074_v50, 0  ;;  %v2252_v50 = vld [vmem:[%s2667_s7 + $0x30] sm:$0xff]  }
 0x310   : > { %2134 = vmatpush3.bf16.msra.mxu1 %v1079_v52  ;;  %v2253_v52 = vld [vmem:[%s2667_s7 + $0x38] sm:$0xff]  }
 0x311   : > { %2147 = vmatprep.subr.bf16.mxu1 %v2284_v9 }
 0x38c   : > { %v758_v55 = vpop.xlane.xlu1 %757 }
 0x38d   : > { %v759_v56 = vsub.f32 %v755_v49, %v758_v55  ;;  %v1009_v49 = vpop.f32.mrb[14].mxu1 }
 0x38e   : > { %v2126_v51 = vpop.f32.mrb[15].mxu1 }
 0x38f   : > { %v760_v57 = vmul.f32 1.442695, %v759_v56 }
 0x391   : > { %2260 = vpow2.f32 %v760_v57 }
 0x39b   : > { %v2261_v58 = vpop.eup %2260 }
 0x39c   : > { %v762_v59 = vsel %vm701_vm2, %v2261_v58, 0.0 }
 0x39d   : > { %763 = vadd.xlane.f32.xlu1 %v762_v59 }
 0x42a   : > { %v764_v5 = vpop.xlane.xlu1 %763 }
 0x42b   : > { %2262 = vrcp.f32 %v764_v5  ;;  %v1962_v5 = vld [vmem:[%s2668_s8 + $0x2] ss:$0 sm:$0xff] }
 0x435   : > { %v2263_v6 = vpop.eup %2262 }
 0x436   : > { %v766_v7 = vmul.f32 %v2263_v6, %v2261_v58 }
 0x438   : > { %v767_v10 = vpack.c.bf16 %v766_v7, %v766_v7 }
 0x43a   : > { %2100 = vmatmul.mubr.msk.bf16.vlgmr.msra.gmra.mrb[8].mxu0 %vm701_vm2, %v767_v10 }
 0x43b   : > { %2112 = vmatpush3.bf16.msra.mxu0 %v2240_v8  ;;  %2115 = vmatprep.mubr.msk.bf16.mxu0 %vm2285_vm1, %v2284_v9 }
 0x43c   : > { %2113 = vmatprep.subr.bf16.mxu0 %v2284_v9 }
 0x43f   : > { %2114 = vmatpush3.bf16.msra.mxu0 %v2241_v11 }
 0x440   : > { %2127 = vmatprep.subr.bf16.mxu0 %v2284_v9 }
 0x442   : > { %2116 = vmatmul.mubr.msk.bf16.vlgmr.msra.gmra.mrb[12].mxu0 %vm472_vm0, %v2406_v13 }
 0x443   : > { %2129 = vmatprep.mubr.msk.bf16.mxu0 %vm2285_vm1, %v2284_v9 }
 0x50d   : > { %v810_v12 = vpop.f32.mrb[8].mxu0 }
 0x50e   : > { %816 = vst.msk [vmem:[#allocation2] sm:$0xff] %vm701_vm2, %v810_v12  ;;  %v2101_v14 = vpop.f32.mrb[9].mxu0 }
 0x50f   : > { %v813_v15 = vpop.f32.mrb[10].mxu0  ;;  %v1953_v14 = vld [vmem:[%s2666_s6 + $0x2] ss:$0 sm:$0xff] }
 0x510   : > { %v2102_v16 = vpop.f32.mrb[11].mxu0 }
 0x515   : > { %v941_v18 = vpop.f32.mrb[12].mxu0 }
 0x516   : > { %v942_v19 = vadd.f32 %v1933_v17, %v941_v18  ;;  %v2117_v20 = vpop.f32.mrb[13].mxu0  ;;  %v2248_v17 = vld [vmem:[%s2665_s5 + $0x30] sm:$0xff]  }
 0x517   : > { %v944_v21 = vpop.f32.mrb[14].mxu0  ;;  %v2250_v20 = vld [vmem:[%s2669_s9 + $0x20] sm:$0xff]  }
 0x518   : > { %v1013_v22 = vpack.c.bf16 %v942_v19, %v942_v19  ;;  %v2118_v24 = vpop.f32.mrb[15].mxu0  ;;  %v2249_v19 = vld [vmem:[%s2665_s5 + $0x38] sm:$0xff]   ;;  %v2251_v21 = vld [vmem:[%s2669_s9 + $0x28] sm:$0xff]  }
 0x51a   : > { %v1018_v26 = vsel %vm701_vm2, %v1013_v22, 0 }
 0x51b   : > { %2128 = vmatpush3.bf16.xpose.msra.mxu0 %v1018_v26 }
 0x51c   : > { %2139 = vmatprep.subr.bf16.mxu0 %v2284_v9 }
 0x522   : > { %2130 = vmatmul.mubr.msk.bf16.vlgmr.msra.gmra.mrb[16].mxu0 %vm701_vm2, %v1012_v29 }
 0x523   : > { %2140 = vmatpush3.bf16.msra.mxu0 %v2242_v28  ;;  %2143 = vmatprep.mubr.msk.bf16.mxu0 %vm2285_vm1, %v2284_v9 }
 0x524   : > { %2141 = vmatprep.subr.bf16.mxu0 %v2284_v9 }
 0x527   : > { %2142 = vmatpush3.bf16.msra.mxu0 %v2243_v30 }
 0x528   : > { %2155 = vmatprep.subr.bf16.mxu0 %v2284_v9 }
 0x52a   : > { %2144 = vmatmul.mubr.msk.bf16.vlgmr.msra.gmra.mrb[20].mxu0 %vm472_vm0, %v2420_v23 }
 0x52b   : > { %2159 = vmatprep.mubr.msk.bf16.mxu0 %vm2285_vm1, %v2284_v9  ;;  %2156 = vmatpush3.bf16.msra.mxu0 %v2250_v20 }
 0x52c   : > { %2157 = vmatprep.subr.bf16.mxu0 %v2284_v9 }
 0x52f   : > { %2158 = vmatpush3.bf16.msra.mxu0 %v2251_v21 }
 0x530   : > { %2169 = vmatprep.subr.bf16.mxu0 %v2284_v9 }
 0x532   : > { %2160 = vmatmul.mubr.msk.bf16.vlgmr.msra.gmra.mrb[24].mxu0 %vm472_vm0, %v2406_v13 }
 0x533   : > { %2171 = vmatprep.mubr.msk.bf16.mxu0 %vm2285_vm1, %v2284_v9 }
 0x5f5   : > { %v1054_v33 = vpop.f32.mrb[16].mxu0 }
 0x5f6   : > { %v1060_v34 = vmul.f32 0.35355338, %v1054_v33  ;;  %v2131_v35 = vpop.f32.mrb[17].mxu0 }
 0x5f7   : > { %v1057_v36 = vpop.f32.mrb[18].mxu0 }
 0x5f8   : > { %v2132_v37 = vpop.f32.mrb[19].mxu0  ;;  %v1061_v38 = vadd.f32 %v2465_v44, %v1060_v34 }
 0x5fa   : > { %v1062_v39 = vsel %vm701_vm2, %v1061_v38, -inf }
 0x5fb   : > { %1063 = vmax.xlane.f32.xlu0 %v1062_v39 }
 0x5fd   : > { %v1186_v40 = vpop.f32.mrb[20].mxu0 }
 0x5fe   : > { %v2145_v41 = vpop.f32.mrb[21].mxu0  ;;  %v1187_v16 = vadd.f32 %v1953_v14, %v1186_v40 }
 0x5ff   : > { %v1189_v42 = vpop.f32.mrb[22].mxu0  ;;  %v1971_v41 = vld [vmem:[%s2670_s10 + $0x2] ss:$0 sm:$0xff] }
 0x600   : > { %v2146_v43 = vpop.f32.mrb[23].mxu0  ;;  %v1322_v18 = vpack.c.bf16 %v1187_v16, %v1187_v16 }
 0x688   : > { %v1064_v53 = vpop.xlane.xlu0 %1063 }
 0x689   : > { %v1065_v54 = vsub.f32 %v1061_v38, %v1064_v53  ;;  %v1316_v38 = vpop.f32.mrb[24].mxu0 }
 0x68a   : > { %v2161_v39 = vpop.f32.mrb[25].mxu0  ;;  %v1317_v43 = vadd.f32 %v1971_v41, %v1316_v38 }
 0x68b   : > { %v1066_v55 = vmul.f32 1.442695, %v1065_v54  ;;  %v1319_v40 = vpop.f32.mrb[26].mxu0 }
 0x68c   : > { %v2162_v42 = vpop.f32.mrb[27].mxu0  ;;  %v1384_v45 = vpack.c.bf16 %v1317_v43, %v1317_v43 }
 0x68d   : > { %2264 = vpow2.f32 %v1066_v55 }
 0x68e   : > { %v1389_v46 = vsel %vm772_vm3, %v1384_v45, 0 }
 0x68f   : > { %2170 = vmatpush3.bf16.msra.mxu0 %v1389_v46 }
 0x690   : > { %2183 = vmatprep.subr.bf16.mxu0 %v2284_v9 }
 0x697   : > { %v2265_v56 = vpop.eup %2264 }
 0x698   : > { %v1068_v57 = vsel %vm701_vm2, %v2265_v56, 0.0 }
 0x699   : > { %1069 = vadd.xlane.f32.xlu1 %v1068_v57  ;;  %v1991_v57 = vld [vmem:[%s2668_s8 + $0x3] ss:$0 sm:$0xff] }
 0x726   : > { %v1070_v58 = vpop.xlane.xlu1 %1069 }
 0x727   : > { %2266 = vrcp.f32 %v1070_v58 }
 0x731   : > { %v2267_v59 = vpop.eup %2266 }
 0x732   : > { %v1072_v60 = vmul.f32 %v2267_v59, %v2265_v56 }
 0x734   : > { %v1073_v62 = vpack.c.bf16 %v1072_v60, %v1072_v60 }
 0x736   : > { %2136 = vmatmul.mubr.msk.bf16.vlgmr.msra.gmra.mrb[16].mxu1 %vm701_vm2, %v1073_v62 }
 0x737   : > { %2148 = vmatpush3.bf16.msra.mxu1 %v2246_v61  ;;  %2151 = vmatprep.mubr.msk.bf16.mxu1 %vm2285_vm1, %v2284_v9 }
 0x738   : > { %2149 = vmatprep.subr.bf16.mxu1 %v2284_v9 }
 0x73b   : > { %2150 = vmatpush3.bf16.msra.mxu1 %v2247_v63 }
 0x73c   : > { %2163 = vmatprep.subr.bf16.mxu1 %v2284_v9 }
 0x73e   : > { %2152 = vmatmul.mubr.msk.bf16.vlgmr.msra.gmra.mrb[20].mxu1 %vm472_vm0, %v2406_v13 }
 0x73f   : > { %2165 = vmatprep.mubr.msk.bf16.mxu1 %vm2285_vm1, %v2284_v9 }
 0x809   : > { %v2549_v0 = vpop.f32.mrb[16].mxu1 }
 0x80a   : > { %v2137_v2 = vpop.f32.mrb[17].mxu1 }
 0x80b   : > { %v1118_v3 = vpop.f32.mrb[18].mxu1  ;;  %v1982_v2 = vld [vmem:[%s2666_s6 + $0x3] ss:$0 sm:$0xff] }
 0x80c   : > { %v2138_v4 = vpop.f32.mrb[19].mxu1 }
 0x811   : > { %v1251_v6 = vpop.f32.mrb[20].mxu1 }
 0x812   : > { %v1252_v7 = vadd.f32 %v1962_v5, %v1251_v6  ;;  %v2153_v8 = vpop.f32.mrb[21].mxu1  ;;  %v2254_v6 = vld [vmem:[%s2669_s9 + $0x30] sm:$0xff]  }
 0x813   : > { %v1254_v10 = vpop.f32.mrb[22].mxu1 }
 0x814   : > { %v1323_v11 = vpack.c.bf16 %v1252_v7, %v1252_v7  ;;  %v2154_v12 = vpop.f32.mrb[23].mxu1  ;;  %v2255_v7 = vld [vmem:[%s2669_s9 + $0x38] sm:$0xff]  }
 0x816   : > { %v1328_v15 = vsel %vm701_vm2, %v1323_v11, 0 }
 0x817   : > { %2164 = vmatpush3.bf16.xpose.msra.mxu1 %v1328_v15 }
 0x818   : > { %2175 = vmatprep.subr.bf16.mxu1 %v2284_v9 }
 0x81e   : > { %2166 = vmatmul.mubr.msk.bf16.vlgmr.msra.gmra.mrb[24].mxu1 %vm701_vm2, %v1322_v18 }
 0x81f   : > { %2176 = vmatpush3.bf16.msra.mxu1 %v2248_v17  ;;  %2179 = vmatprep.mubr.msk.bf16.mxu1 %vm2285_vm1, %v2284_v9 }
 0x820   : > { %2177 = vmatprep.subr.bf16.mxu1 %v2284_v9 }
 0x823   : > { %2178 = vmatpush3.bf16.msra.mxu1 %v2249_v19 }
 0x824   : > { %2191 = vmatprep.subr.bf16.mxu1 %v2284_v9 }
 0x826   : > { %2180 = vmatmul.mubr.msk.bf16.vlgmr.msra.gmra.mrb[28].mxu1 %vm472_vm0, %v2420_v23 }
 0x827   : > { %2195 = vmatprep.mubr.msk.bf16.mxu1 %vm2285_vm1, %v2284_v9  ;;  %2192 = vmatpush3.bf16.msra.mxu1 %v2254_v6 }
 0x828   : > { %2193 = vmatprep.subr.bf16.mxu1 %v2284_v9 }
 0x82b   : > { %2194 = vmatpush3.bf16.msra.mxu1 %v2255_v7 }
 0x82c   : > { %2205 = vmatprep.subr.bf16.mxu1 %v2284_v9 }
 0x82e   : > { %2196 = vmatmul.mubr.msk.bf16.vlgmr.msra.gmra.mrb[32].mxu1 %vm472_vm0, %v2406_v13 }
 0x82f   : > { %2207 = vmatprep.mubr.msk.bf16.mxu1 %vm2285_vm1, %v2284_v9 }
 0x8f1   : > { %v1364_v23 = vpop.f32.mrb[24].mxu1 }
 0x8f2   : > { %v1370_v22 = vmul.f32 0.35355338, %v1364_v23  ;;  %v2167_v24 = vpop.f32.mrb[25].mxu1 }
 0x8f3   : > { %v1367_v25 = vpop.f32.mrb[26].mxu1 }
 0x8f4   : > { %v2168_v26 = vpop.f32.mrb[27].mxu1  ;;  %v1371_v27 = vadd.f32 %v2465_v44, %v1370_v22 }
 0x8f6   : > { %v1372_v28 = vsel %vm701_vm2, %v1371_v27, -inf }
 0x8f7   : > { %1373 = vmax.xlane.f32.xlu0 %v1372_v28 }
 0x8f9   : > { %v1496_v29 = vpop.f32.mrb[28].mxu1 }
 0x8fa   : > { %v2181_v30 = vpop.f32.mrb[29].mxu1  ;;  %v1497_v4 = vadd.f32 %v1982_v2, %v1496_v29 }
 0x8fb   : > { %v1499_v31 = vpop.f32.mrb[30].mxu1 }
 0x8fc   : > { %v2182_v32 = vpop.f32.mrb[31].mxu1  ;;  %v1632_v5 = vpack.c.bf16 %v1497_v4, %v1497_v4 }
 0x901   : > { %v1626_v17 = vpop.f32.mrb[32].mxu1 }
 0x902   : > { %v2197_v19 = vpop.f32.mrb[33].mxu1 }
 0x903   : > { %v1629_v20 = vpop.f32.mrb[34].mxu1 }
 0x904   : > { %v2198_v23 = vpop.f32.mrb[35].mxu1 }
 0x984   : > { %v1374_v33 = vpop.xlane.xlu0 %1373 }
 0x985   : > { %v1375_v34 = vsub.f32 %v1371_v27, %v1374_v33  ;;  %v2256_v33 = vld [vmem:[%s2671_s11] sm:$0xff]  }
 0x987   : > { %v1376_v35 = vmul.f32 1.442695, %v1375_v34  ;;  %v2257_v34 = vld [vmem:[%s2671_s11 + $0x8] sm:$0xff]  }
 0x989   : > { %2268 = vpow2.f32 %v1376_v35 }
 0x993   : > { %v2269_v36 = vpop.eup %2268 }
 0x994   : > { %v1378_v37 = vsel %vm701_vm2, %v2269_v36, 0.0 }
 0x995   : > { %1379 = vadd.xlane.f32.xlu1 %v1378_v37 }
 0xa22   : > { %v1380_v47 = vpop.xlane.xlu1 %1379 }
 0xa23   : > { %2270 = vrcp.f32 %v1380_v47 }
 0xa2d   : > { %v2271_v48 = vpop.eup %2270 }
 0xa2e   : > { %v1382_v49 = vmul.f32 %v2271_v48, %v2269_v36 }
 0xa30   : > { %v1383_v51 = vpack.c.bf16 %v1382_v49, %v1382_v49 }
 0xa32   : > { %2172 = vmatmul.mubr.msk.bf16.vlgmr.msra.gmra.mrb[28].mxu0 %vm701_vm2, %v1383_v51 }
 0xa33   : > { %2184 = vmatpush3.bf16.msra.mxu0 %v2252_v50  ;;  %2187 = vmatprep.mubr.msk.bf16.mxu0 %vm2285_vm1, %v2284_v9 }
 0xa34   : > { %2185 = vmatprep.subr.bf16.mxu0 %v2284_v9 }
 0xa37   : > { %2186 = vmatpush3.bf16.msra.mxu0 %v2253_v52 }
 0xa38   : > { %2199 = vmatprep.subr.bf16.mxu0 %v2284_v9 }
 0xa3a   : > { %2188 = vmatmul.mubr.msk.bf16.vlgmr.msra.gmra.mrb[32].mxu0 %vm472_vm0, %v2406_v13  ;;  %v2000_v13 = vld [vmem:[%s2670_s10 + $0x3] ss:$0 sm:$0xff] }
 0xa3b   : > { %2201 = vmatprep.mubr.msk.bf16.mxu0 %vm2285_vm1, %v2284_v9  ;;  %v1627_v18 = vadd.f32 %v2000_v13, %v1626_v17 }
 0xa3d   : > { %v1694_v21 = vpack.c.bf16 %v1627_v18, %v1627_v18 }
 0xa3f   : > { %v1699_v22 = vsel %vm772_vm3, %v1694_v21, 0 }
 0xa40   : > { %2206 = vmatpush3.bf16.msra.mxu1 %v1699_v22 }
 0xb05   : > { %v1425_v53 = vpop.f32.mrb[28].mxu0 }
 0xb06   : > { %v2173_v54 = vpop.f32.mrb[29].mxu0 }
 0xb07   : > { %v1428_v55 = vpop.f32.mrb[30].mxu0 }
 0xb08   : > { %v2174_v56 = vpop.f32.mrb[31].mxu0 }
 0xb0d   : > { %v1561_v58 = vpop.f32.mrb[32].mxu0 }
 0xb0e   : > { %v1562_v59 = vadd.f32 %v1991_v57, %v1561_v58  ;;  %v2189_v60 = vpop.f32.mrb[33].mxu0 }
 0xb0f   : > { %v1564_v61 = vpop.f32.mrb[34].mxu0 }
 0xb10   : > { %v1633_v62 = vpack.c.bf16 %v1562_v59, %v1562_v59  ;;  %v2190_v63 = vpop.f32.mrb[35].mxu0 }
 0xb12   : > { %v1638_v3 = vsel %vm701_vm2, %v1633_v62, 0 }
 0xb13   : > { %2200 = vmatpush3.bf16.xpose.msra.mxu0 %v1638_v3 }
 0xb14   : > { %2211 = vmatprep.subr.bf16.mxu0 %v2284_v9 }
 0xb1a   : > { %2202 = vmatmul.mubr.msk.bf16.vlgmr.msra.gmra.mrb[36].mxu0 %vm701_vm2, %v1632_v5 }
 0xb1b   : > { %2215 = vmatprep.mubr.msk.bf16.mxu0 %vm2285_vm1, %v2284_v9  ;;  %2212 = vmatpush3.bf16.msra.mxu0 %v2256_v33 }
 0xb1c   : > { %2213 = vmatprep.subr.bf16.mxu0 %v2284_v9  ;;  %v2009_v9 = vld [vmem:[%s2672_s12] ss:$0 sm:$0xff] }
 0xb1f   : > { %2214 = vmatpush3.bf16.msra.mxu0 %v2257_v34 }
 0xbed   : > { %v1674_v8 = vpop.f32.mrb[36].mxu0 }
 0xbee   : > { %v1680_v10 = vmul.f32 0.35355338, %v1674_v8  ;;  %v2203_v11 = vpop.f32.mrb[37].mxu0 }
 0xbef   : > { %v1677_v12 = vpop.f32.mrb[38].mxu0 }
 0xbf0   : > { %v2204_v14 = vpop.f32.mrb[39].mxu0  ;;  %v1681_v15 = vadd.f32 %v2465_v44, %v1680_v10 }
 0xbf2   : > { %v1682_v16 = vsel %vm701_vm2, %v1681_v15, -inf }
 0xbf3   : > { %1683 = vmax.xlane.f32.xlu0 %v1682_v16 }
 0xc09   : > { %1122 = vrot.lane.b32.xlu0 %v2549_v0, %s2286_s20 }
 0xc80   : > { %v1684_v44 = vpop.xlane.xlu0 %1683 }
 0xc81   : > { %v1685_v24 = vsub.f32 %v1681_v15, %v1684_v44 }
 0xc83   : > { %v1686_v25 = vmul.f32 1.442695, %v1685_v24 }
 0xc84   : > { %v1123_v26 = vpop.permute.xlu0 %1122 }
 0xc85   : > { %2272 = vpow2.f32 %v1686_v25  ;;  %1126 = vst.msk [vmem:[#allocation2] sm:$0xff] %vm1125_vm4, %v1123_v26 }
 0xc8f   : > { %v2273_v0 = vpop.eup %2272 }
 0xc90   : > { %v1688_v27 = vsel %vm701_vm2, %v2273_v0, 0.0 }
 0xc91   : > { %1689 = vadd.xlane.f32.xlu1 %v1688_v27 }
 0xca2   : > { %1432 = vrot.lane.b32.xlu1 %v1425_v53, %s2287_s23 }
 0xd1e   : > { %v1690_v28 = vpop.xlane.xlu1 %1689 }
 0xd1f   : > { %2274 = vrcp.f32 %v1690_v28 }
 0xd22   : > { %v1433_v29 = vpop.permute.xlu1 %1432 }
 0xd23   : > { %1436 = vst.msk [vmem:[#allocation2] sm:$0xff] %vm1435_vm5, %v1433_v29 }
 0xd29   : > { %v2275_v30 = vpop.eup %2274 }
 0xd2a   : > { %v1692_v31 = vmul.f32 %v2275_v30, %v2273_v0 }
 0xd2c   : > { %v1693_v32 = vpack.c.bf16 %v1692_v31, %v1692_v31 }
 0xd2e   : > { %2208 = vmatmul.mubr.msk.bf16.vlgmr.msra.gmra.mrb[36].mxu1 %vm701_vm2, %v1693_v32 }
 0xe01   : > { %v1735_v35 = vpop.f32.mrb[36].mxu1 }
 0xe02   : > { %1742 = vrot.lane.b32.xlu1 %v1735_v35, %s2288_s14  ;;  %v2209_v36 = vpop.f32.mrb[37].mxu1 }
 0xe03   : > { %v1738_v37 = vpop.f32.mrb[38].mxu1 }
 0xe04   : > { %v2210_v38 = vpop.f32.mrb[39].mxu1 }
 0xe74   : > { %v1743_v39 = vpop.permute.xlu1 %1742 }
 0xe75   : > { %1746 = vst.msk [vmem:[#allocation2] sm:$0xff] %vm1745_vm6, %v1743_v39 }
 0xe7c   : > { %v1747_v40 = vld [vmem:[#allocation2] sm:$0xff] }
 0xe7d   : > { %v1752_v41 = vpack.c.bf16 %v1747_v40, %v1747_v40 }
 0xe7f   : > { %2216 = vmatmul.mubr.msk.bf16.vlgmr.msra.gmra.mrb[40].mxu0 %vm472_vm0, %v1752_v41 }
 0xf52   : > { %v1802_v42 = vpop.f32.mrb[40].mxu0 }
 0xf53   : > { %v1808_v43 = vadd.f32 %v1802_v42, %v2376_v1  ;;  %v2217_v45 = vpop.f32.mrb[41].mxu0 }
 0xf54   : > { %v1805_v46 = vpop.f32.mrb[42].mxu0 }
 0xf55   : > { %v1816_v47 = vadd.f32 %v2009_v9, %v1808_v43  ;;  %v2218_v48 = vpop.f32.mrb[43].mxu0 }
 0xf57   : > { %v1817_v49 = vpack.c.bf16 %v1816_v47, %v1816_v47 }
 0xf59   : > { %1819 = vst.msk [vmem:[%s466_s18] sm:$0xf] %vm1818_vm7, %v1817_v49 }
 0xf5a PF: > { %s23_s25 = sadd.s32 1, %s2282_s25  }
 0xf5b   : > { %p20_p4 = scmp.ge.s32.totalorder %s23_s25, 4  }
 0xf5d   :  { %22 = sbr.rel (!%p20_p4) target bundleno = 1 (0x1), region = 126 }

// kernel: _lambda_.12
= control target key start
LH: loop header
LB: loop body
LE: loop exit
PB: predicated region body
PF: predicated region fallthrough
CT: control target
= control target key end

     0   :  { %s2293_s21 = smov 0   ;;  %s2588_s0 = inlined_call_operand.vmem [shape: bf16[2,8,32], index: 0, kind: input, shape index: {}]   ;;  %s2589_s1 = inlined_call_operand.vmem [shape: f32[2,1,8], index: 1, kind: input, shape index: {}]   ;;  %s2590_s2 = inlined_call_operand.vmem [shape: f32[1,32], index: 2, kind: input, shape index: {}]   ;;  %s2591_s3 = inlined_call_operand.vmem [shape: f32[1,32], index: 3, kind: input, shape index: {}]   ;;  %s2592_s4 = inlined_call_operand.vmem [shape: bf16[4,32,8], index: 4, kind: input, shape index: {}]   ;;  %s2593_s5 = inlined_call_operand.vmem [shape: f32[4,1,8], index: 5, kind: input, shape index: {}]   ;;  %s2594_s6 = inlined_call_operand.vmem [shape: bf16[4,32,8], index: 6, kind: input, shape index: {}]   ;;  %s2595_s7 = inlined_call_operand.vmem [shape: f32[4,1,8], index: 7, kind: input, shape index: {}]   ;;  %s2596_s8 = inlined_call_operand.vmem [shape: bf16[4,32,8], index: 8, kind: input, shape index: {}]   ;;  %s2597_s9 = inlined_call_operand.vmem [shape: f32[4,1,8], index: 9, kind: input, shape index: {}]   ;;  %s2598_s10 = inlined_call_operand.vmem [shape: bf16[32,32], index: 10, kind: input, shape index: {}]   ;;  %s2599_s11 = inlined_call_operand.vmem [shape: f32[1,32], index: 11, kind: input, shape index: {}]   ;;  %s2600_s12 = inlined_call_operand.vmem [shape: bf16[2,8,32], index: 12, kind: output, shape index: {}]  }
   0x1 LB: > { %s1834_s22 = sadd.s32 4294967295, %s2221_s21   ;;  %p1838_p0 = scmp.ge.s32.totalorder %s2221_s21, 1  ;;  %s2221_s21 = sphi %s2293_s21, %s22_s21  }
   0x2   : > { %p369_p1 = scmp.lt.s32.totalorder %s2221_s21, 3 }
   0x4   : > { %p370_p2 = pnand %p1838_p0, %p369_p1 }
   0x5   : > { %p412_p3 = scmp.lt.s32.totalorder (!%p370_p2), %s1834_s22, 1  ;;  %vm428_vm0 = vcmask (!%p370_p2), 261120   ;;  %v2171_v8 = vld [vmem:[%s2592_s4] sm:$0xff] (!%p370_p2)   ;;  %v2223_v10 = vmov (!%p370_p2), 0.0   ;;  %v2173_v11 = vld [vmem:[%s2592_s4 + $0x8] sm:$0xff] (!%p370_p2)   ;;  %vm2224_vm1 = vmmov (!%p370_p2), 0  }
   0x6   : > { %373 = sbr.rel (%p370_p2) target bundleno = 3938 (0xf62), region = 68  ;;  %v2172_v9 = vld [vmem:[%s2594_s6] sm:$0xff] (!%p370_p2)   ;;  %2006 = vmatprep.subr.bf16.mxu0 (!%p370_p2), %v2223_v10  ;;  %2014 = vmatprep.subr.bf16.mxu1 (!%p370_p2), %v2223_v10  ;;  %v2174_v12 = vld [vmem:[%s2594_s6 + $0x8] sm:$0xff] (!%p370_p2)   ;;  %vm653_vm2 = vcmask (!%p370_p2), 64512   ;;  %vm724_vm3 = vcmask (!%p370_p2), 1043456   ;;  %v2177_v44 = vld [vmem:[%s2592_s4 + $0x10] sm:$0xff] (!%p370_p2)  }
   0x7   : > { %2007 = vmatpush3.bf16.msra.mxu0 (!%p370_p2), %v2171_v8  ;;  %2015 = vmatpush3.bf16.msra.mxu1 (!%p370_p2), %v2172_v9  ;;  %v1841_v17 = vld [vmem:[%s2590_s2] ss:$0 sm:$0xff] (!%p370_p2)  ;;  %v2176_v24 = vld [vmem:[%s2596_s8 + $0x8] sm:$0xff] (!%p370_p2)   ;;  %v2178_v49 = vld [vmem:[%s2592_s4 + $0x18] sm:$0xff] (!%p370_p2)   ;;  %s2225_s13 = smov (!%p370_p2), 8   ;;  %vm1077_vm4 = vcmask (!%p370_p2), 130112  }
   0x8   : > { %2008 = vmatprep.subr.bf16.mxu0 (!%p370_p2), %v2223_v10  ;;  %2016 = vmatprep.subr.bf16.mxu1 (!%p370_p2), %v2223_v10  ;;  %v1842_v19 = vld [vmem:[%s2591_s3] ss:$0 sm:$0xff] (!%p370_p2)  ;;  %v2179_v50 = vld [vmem:[%s2596_s8 + $0x10] sm:$0xff] (!%p370_p2)   ;;  %v2180_v51 = vld [vmem:[%s2596_s8 + $0x18] sm:$0xff] (!%p370_p2)   ;;  %s2226_s14 = smov (!%p370_p2), 16   ;;  %vm1387_vm5 = vcmask (!%p370_p2), 195712  }
   0x9   : > { %2010 = vmatprep.mubr.msk.bf16.mxu0 (!%p370_p2), %vm2224_vm1, %v2223_v10  ;;  %2018 = vmatprep.mubr.msk.bf16.mxu1 (!%p370_p2), %vm2224_vm1, %v2223_v10  ;;  %v2175_v22 = vld [vmem:[%s2596_s8] sm:$0xff] (!%p370_p2)   ;;  %s2227_s19 = smov (!%p370_p2), 24   ;;  %vm1697_vm6 = vcmask (!%p370_p2), 261312   ;;  %vm1770_vm7 = vcmask (!%p370_p2), 257024  }
   0xa   : > { %v1847_v25 = vld [vmem:[%s2595_s7] ss:$0 sm:$0xff] (!%p370_p2) }
   0xb   : > { %2009 = vmatpush3.bf16.msra.mxu0 (!%p370_p2), %v2173_v11  ;;  %2017 = vmatpush3.bf16.msra.mxu1 (!%p370_p2), %v2174_v12  ;;  %v1843_v36 = vld [vmem:[%s2593_s5] ss:$0 sm:$0xff] (!%p370_p2) }
   0xc   : > { %2022 = vmatprep.subr.bf16.mxu0 (!%p370_p2), %v2223_v10  ;;  %2030 = vmatprep.subr.bf16.mxu1 (!%p370_p2), %v2223_v10  ;;  %v1851_v38 = vld [vmem:[%s2597_s9] ss:$0 sm:$0xff] (!%p370_p2) }
   0xd   : > { %s2602_s22 = smov (!%p412_p3, %s1834_s22), 1 }
   0xe   : > { %s1839_s23 = sshll.u32 %s2602_s22, 2  ;;  %s418_s29 = scalar_lea.vmem %s2589_s1, %s2602_s22 }
   0xf   : > { %s415_s26 = scalar_lea.vmem %s2588_s0, %s1839_s23  ;;  %v2409_v53 = vld [vmem:[%s418_s29] ss:$0 sm:$0xff]  ;;  %s422_s27 = scalar_lea.vmem %s2600_s12, %s1839_s23 }
  0x10   : > { %v424_v0 = vld [vmem:[%s415_s26] sm:$0xf] }
  0x11   : > { %v2309_v1 = vunpack.c.l.bf16 %v424_v0  ;;  %v1881_v0 = vld [vmem:[%s2597_s9 + $0x1] ss:$0 sm:$0xff] }
  0x13   : > { %v429_v2 = vsel %vm428_vm0, %v2309_v1, 0.0 }
  0x14   : > { %430 = vadd.xlane.f32.xlu0 %v429_v2 }
  0xa1   : > { %v431_v3 = vpop.xlane.xlu0 %430 }
  0xa2   : > { %v433_v4 = vmul.f32 0.03125, %v431_v3 }
  0xa4   : > { %v434_v5 = vsub.f32 %v2309_v1, %v433_v4 }
  0xa6   : > { %v435_v6 = vmul.f32 %v434_v5, %v434_v5 }
  0xa8   : > { %v436_v7 = vsel %vm428_vm0, %v435_v6, 0.0 }
  0xa9   : > { %437 = vadd.xlane.f32.xlu0 %v436_v7 }
 0x136   : > { %v438_v13 = vpop.xlane.xlu0 %437 }
 0x137   : > { %v439_v14 = vmul.f32 0.03125, %v438_v13 }
 0x139   : > { %v440_v15 = vadd.f32 1e-05, %v439_v14 }
 0x13b   : > { %2197 = vrsqrt.f32 %v440_v15 }
 0x145   : > { %v2198_v16 = vpop.eup %2197 }
 0x146   : > { %v442_v18 = vmul.f32 %v2198_v16, %v434_v5 }
 0x148   : > { %v449_v20 = vmul.f32 %v1841_v17, %v442_v18  ;;  %v2181_v18 = vld [vmem:[%s2594_s6 + $0x10] sm:$0xff]  }
 0x14a   : > { %v456_v21 = vadd.f32 %v1842_v19, %v449_v20  ;;  %v2182_v20 = vld [vmem:[%s2594_s6 + $0x18] sm:$0xff]  }
 0x14c   : > { %v2346_v23 = vpack.c.bf16 %v456_v21, %v456_v21 }
 0x14e   : > { %2011 = vmatmul.mubr.msk.bf16.vlgmr.msra.gmra.mrb[0].mxu0 %vm428_vm0, %v2346_v23  ;;  %2019 = vmatmul.mubr.msk.bf16.vlgmr.msra.gmra.mrb[0].mxu1 %vm428_vm0, %v2346_v23 }
 0x14f   : > { %2023 = vmatpush3.bf16.msra.mxu0 %v2175_v22  ;;  %2026 = vmatprep.mubr.msk.bf16.mxu0 %vm2224_vm1, %v2223_v10 }
 0x150   : > { %2024 = vmatprep.subr.bf16.mxu0 %v2223_v10  ;;  %2032 = vmatprep.mubr.msk.bf16.mxu1 %vm2224_vm1, %v2223_v10 }
 0x153   : > { %2025 = vmatpush3.bf16.msra.mxu0 %v2176_v24 }
 0x154   : > { %2036 = vmatprep.subr.bf16.mxu0 %v2223_v10 }
 0x156   : > { %2027 = vmatmul.mubr.msk.bf16.vlgmr.msra.gmra.mrb[4].mxu0 %vm428_vm0, %v2346_v23 }
 0x157   : > { %2038 = vmatprep.mubr.msk.bf16.mxu0 %vm2224_vm1, %v2223_v10 }
 0x221   : > { %v519_v26 = vpop.f32.mrb[0].mxu0  ;;  %v582_v27 = vpop.f32.mrb[0].mxu1 }
 0x222   : > { %v583_v28 = vadd.f32 %v1847_v25, %v582_v27  ;;  %v2012_v29 = vpop.f32.mrb[1].mxu0  ;;  %v2020_v30 = vpop.f32.mrb[1].mxu1  ;;  %v520_v39 = vadd.f32 %v1843_v36, %v519_v26  ;;  %v1872_v26 = vld [vmem:[%s2595_s7 + $0x1] ss:$0 sm:$0xff] }
 0x223   : > { %v522_v31 = vpop.f32.mrb[2].mxu0  ;;  %v585_v32 = vpop.f32.mrb[2].mxu1  ;;  %v2183_v36 = vld [vmem:[%s2592_s4 + $0x20] sm:$0xff]  }
 0x224   : > { %v652_v33 = vpack.c.bf16 %v583_v28, %v583_v28  ;;  %v2013_v34 = vpop.f32.mrb[3].mxu0  ;;  %v2021_v35 = vpop.f32.mrb[3].mxu1  ;;  %v651_v45 = vpack.c.bf16 %v520_v39, %v520_v39  ;;  %v2185_v39 = vld [vmem:[%s2596_s8 + $0x20] sm:$0xff]  }
 0x226   : > { %v658_v37 = vsel %vm653_vm2, %v652_v33, 0  ;;  %v1863_v33 = vld [vmem:[%s2593_s5 + $0x1] ss:$0 sm:$0xff] }
 0x227   : > { %2031 = vmatpush3.bf16.xpose.msra.mxu1 %v658_v37 }
 0x228   : > { %2042 = vmatprep.subr.bf16.mxu1 %v2223_v10 }
 0x229   : > { %v645_v40 = vpop.f32.mrb[4].mxu0 }
 0x22a   : > { %v646_v41 = vadd.f32 %v1851_v38, %v645_v40  ;;  %v2028_v42 = vpop.f32.mrb[5].mxu0  ;;  %v2184_v38 = vld [vmem:[%s2592_s4 + $0x28] sm:$0xff]  }
 0x22b   : > { %v648_v43 = vpop.f32.mrb[6].mxu0  ;;  %v2186_v40 = vld [vmem:[%s2596_s8 + $0x28] sm:$0xff]  }
 0x22c   : > { %v720_v46 = vpack.c.bf16 %v646_v41, %v646_v41  ;;  %v2029_v47 = vpop.f32.mrb[7].mxu0 }
 0x22e   : > { %v726_v48 = vsel %vm724_vm3, %v720_v46, 0  ;;  %2033 = vmatmul.mubr.msk.bf16.vlgmr.msra.gmra.mrb[4].mxu1 %vm653_vm2, %v651_v45 }
 0x22f   : > { %2037 = vmatpush3.bf16.msra.mxu0 %v726_v48  ;;  %2043 = vmatpush3.bf16.msra.mxu1 %v2177_v44 }
 0x230   : > { %2044 = vmatprep.subr.bf16.mxu1 %v2223_v10  ;;  %2046 = vmatprep.mubr.msk.bf16.mxu1 %vm2224_vm1, %v2223_v10 }
 0x231   : > { %2050 = vmatprep.subr.bf16.mxu0 %v2223_v10 }
 0x233   : > { %2045 = vmatpush3.bf16.msra.mxu1 %v2178_v49 }
 0x234   : > { %2058 = vmatprep.subr.bf16.mxu1 %v2223_v10 }
 0x236   : > { %2047 = vmatmul.mubr.msk.bf16.vlgmr.msra.gmra.mrb[8].mxu1 %vm428_vm0, %v2346_v23 }
 0x237   : > { %2059 = vmatpush3.bf16.msra.mxu1 %v2179_v50  ;;  %2062 = vmatprep.mubr.msk.bf16.mxu1 %vm2224_vm1, %v2223_v10 }
 0x238   : > { %2060 = vmatprep.subr.bf16.mxu1 %v2223_v10 }
 0x23b   : > { %2061 = vmatpush3.bf16.msra.mxu1 %v2180_v51 }
 0x23c   : > { %2072 = vmatprep.subr.bf16.mxu1 %v2223_v10 }
 0x23e   : > { %2063 = vmatmul.mubr.msk.bf16.vlgmr.msra.gmra.mrb[12].mxu1 %vm428_vm0, %v2346_v23 }
 0x23f   : > { %2074 = vmatprep.mubr.msk.bf16.mxu1 %vm2224_vm1, %v2223_v10 }
 0x301   : > { %v694_v52 = vpop.f32.mrb[4].mxu1 }
 0x302   : > { %v700_v54 = vmul.f32 0.35355338, %v694_v52  ;;  %v2034_v55 = vpop.f32.mrb[5].mxu1  ;;  %v1910_v52 = vld [vmem:[%s2597_s9 + $0x2] ss:$0 sm:$0xff] }
 0x303   : > { %v697_v56 = vpop.f32.mrb[6].mxu1 }
 0x304   : > { %v2035_v57 = vpop.f32.mrb[7].mxu1  ;;  %v707_v58 = vadd.f32 %v2409_v53, %v700_v54 }
 0x306   : > { %v708_v59 = vsel %vm653_vm2, %v707_v58, -inf }
 0x307   : > { %709 = vmax.xlane.f32.xlu1 %v708_v59 }
 0x309   : > { %v828_v60 = vpop.f32.mrb[8].mxu1 }
 0x30a   : > { %v2048_v61 = vpop.f32.mrb[9].mxu1  ;;  %v829_v35 = vadd.f32 %v1863_v33, %v828_v60 }
 0x30b   : > { %v831_v62 = vpop.f32.mrb[10].mxu1 }
 0x30c   : > { %v2049_v63 = vpop.f32.mrb[11].mxu1  ;;  %v964_v37 = vpack.c.bf16 %v829_v35, %v829_v35 }
 0x311   : > { %v958_v2 = vpop.f32.mrb[12].mxu1 }
 0x312   : > { %v959_v3 = vadd.f32 %v1881_v0, %v958_v2  ;;  %v2064_v4 = vpop.f32.mrb[13].mxu1 }
 0x313   : > { %v961_v5 = vpop.f32.mrb[14].mxu1 }
 0x314   : > { %v1026_v6 = vpack.c.bf16 %v959_v3, %v959_v3  ;;  %v2065_v7 = vpop.f32.mrb[15].mxu1 }
 0x316   : > { %v1031_v8 = vsel %vm724_vm3, %v1026_v6, 0  ;;  %v2187_v6 = vld [vmem:[%s2594_s6 + $0x20] sm:$0xff]  }
 0x317   : > { %2073 = vmatpush3.bf16.msra.mxu1 %v1031_v8  ;;  %v2188_v8 = vld [vmem:[%s2594_s6 + $0x28] sm:$0xff]  }
 0x318   : > { %2086 = vmatprep.subr.bf16.mxu1 %v2223_v10 }
 0x394   : > { %v710_v9 = vpop.xlane.xlu1 %709 }
 0x395   : > { %v711_v11 = vsub.f32 %v707_v58, %v710_v9 }
 0x397   : > { %v712_v12 = vmul.f32 1.442695, %v711_v11 }
 0x399   : > { %2199 = vpow2.f32 %v712_v12 }
 0x3a3   : > { %v2200_v13 = vpop.eup %2199 }
 0x3a4   : > { %v714_v14 = vsel %vm653_vm2, %v2200_v13, 0.0 }
 0x3a5   : > { %715 = vadd.xlane.f32.xlu1 %v714_v14  ;;  %v1901_v14 = vld [vmem:[%s2595_s7 + $0x2] ss:$0 sm:$0xff] }
 0x432   : > { %v716_v15 = vpop.xlane.xlu1 %715 }
 0x433   : > { %2201 = vrcp.f32 %v716_v15 }
 0x43d   : > { %v2202_v16 = vpop.eup %2201 }
 0x43e   : > { %v718_v17 = vmul.f32 %v2202_v16, %v2200_v13 }
 0x440   : > { %v719_v19 = vpack.c.bf16 %v718_v17, %v718_v17 }
 0x442   : > { %2039 = vmatmul.mubr.msk.bf16.vlgmr.msra.gmra.mrb[8].mxu0 %vm653_vm2, %v719_v19 }
 0x443   : > { %2051 = vmatpush3.bf16.msra.mxu0 %v2181_v18  ;;  %2054 = vmatprep.mubr.msk.bf16.mxu0 %vm2224_vm1, %v2223_v10 }
 0x444   : > { %2052 = vmatprep.subr.bf16.mxu0 %v2223_v10 }
 0x447   : > { %2053 = vmatpush3.bf16.msra.mxu0 %v2182_v20 }
 0x448   : > { %2066 = vmatprep.subr.bf16.mxu0 %v2223_v10 }
 0x44a   : > { %2055 = vmatmul.mubr.msk.bf16.vlgmr.msra.gmra.mrb[12].mxu0 %vm428_vm0, %v2346_v23 }
 0x44b   : > { %2068 = vmatprep.mubr.msk.bf16.mxu0 %vm2224_vm1, %v2223_v10 }
 0x515   : > { %v762_v21 = vpop.f32.mrb[8].mxu0 }
 0x516   : > { %768 = vst.msk [vmem:[#allocation2] sm:$0xff] %vm653_vm2, %v762_v21  ;;  %v2040_v22 = vpop.f32.mrb[9].mxu0  ;;  %v1892_v21 = vld [vmem:[%s2593_s5 + $0x2] ss:$0 sm:$0xff] }
 0x517   : > { %v765_v24 = vpop.f32.mrb[10].mxu0 }
 0x518   : > { %v2041_v25 = vpop.f32.mrb[11].mxu0 }
 0x519   : > { %v2189_v25 = vld [vmem:[%s2592_s4 + $0x30] sm:$0xff]  }
 0x51d   : > { %v893_v27 = vpop.f32.mrb[12].mxu0 }
 0x51e   : > { %v894_v28 = vadd.f32 %v1872_v26, %v893_v27  ;;  %v2056_v29 = vpop.f32.mrb[13].mxu0  ;;  %v2190_v27 = vld [vmem:[%s2592_s4 + $0x38] sm:$0xff]  }
 0x51f   : > { %v896_v30 = vpop.f32.mrb[14].mxu0  ;;  %v2192_v29 = vld [vmem:[%s2596_s8 + $0x38] sm:$0xff]  }
 0x520   : > { %v965_v31 = vpack.c.bf16 %v894_v28, %v894_v28  ;;  %v2057_v32 = vpop.f32.mrb[15].mxu0  ;;  %v2191_v28 = vld [vmem:[%s2596_s8 + $0x30] sm:$0xff]  }
 0x522   : > { %v970_v34 = vsel %vm653_vm2, %v965_v31, 0 }
 0x523   : > { %2067 = vmatpush3.bf16.xpose.msra.mxu0 %v970_v34 }
 0x524   : > { %2078 = vmatprep.subr.bf16.mxu0 %v2223_v10 }
 0x52a   : > { %2069 = vmatmul.mubr.msk.bf16.vlgmr.msra.gmra.mrb[16].mxu0 %vm653_vm2, %v964_v37 }
 0x52b   : > { %2079 = vmatpush3.bf16.msra.mxu0 %v2183_v36  ;;  %2082 = vmatprep.mubr.msk.bf16.mxu0 %vm2224_vm1, %v2223_v10 }
 0x52c   : > { %2080 = vmatprep.subr.bf16.mxu0 %v2223_v10 }
 0x52f   : > { %2081 = vmatpush3.bf16.msra.mxu0 %v2184_v38 }
 0x530   : > { %2094 = vmatprep.subr.bf16.mxu0 %v2223_v10 }
 0x532   : > { %2083 = vmatmul.mubr.msk.bf16.vlgmr.msra.gmra.mrb[20].mxu0 %vm428_vm0, %v2346_v23 }
 0x533   : > { %2095 = vmatpush3.bf16.msra.mxu0 %v2185_v39  ;;  %2098 = vmatprep.mubr.msk.bf16.mxu0 %vm2224_vm1, %v2223_v10 }
 0x534   : > { %2096 = vmatprep.subr.bf16.mxu0 %v2223_v10 }
 0x537   : > { %2097 = vmatpush3.bf16.msra.mxu0 %v2186_v40 }
 0x538   : > { %2108 = vmatprep.subr.bf16.mxu0 %v2223_v10 }
 0x53a   : > { %2099 = vmatmul.mubr.msk.bf16.vlgmr.msra.gmra.mrb[24].mxu0 %vm428_vm0, %v2346_v23 }
 0x53b   : > { %2110 = vmatprep.mubr.msk.bf16.mxu0 %vm2224_vm1, %v2223_v10 }
 0x5fd   : > { %v1006_v41 = vpop.f32.mrb[16].mxu0 }
 0x5fe   : > { %v1012_v42 = vmul.f32 0.35355338, %v1006_v41  ;;  %v2070_v43 = vpop.f32.mrb[17].mxu0  ;;  %v1939_v41 = vld [vmem:[%s2597_s9 + $0x3] ss:$0 sm:$0xff] }
 0x5ff   : > { %v1009_v44 = vpop.f32.mrb[18].mxu0 }
 0x600   : > { %v2071_v45 = vpop.f32.mrb[19].mxu0  ;;  %v1013_v46 = vadd.f32 %v2409_v53, %v1012_v42 }
 0x602   : > { %v1014_v47 = vsel %vm653_vm2, %v1013_v46, -inf }
 0x603   : > { %1015 = vmax.xlane.f32.xlu0 %v1014_v47 }
 0x605   : > { %v1138_v48 = vpop.f32.mrb[20].mxu0 }
 0x606   : > { %v2084_v49 = vpop.f32.mrb[21].mxu0  ;;  %v1139_v24 = vadd.f32 %v1892_v21, %v1138_v48 }
 0x607   : > { %v1141_v50 = vpop.f32.mrb[22].mxu0 }
 0x608   : > { %v2085_v51 = vpop.f32.mrb[23].mxu0  ;;  %v1274_v26 = vpack.c.bf16 %v1139_v24, %v1139_v24 }
 0x60d   : > { %v1268_v54 = vpop.f32.mrb[24].mxu0 }
 0x60e   : > { %v1269_v55 = vadd.f32 %v1910_v52, %v1268_v54  ;;  %v2100_v56 = vpop.f32.mrb[25].mxu0 }
 0x60f   : > { %v1271_v57 = vpop.f32.mrb[26].mxu0 }
 0x610   : > { %v1336_v58 = vpack.c.bf16 %v1269_v55, %v1269_v55  ;;  %v2101_v59 = vpop.f32.mrb[27].mxu0 }
 0x612   : > { %v1341_v60 = vsel %vm724_vm3, %v1336_v58, 0  ;;  %v2193_v58 = vld [vmem:[%s2594_s6 + $0x30] sm:$0xff]  }
 0x613   : > { %2109 = vmatpush3.bf16.msra.mxu0 %v1341_v60  ;;  %v2194_v60 = vld [vmem:[%s2594_s6 + $0x38] sm:$0xff]  }
 0x614   : > { %2122 = vmatprep.subr.bf16.mxu0 %v2223_v10 }
 0x690   : > { %v1016_v61 = vpop.xlane.xlu0 %1015 }
 0x691   : > { %v1017_v62 = vsub.f32 %v1013_v46, %v1016_v61 }
 0x693   : > { %v1018_v63 = vmul.f32 1.442695, %v1017_v62 }
 0x695   : > { %2203 = vpow2.f32 %v1018_v63 }
 0x69f   : > { %v2204_v0 = vpop.eup %2203 }
 0x6a0   : > { %v1020_v2 = vsel %vm653_vm2, %v2204_v0, 0.0 }
 0x6a1   : > { %1021 = vadd.xlane.f32.xlu1 %v1020_v2  ;;  %v1930_v2 = vld [vmem:[%s2595_s7 + $0x3] ss:$0 sm:$0xff] }
 0x72e   : > { %v1022_v3 = vpop.xlane.xlu1 %1021 }
 0x72f   : > { %2205 = vrcp.f32 %v1022_v3 }
 0x739   : > { %v2206_v4 = vpop.eup %2205 }
 0x73a   : > { %v1024_v5 = vmul.f32 %v2206_v4, %v2204_v0 }
 0x73c   : > { %v1025_v7 = vpack.c.bf16 %v1024_v5, %v1024_v5 }
 0x73e   : > { %2075 = vmatmul.mubr.msk.bf16.vlgmr.msra.gmra.mrb[16].mxu1 %vm653_vm2, %v1025_v7 }
 0x73f   : > { %2087 = vmatpush3.bf16.msra.mxu1 %v2187_v6  ;;  %2090 = vmatprep.mubr.msk.bf16.mxu1 %vm2224_vm1, %v2223_v10 }
 0x740   : > { %2088 = vmatprep.subr.bf16.mxu1 %v2223_v10 }
 0x743   : > { %2089 = vmatpush3.bf16.msra.mxu1 %v2188_v8 }
 0x744   : > { %2102 = vmatprep.subr.bf16.mxu1 %v2223_v10 }
 0x746   : > { %2091 = vmatmul.mubr.msk.bf16.vlgmr.msra.gmra.mrb[20].mxu1 %vm428_vm0, %v2346_v23 }
 0x747   : > { %2104 = vmatprep.mubr.msk.bf16.mxu1 %vm2224_vm1, %v2223_v10 }
 0x811   : > { %v2493_v9 = vpop.f32.mrb[16].mxu1 }
 0x812   : > { %v2076_v11 = vpop.f32.mrb[17].mxu1 }
 0x813   : > { %v1070_v12 = vpop.f32.mrb[18].mxu1 }
 0x814   : > { %v2077_v13 = vpop.f32.mrb[19].mxu1 }
 0x819   : > { %v1203_v15 = vpop.f32.mrb[20].mxu1 }
 0x81a   : > { %v1204_v16 = vadd.f32 %v1901_v14, %v1203_v15  ;;  %v2092_v17 = vpop.f32.mrb[21].mxu1 }
 0x81b   : > { %v1206_v18 = vpop.f32.mrb[22].mxu1 }
 0x81c   : > { %v1275_v19 = vpack.c.bf16 %v1204_v16, %v1204_v16  ;;  %v2093_v20 = vpop.f32.mrb[23].mxu1 }
 0x81e   : > { %v1280_v22 = vsel %vm653_vm2, %v1275_v19, 0 }
 0x81f   : > { %2103 = vmatpush3.bf16.xpose.msra.mxu1 %v1280_v22 }
 0x820   : > { %2114 = vmatprep.subr.bf16.mxu1 %v2223_v10 }
 0x826   : > { %2105 = vmatmul.mubr.msk.bf16.vlgmr.msra.gmra.mrb[24].mxu1 %vm653_vm2, %v1274_v26 }
 0x827   : > { %2115 = vmatpush3.bf16.msra.mxu1 %v2189_v25  ;;  %2118 = vmatprep.mubr.msk.bf16.mxu1 %vm2224_vm1, %v2223_v10 }
 0x828   : > { %2116 = vmatprep.subr.bf16.mxu1 %v2223_v10 }
 0x82b   : > { %2117 = vmatpush3.bf16.msra.mxu1 %v2190_v27 }
 0x82c   : > { %2130 = vmatprep.subr.bf16.mxu1 %v2223_v10 }
 0x82e   : > { %2119 = vmatmul.mubr.msk.bf16.vlgmr.msra.gmra.mrb[28].mxu1 %vm428_vm0, %v2346_v23 }
 0x82f   : > { %2131 = vmatpush3.bf16.msra.mxu1 %v2191_v28  ;;  %2134 = vmatprep.mubr.msk.bf16.mxu1 %vm2224_vm1, %v2223_v10 }
 0x830   : > { %2132 = vmatprep.subr.bf16.mxu1 %v2223_v10 }
 0x833   : > { %2133 = vmatpush3.bf16.msra.mxu1 %v2192_v29 }
 0x834   : > { %2144 = vmatprep.subr.bf16.mxu1 %v2223_v10 }
 0x836   : > { %2135 = vmatmul.mubr.msk.bf16.vlgmr.msra.gmra.mrb[32].mxu1 %vm428_vm0, %v2346_v23 }
 0x837   : > { %2146 = vmatprep.mubr.msk.bf16.mxu1 %vm2224_vm1, %v2223_v10 }
 0x8f9   : > { %v1316_v30 = vpop.f32.mrb[24].mxu1 }
 0x8fa   : > { %v1322_v31 = vmul.f32 0.35355338, %v1316_v30  ;;  %v2106_v32 = vpop.f32.mrb[25].mxu1 }
 0x8fb   : > { %v1319_v33 = vpop.f32.mrb[26].mxu1  ;;  %v2196_v32 = vld [vmem:[%s2598_s10 + $0x8] sm:$0xff]  }
 0x8fc   : > { %v2107_v34 = vpop.f32.mrb[27].mxu1  ;;  %v1323_v35 = vadd.f32 %v2409_v53, %v1322_v31  ;;  %v2195_v31 = vld [vmem:[%s2598_s10] sm:$0xff]  }
 0x8fe   : > { %v1324_v36 = vsel %vm653_vm2, %v1323_v35, -inf }
 0x8ff   : > { %1325 = vmax.xlane.f32.xlu0 %v1324_v36 }
 0x901   : > { %v1448_v37 = vpop.f32.mrb[28].mxu1 }
 0x902   : > { %v2120_v38 = vpop.f32.mrb[29].mxu1 }
 0x903   : > { %v1451_v39 = vpop.f32.mrb[30].mxu1 }
 0x904   : > { %v2121_v40 = vpop.f32.mrb[31].mxu1 }
 0x909   : > { %v1578_v42 = vpop.f32.mrb[32].mxu1 }
 0x90a   : > { %v1579_v43 = vadd.f32 %v1939_v41, %v1578_v42  ;;  %v2136_v44 = vpop.f32.mrb[33].mxu1 }
 0x90b   : > { %v1581_v45 = vpop.f32.mrb[34].mxu1 }
 0x90c   : > { %v1646_v46 = vpack.c.bf16 %v1579_v43, %v1579_v43  ;;  %v2137_v47 = vpop.f32.mrb[35].mxu1 }
 0x90e   : > { %v1651_v48 = vsel %vm724_vm3, %v1646_v46, 0 }
 0x90f   : > { %2145 = vmatpush3.bf16.msra.mxu1 %v1651_v48 }
 0x98c   : > { %v1326_v49 = vpop.xlane.xlu0 %1325 }
 0x98d   : > { %v1327_v50 = vsub.f32 %v1323_v35, %v1326_v49 }
 0x98f   : > { %v1328_v51 = vmul.f32 1.442695, %v1327_v50 }
 0x991   : > { %2207 = vpow2.f32 %v1328_v51 }
 0x99b   : > { %v2208_v52 = vpop.eup %2207 }
 0x99c   : > { %v1330_v54 = vsel %vm653_vm2, %v2208_v52, 0.0 }
 0x99d   : > { %1331 = vadd.xlane.f32.xlu1 %v1330_v54 }
 0xa2a   : > { %v1332_v55 = vpop.xlane.xlu1 %1331 }
 0xa2b   : > { %2209 = vrcp.f32 %v1332_v55 }
 0xa35   : > { %v2210_v56 = vpop.eup %2209 }
 0xa36   : > { %v1334_v57 = vmul.f32 %v2210_v56, %v2208_v52 }
 0xa38   : > { %v1335_v59 = vpack.c.bf16 %v1334_v57, %v1334_v57 }
 0xa3a   : > { %2111 = vmatmul.mubr.msk.bf16.vlgmr.msra.gmra.mrb[28].mxu0 %vm653_vm2, %v1335_v59 }
 0xa3b   : > { %2123 = vmatpush3.bf16.msra.mxu0 %v2193_v58  ;;  %2126 = vmatprep.mubr.msk.bf16.mxu0 %vm2224_vm1, %v2223_v10 }
 0xa3c   : > { %2124 = vmatprep.subr.bf16.mxu0 %v2223_v10 }
 0xa3f   : > { %2125 = vmatpush3.bf16.msra.mxu0 %v2194_v60 }
 0xa40   : > { %2138 = vmatprep.subr.bf16.mxu0 %v2223_v10 }
 0xa42   : > { %2127 = vmatmul.mubr.msk.bf16.vlgmr.msra.gmra.mrb[32].mxu0 %vm428_vm0, %v2346_v23  ;;  %v1921_v23 = vld [vmem:[%s2593_s5 + $0x3] ss:$0 sm:$0xff] }
 0xa43   : > { %2140 = vmatprep.mubr.msk.bf16.mxu0 %vm2224_vm1, %v2223_v10  ;;  %v1449_v12 = vadd.f32 %v1921_v23, %v1448_v37 }
 0xa45   : > { %v1584_v13 = vpack.c.bf16 %v1449_v12, %v1449_v12 }
 0xb0d   : > { %v1377_v61 = vpop.f32.mrb[28].mxu0 }
 0xb0e   : > { %v2112_v62 = vpop.f32.mrb[29].mxu0 }
 0xb0f   : > { %v1380_v63 = vpop.f32.mrb[30].mxu0 }
 0xb10   : > { %v2113_v0 = vpop.f32.mrb[31].mxu0 }
 0xb15   : > { %v1513_v3 = vpop.f32.mrb[32].mxu0 }
 0xb16   : > { %v1514_v4 = vadd.f32 %v1930_v2, %v1513_v3  ;;  %v2128_v5 = vpop.f32.mrb[33].mxu0 }
 0xb17   : > { %v1516_v6 = vpop.f32.mrb[34].mxu0 }
 0xb18   : > { %v1585_v7 = vpack.c.bf16 %v1514_v4, %v1514_v4  ;;  %v2129_v8 = vpop.f32.mrb[35].mxu0 }
 0xb1a   : > { %v1590_v11 = vsel %vm653_vm2, %v1585_v7, 0 }
 0xb1b   : > { %2139 = vmatpush3.bf16.xpose.msra.mxu0 %v1590_v11 }
 0xb1c   : > { %2150 = vmatprep.subr.bf16.mxu0 %v2223_v10 }
 0xb22   : > { %2141 = vmatmul.mubr.msk.bf16.vlgmr.msra.gmra.mrb[36].mxu0 %vm653_vm2, %v1584_v13 }
 0xb23   : > { %2154 = vmatprep.mubr.msk.bf16.mxu0 %vm2224_vm1, %v2223_v10  ;;  %2151 = vmatpush3.bf16.msra.mxu0 %v2195_v31 }
 0xb24   : > { %2152 = vmatprep.subr.bf16.mxu0 %v2223_v10  ;;  %v1948_v10 = vld [vmem:[%s2599_s11] ss:$0 sm:$0xff] }
 0xb27   : > { %2153 = vmatpush3.bf16.msra.mxu0 %v2196_v32 }
 0xbf5   : > { %v1626_v14 = vpop.f32.mrb[36].mxu0 }
 0xbf6   : > { %v1632_v15 = vmul.f32 0.35355338, %v1626_v14  ;;  %v2142_v16 = vpop.f32.mrb[37].mxu0 }
 0xbf7   : > { %v1629_v17 = vpop.f32.mrb[38].mxu0 }
 0xbf8   : > { %v2143_v18 = vpop.f32.mrb[39].mxu0  ;;  %v1633_v19 = vadd.f32 %v2409_v53, %v1632_v15 }
 0xbfa   : > { %v1634_v20 = vsel %vm653_vm2, %v1633_v19, -inf }
 0xbfb   : > { %1635 = vmax.xlane.f32.xlu0 %v1634_v20 }
 0xc11   : > { %1074 = vrot.lane.b32.xlu0 %v2493_v9, %s2225_s13 }
 0xc88   : > { %v1636_v21 = vpop.xlane.xlu0 %1635 }
 0xc89   : > { %v1637_v22 = vsub.f32 %v1633_v19, %v1636_v21 }
 0xc8b   : > { %v1638_v24 = vmul.f32 1.442695, %v1637_v22 }
 0xc8c   : > { %v1075_v25 = vpop.permute.xlu0 %1074 }
 0xc8d   : > { %2211 = vpow2.f32 %v1638_v24  ;;  %1078 = vst.msk [vmem:[#allocation2] sm:$0xff] %vm1077_vm4, %v1075_v25 }
 0xc97   : > { %v2212_v26 = vpop.eup %2211 }
 0xc98   : > { %v1640_v27 = vsel %vm653_vm2, %v2212_v26, 0.0 }
 0xc99   : > { %1641 = vadd.xlane.f32.xlu1 %v1640_v27 }
 0xcaa   : > { %1384 = vrot.lane.b32.xlu1 %v1377_v61, %s2226_s14 }
 0xd26   : > { %v1642_v53 = vpop.xlane.xlu1 %1641 }
 0xd27   : > { %2213 = vrcp.f32 %v1642_v53 }
 0xd2a   : > { %v1385_v28 = vpop.permute.xlu1 %1384 }
 0xd2b   : > { %1388 = vst.msk [vmem:[#allocation2] sm:$0xff] %vm1387_vm5, %v1385_v28 }
 0xd31   : > { %v2214_v29 = vpop.eup %2213 }
 0xd32   : > { %v1644_v9 = vmul.f32 %v2214_v29, %v2212_v26 }
 0xd34   : > { %v1645_v30 = vpack.c.bf16 %v1644_v9, %v1644_v9 }
 0xd36   : > { %2147 = vmatmul.mubr.msk.bf16.vlgmr.msra.gmra.mrb[36].mxu1 %vm653_vm2, %v1645_v30 }
 0xe09   : > { %v1687_v33 = vpop.f32.mrb[36].mxu1 }
 0xe0a   : > { %1694 = vrot.lane.b32.xlu1 %v1687_v33, %s2227_s19  ;;  %v2148_v34 = vpop.f32.mrb[37].mxu1 }
 0xe0b   : > { %v1690_v35 = vpop.f32.mrb[38].mxu1 }
 0xe0c   : > { %v2149_v36 = vpop.f32.mrb[39].mxu1 }
 0xe7c   : > { %v1695_v37 = vpop.permute.xlu1 %1694 }
 0xe7d   : > { %1698 = vst.msk [vmem:[#allocation2] sm:$0xff] %vm1697_vm6, %v1695_v37 }
 0xe84   : > { %v1699_v38 = vld [vmem:[#allocation2] sm:$0xff] }
 0xe85   : > { %v1704_v39 = vpack.c.bf16 %v1699_v38, %v1699_v38 }
 0xe87   : > { %2155 = vmatmul.mubr.msk.bf16.vlgmr.msra.gmra.mrb[40].mxu0 %vm428_vm0, %v1704_v39 }
 0xf5a   : > { %v1754_v40 = vpop.f32.mrb[40].mxu0 }
 0xf5b   : > { %v1760_v41 = vadd.f32 %v1754_v40, %v2309_v1  ;;  %v2156_v42 = vpop.f32.mrb[41].mxu0 }
 0xf5c   : > { %v1757_v43 = vpop.f32.mrb[42].mxu0 }
 0xf5d   : > { %v1768_v44 = vadd.f32 %v1948_v10, %v1760_v41  ;;  %v2157_v45 = vpop.f32.mrb[43].mxu0 }
 0xf5f   : > { %v1769_v46 = vpack.c.bf16 %v1768_v44, %v1768_v44 }
 0xf61   : > { %1771 = vst.msk [vmem:[%s422_s27] sm:$0xf] %vm1770_vm7, %v1769_v46 }
 0xf62 PF: > { %s22_s21 = sadd.s32 1, %s2221_s21  }
 0xf63   : > { %p19_p4 = scmp.ge.s32.totalorder %s22_s21, 4  }
 0xf65   :  { %21 = sbr.rel (!%p19_p4) target bundleno = 1 (0x1), region = 119 }

// kernel: _lambda_.17
= control target key start
LH: loop header
LB: loop body
LE: loop exit
PB: predicated region body
PF: predicated region fallthrough
CT: control target
= control target key end

     0   :  { %s2300_s21 = smov 0   ;;  %s2596_s0 = inlined_call_operand.vmem [shape: bf16[2,8,32], index: 0, kind: input, shape index: {}]   ;;  %s2597_s1 = inlined_call_operand.vmem [shape: f32[2,1,8], index: 1, kind: input, shape index: {}]   ;;  %s2598_s2 = inlined_call_operand.vmem [shape: f32[1,32], index: 2, kind: input, shape index: {}]   ;;  %s2599_s3 = inlined_call_operand.vmem [shape: f32[1,32], index: 3, kind: input, shape index: {}]   ;;  %s2600_s4 = inlined_call_operand.vmem [shape: bf16[4,32,8], index: 4, kind: input, shape index: {}]   ;;  %s2601_s5 = inlined_call_operand.vmem [shape: f32[4,1,8], index: 5, kind: input, shape index: {}]   ;;  %s2602_s6 = inlined_call_operand.vmem [shape: bf16[4,32,8], index: 6, kind: input, shape index: {}]   ;;  %s2603_s7 = inlined_call_operand.vmem [shape: f32[4,1,8], index: 7, kind: input, shape index: {}]   ;;  %s2604_s8 = inlined_call_operand.vmem [shape: bf16[4,32,8], index: 8, kind: input, shape index: {}]   ;;  %s2605_s9 = inlined_call_operand.vmem [shape: f32[4,1,8], index: 9, kind: input, shape index: {}]   ;;  %s2606_s10 = inlined_call_operand.vmem [shape: bf16[32,32], index: 10, kind: input, shape index: {}]   ;;  %s2607_s11 = inlined_call_operand.vmem [shape: f32[1,32], index: 11, kind: input, shape index: {}]   ;;  %s2608_s12 = inlined_call_operand.vmem [shape: bf16[2,8,32], index: 12, kind: output, shape index: {}]  }
   0x1 LB: > { %s1841_s22 = sadd.s32 4294967295, %s2228_s21   ;;  %p1845_p0 = scmp.ge.s32.totalorder %s2228_s21, 1  ;;  %s2228_s21 = sphi %s2300_s21, %s22_s21  }
   0x2   : > { %p369_p1 = scmp.lt.s32.totalorder %s2228_s21, 3 }
   0x4   : > { %p370_p2 = pnand %p1845_p0, %p369_p1 }
   0x5   : > { %p412_p3 = scmp.lt.s32.totalorder (!%p370_p2), %s1841_s22, 1  ;;  %vm428_vm0 = vcmask (!%p370_p2), 261120   ;;  %v2178_v8 = vld [vmem:[%s2600_s4] sm:$0xff] (!%p370_p2)   ;;  %v2230_v10 = vmov (!%p370_p2), 0.0   ;;  %v2180_v11 = vld [vmem:[%s2600_s4 + $0x8] sm:$0xff] (!%p370_p2)   ;;  %vm2231_vm1 = vmmov (!%p370_p2), 0   ;;  %v458_v52 = vlaneseq (!%p370_p2) }
   0x6   : > { %373 = sbr.rel (%p370_p2) target bundleno = 3938 (0xf62), region = 68  ;;  %v2179_v9 = vld [vmem:[%s2602_s6] sm:$0xff] (!%p370_p2)   ;;  %2013 = vmatprep.subr.bf16.mxu0 (!%p370_p2), %v2230_v10  ;;  %2021 = vmatprep.subr.bf16.mxu1 (!%p370_p2), %v2230_v10  ;;  %v2181_v12 = vld [vmem:[%s2602_s6 + $0x8] sm:$0xff] (!%p370_p2)   ;;  %vm666_vm2 = vcmask (!%p370_p2), 64512   ;;  %vm731_vm3 = vcmask (!%p370_p2), 1043456   ;;  %v2184_v44 = vld [vmem:[%s2600_s4 + $0x10] sm:$0xff] (!%p370_p2)  }
   0x7   : > { %2014 = vmatpush3.bf16.msra.mxu0 (!%p370_p2), %v2178_v8  ;;  %2022 = vmatpush3.bf16.msra.mxu1 (!%p370_p2), %v2179_v9  ;;  %v1848_v17 = vld [vmem:[%s2598_s2] ss:$0 sm:$0xff] (!%p370_p2)  ;;  %v2183_v24 = vld [vmem:[%s2604_s8 + $0x8] sm:$0xff] (!%p370_p2)   ;;  %v2185_v49 = vld [vmem:[%s2600_s4 + $0x18] sm:$0xff] (!%p370_p2)   ;;  %v459_v53 = vshrl.u32 (!%p370_p2), %v458_v52, 7  ;;  %v461_v54 = vand.u32 (!%p370_p2), 127, %v458_v52 }
   0x8   : > { %2015 = vmatprep.subr.bf16.mxu0 (!%p370_p2), %v2230_v10  ;;  %2023 = vmatprep.subr.bf16.mxu1 (!%p370_p2), %v2230_v10  ;;  %v1849_v19 = vld [vmem:[%s2599_s3] ss:$0 sm:$0xff] (!%p370_p2)  ;;  %v2186_v50 = vld [vmem:[%s2604_s8 + $0x10] sm:$0xff] (!%p370_p2)   ;;  %v2187_v51 = vld [vmem:[%s2604_s8 + $0x18] sm:$0xff] (!%p370_p2)   ;;  %s2232_s13 = smov (!%p370_p2), 8   ;;  %vm1084_vm5 = vcmask (!%p370_p2), 130112  }
   0x9   : > { %2017 = vmatprep.mubr.msk.bf16.mxu0 (!%p370_p2), %vm2231_vm1, %v2230_v10  ;;  %2025 = vmatprep.mubr.msk.bf16.mxu1 (!%p370_p2), %vm2231_vm1, %v2230_v10  ;;  %v2182_v22 = vld [vmem:[%s2604_s8] sm:$0xff] (!%p370_p2)   ;;  %vm462_vm4 = vcmp.gt.s32.totalorder (!%p370_p2), %v461_v54, %v459_v53  ;;  %s2233_s14 = smov (!%p370_p2), 16   ;;  %vm1394_vm6 = vcmask (!%p370_p2), 195712   ;;  %s2234_s19 = smov (!%p370_p2), 24   ;;  %vm1704_vm7 = vcmask (!%p370_p2), 261312   ;;  %vm1777_vm8 = vcmask (!%p370_p2), 257024  }
   0xa   : > { %v1855_v25 = vld [vmem:[%s2603_s7] ss:$0 sm:$0xff] (!%p370_p2)  ;;  %v463_v56 = vsel (!%p370_p2), %vm462_vm4, -1e+09, %v2230_v10 }
   0xb   : > { %2016 = vmatpush3.bf16.msra.mxu0 (!%p370_p2), %v2180_v11  ;;  %2024 = vmatpush3.bf16.msra.mxu1 (!%p370_p2), %v2181_v12  ;;  %v1851_v36 = vld [vmem:[%s2601_s5] ss:$0 sm:$0xff] (!%p370_p2) }
   0xc   : > { %2029 = vmatprep.subr.bf16.mxu0 (!%p370_p2), %v2230_v10  ;;  %2037 = vmatprep.subr.bf16.mxu1 (!%p370_p2), %v2230_v10  ;;  %v1859_v38 = vld [vmem:[%s2605_s9] ss:$0 sm:$0xff] (!%p370_p2) }
   0xd   : > { %s2610_s22 = smov (!%p412_p3, %s1841_s22), 1 }
   0xe   : > { %s1846_s23 = sshll.u32 %s2610_s22, 2  ;;  %s418_s29 = scalar_lea.vmem %s2597_s1, %s2610_s22 }
   0xf   : > { %s415_s26 = scalar_lea.vmem %s2596_s0, %s1846_s23  ;;  %v1850_v55 = vld [vmem:[%s418_s29] ss:$0 sm:$0xff]  ;;  %s422_s27 = scalar_lea.vmem %s2608_s12, %s1846_s23 }
  0x10   : > { %v424_v0 = vld [vmem:[%s415_s26] sm:$0xf]  ;;  %v2417_v57 = vadd.f32 %v1850_v55, %v463_v56 }
  0x11   : > { %v2316_v1 = vunpack.c.l.bf16 %v424_v0 }
  0x13   : > { %v429_v2 = vsel %vm428_vm0, %v2316_v1, 0.0 }
  0x14   : > { %430 = vadd.xlane.f32.xlu0 %v429_v2 }
  0xa1   : > { %v431_v3 = vpop.xlane.xlu0 %430 }
  0xa2   : > { %v433_v4 = vmul.f32 0.03125, %v431_v3 }
  0xa4   : > { %v434_v5 = vsub.f32 %v2316_v1, %v433_v4 }
  0xa6   : > { %v435_v6 = vmul.f32 %v434_v5, %v434_v5 }
  0xa8   : > { %v436_v7 = vsel %vm428_vm0, %v435_v6, 0.0  ;;  %v1888_v6 = vld [vmem:[%s2605_s9 + $0x1] ss:$0 sm:$0xff] }
  0xa9   : > { %437 = vadd.xlane.f32.xlu0 %v436_v7 }
 0x136   : > { %v438_v13 = vpop.xlane.xlu0 %437 }
 0x137   : > { %v439_v14 = vmul.f32 0.03125, %v438_v13 }
 0x139   : > { %v440_v15 = vadd.f32 1e-05, %v439_v14 }
 0x13b   : > { %2204 = vrsqrt.f32 %v440_v15 }
 0x145   : > { %v2205_v16 = vpop.eup %2204 }
 0x146   : > { %v442_v18 = vmul.f32 %v2205_v16, %v434_v5 }
 0x148   : > { %v449_v20 = vmul.f32 %v1848_v17, %v442_v18 }
 0x14a   : > { %v456_v21 = vadd.f32 %v1849_v19, %v449_v20 }
 0x14c   : > { %v2353_v23 = vpack.c.bf16 %v456_v21, %v456_v21 }
 0x14e   : > { %2018 = vmatmul.mubr.msk.bf16.vlgmr.msra.gmra.mrb[0].mxu0 %vm428_vm0, %v2353_v23  ;;  %2026 = vmatmul.mubr.msk.bf16.vlgmr.msra.gmra.mrb[0].mxu1 %vm428_vm0, %v2353_v23 }
 0x14f   : > { %2030 = vmatpush3.bf16.msra.mxu0 %v2182_v22  ;;  %2033 = vmatprep.mubr.msk.bf16.mxu0 %vm2231_vm1, %v2230_v10 }
 0x150   : > { %2031 = vmatprep.subr.bf16.mxu0 %v2230_v10  ;;  %2039 = vmatprep.mubr.msk.bf16.mxu1 %vm2231_vm1, %v2230_v10 }
 0x153   : > { %2032 = vmatpush3.bf16.msra.mxu0 %v2183_v24  ;;  %v2188_v24 = vld [vmem:[%s2602_s6 + $0x10] sm:$0xff]  }
 0x154   : > { %2043 = vmatprep.subr.bf16.mxu0 %v2230_v10 }
 0x156   : > { %2034 = vmatmul.mubr.msk.bf16.vlgmr.msra.gmra.mrb[4].mxu0 %vm428_vm0, %v2353_v23 }
 0x157   : > { %2045 = vmatprep.mubr.msk.bf16.mxu0 %vm2231_vm1, %v2230_v10 }
 0x221   : > { %v532_v26 = vpop.f32.mrb[0].mxu0  ;;  %v595_v27 = vpop.f32.mrb[0].mxu1 }
 0x222   : > { %v596_v28 = vadd.f32 %v1855_v25, %v595_v27  ;;  %v2019_v29 = vpop.f32.mrb[1].mxu0  ;;  %v2027_v30 = vpop.f32.mrb[1].mxu1  ;;  %v533_v39 = vadd.f32 %v1851_v36, %v532_v26  ;;  %v2189_v26 = vld [vmem:[%s2602_s6 + $0x18] sm:$0xff]  }
 0x223   : > { %v535_v31 = vpop.f32.mrb[2].mxu0  ;;  %v598_v32 = vpop.f32.mrb[2].mxu1 }
 0x224   : > { %v665_v33 = vpack.c.bf16 %v596_v28, %v596_v28  ;;  %v2020_v34 = vpop.f32.mrb[3].mxu0  ;;  %v2028_v35 = vpop.f32.mrb[3].mxu1  ;;  %v664_v45 = vpack.c.bf16 %v533_v39, %v533_v39  ;;  %v1879_v31 = vld [vmem:[%s2603_s7 + $0x1] ss:$0 sm:$0xff] }
 0x226   : > { %v671_v37 = vsel %vm666_vm2, %v665_v33, 0 }
 0x227   : > { %2038 = vmatpush3.bf16.xpose.msra.mxu1 %v671_v37 }
 0x228   : > { %2049 = vmatprep.subr.bf16.mxu1 %v2230_v10 }
 0x229   : > { %v658_v40 = vpop.f32.mrb[4].mxu0 }
 0x22a   : > { %v659_v41 = vadd.f32 %v1859_v38, %v658_v40  ;;  %v2035_v42 = vpop.f32.mrb[5].mxu0  ;;  %v1870_v38 = vld [vmem:[%s2601_s5 + $0x1] ss:$0 sm:$0xff] }
 0x22b   : > { %v661_v43 = vpop.f32.mrb[6].mxu0 }
 0x22c   : > { %v727_v46 = vpack.c.bf16 %v659_v41, %v659_v41  ;;  %v2036_v47 = vpop.f32.mrb[7].mxu0  ;;  %v2190_v41 = vld [vmem:[%s2600_s4 + $0x20] sm:$0xff]   ;;  %v2191_v43 = vld [vmem:[%s2600_s4 + $0x28] sm:$0xff]  }
 0x22e   : > { %v733_v48 = vsel %vm731_vm3, %v727_v46, 0  ;;  %2040 = vmatmul.mubr.msk.bf16.vlgmr.msra.gmra.mrb[4].mxu1 %vm666_vm2, %v664_v45  ;;  %v2193_v45 = vld [vmem:[%s2604_s8 + $0x28] sm:$0xff]  }
 0x22f   : > { %2044 = vmatpush3.bf16.msra.mxu0 %v733_v48  ;;  %2050 = vmatpush3.bf16.msra.mxu1 %v2184_v44  ;;  %v2192_v44 = vld [vmem:[%s2604_s8 + $0x20] sm:$0xff]  }
 0x230   : > { %2051 = vmatprep.subr.bf16.mxu1 %v2230_v10  ;;  %2053 = vmatprep.mubr.msk.bf16.mxu1 %vm2231_vm1, %v2230_v10 }
 0x231   : > { %2057 = vmatprep.subr.bf16.mxu0 %v2230_v10 }
 0x233   : > { %2052 = vmatpush3.bf16.msra.mxu1 %v2185_v49 }
 0x234   : > { %2065 = vmatprep.subr.bf16.mxu1 %v2230_v10 }
 0x236   : > { %2054 = vmatmul.mubr.msk.bf16.vlgmr.msra.gmra.mrb[8].mxu1 %vm428_vm0, %v2353_v23 }
 0x237   : > { %2066 = vmatpush3.bf16.msra.mxu1 %v2186_v50  ;;  %2069 = vmatprep.mubr.msk.bf16.mxu1 %vm2231_vm1, %v2230_v10 }
 0x238   : > { %2067 = vmatprep.subr.bf16.mxu1 %v2230_v10 }
 0x23b   : > { %2068 = vmatpush3.bf16.msra.mxu1 %v2187_v51 }
 0x23c   : > { %2079 = vmatprep.subr.bf16.mxu1 %v2230_v10 }
 0x23e   : > { %2070 = vmatmul.mubr.msk.bf16.vlgmr.msra.gmra.mrb[12].mxu1 %vm428_vm0, %v2353_v23 }
 0x23f   : > { %2081 = vmatprep.mubr.msk.bf16.mxu1 %vm2231_vm1, %v2230_v10 }
 0x301   : > { %v707_v58 = vpop.f32.mrb[4].mxu1 }
 0x302   : > { %v713_v59 = vmul.f32 0.35355338, %v707_v58  ;;  %v2041_v60 = vpop.f32.mrb[5].mxu1  ;;  %v1917_v58 = vld [vmem:[%s2605_s9 + $0x2] ss:$0 sm:$0xff] }
 0x303   : > { %v710_v61 = vpop.f32.mrb[6].mxu1 }
 0x304   : > { %v2042_v62 = vpop.f32.mrb[7].mxu1  ;;  %v714_v63 = vadd.f32 %v713_v59, %v2417_v57 }
 0x306   : > { %v715_v0 = vsel %vm666_vm2, %v714_v63, -inf }
 0x307   : > { %716 = vmax.xlane.f32.xlu1 %v715_v0 }
 0x309   : > { %v835_v2 = vpop.f32.mrb[8].mxu1 }
 0x30a   : > { %v2055_v3 = vpop.f32.mrb[9].mxu1  ;;  %v836_v40 = vadd.f32 %v1870_v38, %v835_v2 }
 0x30b   : > { %v838_v4 = vpop.f32.mrb[10].mxu1 }
 0x30c   : > { %v2056_v5 = vpop.f32.mrb[11].mxu1  ;;  %v971_v42 = vpack.c.bf16 %v836_v40, %v836_v40 }
 0x311   : > { %v965_v7 = vpop.f32.mrb[12].mxu1 }
 0x312   : > { %v966_v8 = vadd.f32 %v1888_v6, %v965_v7  ;;  %v2071_v9 = vpop.f32.mrb[13].mxu1 }
 0x313   : > { %v968_v11 = vpop.f32.mrb[14].mxu1 }
 0x314   : > { %v1033_v12 = vpack.c.bf16 %v966_v8, %v966_v8  ;;  %v2072_v13 = vpop.f32.mrb[15].mxu1 }
 0x316   : > { %v1038_v14 = vsel %vm731_vm3, %v1033_v12, 0  ;;  %v2194_v12 = vld [vmem:[%s2602_s6 + $0x20] sm:$0xff]  }
 0x317   : > { %2080 = vmatpush3.bf16.msra.mxu1 %v1038_v14  ;;  %v2195_v14 = vld [vmem:[%s2602_s6 + $0x28] sm:$0xff]  }
 0x318   : > { %2093 = vmatprep.subr.bf16.mxu1 %v2230_v10 }
 0x394   : > { %v717_v15 = vpop.xlane.xlu1 %716 }
 0x395   : > { %v718_v16 = vsub.f32 %v714_v63, %v717_v15 }
 0x397   : > { %v719_v17 = vmul.f32 1.442695, %v718_v16 }
 0x399   : > { %2206 = vpow2.f32 %v719_v17 }
 0x3a3   : > { %v2207_v18 = vpop.eup %2206 }
 0x3a4   : > { %v721_v19 = vsel %vm666_vm2, %v2207_v18, 0.0 }
 0x3a5   : > { %722 = vadd.xlane.f32.xlu1 %v721_v19  ;;  %v1908_v19 = vld [vmem:[%s2603_s7 + $0x2] ss:$0 sm:$0xff] }
 0x432   : > { %v723_v20 = vpop.xlane.xlu1 %722 }
 0x433   : > { %2208 = vrcp.f32 %v723_v20 }
 0x43d   : > { %v2209_v21 = vpop.eup %2208 }
 0x43e   : > { %v725_v22 = vmul.f32 %v2209_v21, %v2207_v18 }
 0x440   : > { %v726_v25 = vpack.c.bf16 %v725_v22, %v725_v22 }
 0x442   : > { %2046 = vmatmul.mubr.msk.bf16.vlgmr.msra.gmra.mrb[8].mxu0 %vm666_vm2, %v726_v25 }
 0x443   : > { %2058 = vmatpush3.bf16.msra.mxu0 %v2188_v24  ;;  %2061 = vmatprep.mubr.msk.bf16.mxu0 %vm2231_vm1, %v2230_v10 }
 0x444   : > { %2059 = vmatprep.subr.bf16.mxu0 %v2230_v10 }
 0x447   : > { %2060 = vmatpush3.bf16.msra.mxu0 %v2189_v26 }
 0x448   : > { %2073 = vmatprep.subr.bf16.mxu0 %v2230_v10 }
 0x44a   : > { %2062 = vmatmul.mubr.msk.bf16.vlgmr.msra.gmra.mrb[12].mxu0 %vm428_vm0, %v2353_v23 }
 0x44b   : > { %2075 = vmatprep.mubr.msk.bf16.mxu0 %vm2231_vm1, %v2230_v10 }
 0x515   : > { %v769_v27 = vpop.f32.mrb[8].mxu0 }
 0x516   : > { %775 = vst.msk [vmem:[#allocation2] sm:$0xff] %vm666_vm2, %v769_v27  ;;  %v2047_v28 = vpop.f32.mrb[9].mxu0  ;;  %v1899_v27 = vld [vmem:[%s2601_s5 + $0x2] ss:$0 sm:$0xff] }
 0x517   : > { %v772_v29 = vpop.f32.mrb[10].mxu0 }
 0x518   : > { %v2048_v30 = vpop.f32.mrb[11].mxu0 }
 0x519   : > { %v2196_v30 = vld [vmem:[%s2600_s4 + $0x30] sm:$0xff]  }
 0x51d   : > { %v900_v32 = vpop.f32.mrb[12].mxu0 }
 0x51e   : > { %v901_v33 = vadd.f32 %v1879_v31, %v900_v32  ;;  %v2063_v34 = vpop.f32.mrb[13].mxu0  ;;  %v2197_v32 = vld [vmem:[%s2600_s4 + $0x38] sm:$0xff]  }
 0x51f   : > { %v903_v35 = vpop.f32.mrb[14].mxu0  ;;  %v2199_v34 = vld [vmem:[%s2604_s8 + $0x38] sm:$0xff]  }
 0x520   : > { %v972_v36 = vpack.c.bf16 %v901_v33, %v901_v33  ;;  %v2064_v37 = vpop.f32.mrb[15].mxu0  ;;  %v2198_v33 = vld [vmem:[%s2604_s8 + $0x30] sm:$0xff]  }
 0x522   : > { %v977_v39 = vsel %vm666_vm2, %v972_v36, 0 }
 0x523   : > { %2074 = vmatpush3.bf16.xpose.msra.mxu0 %v977_v39 }
 0x524   : > { %2085 = vmatprep.subr.bf16.mxu0 %v2230_v10 }
 0x52a   : > { %2076 = vmatmul.mubr.msk.bf16.vlgmr.msra.gmra.mrb[16].mxu0 %vm666_vm2, %v971_v42 }
 0x52b   : > { %2086 = vmatpush3.bf16.msra.mxu0 %v2190_v41  ;;  %2089 = vmatprep.mubr.msk.bf16.mxu0 %vm2231_vm1, %v2230_v10 }
 0x52c   : > { %2087 = vmatprep.subr.bf16.mxu0 %v2230_v10 }
 0x52f   : > { %2088 = vmatpush3.bf16.msra.mxu0 %v2191_v43 }
 0x530   : > { %2101 = vmatprep.subr.bf16.mxu0 %v2230_v10 }
 0x532   : > { %2090 = vmatmul.mubr.msk.bf16.vlgmr.msra.gmra.mrb[20].mxu0 %vm428_vm0, %v2353_v23 }
 0x533   : > { %2102 = vmatpush3.bf16.msra.mxu0 %v2192_v44  ;;  %2105 = vmatprep.mubr.msk.bf16.mxu0 %vm2231_vm1, %v2230_v10 }
 0x534   : > { %2103 = vmatprep.subr.bf16.mxu0 %v2230_v10 }
 0x537   : > { %2104 = vmatpush3.bf16.msra.mxu0 %v2193_v45 }
 0x538   : > { %2115 = vmatprep.subr.bf16.mxu0 %v2230_v10 }
 0x53a   : > { %2106 = vmatmul.mubr.msk.bf16.vlgmr.msra.gmra.mrb[24].mxu0 %vm428_vm0, %v2353_v23 }
 0x53b   : > { %2117 = vmatprep.mubr.msk.bf16.mxu0 %vm2231_vm1, %v2230_v10 }
 0x5fd   : > { %v1013_v46 = vpop.f32.mrb[16].mxu0 }
 0x5fe   : > { %v1019_v47 = vmul.f32 0.35355338, %v1013_v46  ;;  %v2077_v48 = vpop.f32.mrb[17].mxu0  ;;  %v1946_v46 = vld [vmem:[%s2605_s9 + $0x3] ss:$0 sm:$0xff] }
 0x5ff   : > { %v1016_v49 = vpop.f32.mrb[18].mxu0 }
 0x600   : > { %v2078_v50 = vpop.f32.mrb[19].mxu0  ;;  %v1020_v51 = vadd.f32 %v1019_v47, %v2417_v57 }
 0x602   : > { %v1021_v52 = vsel %vm666_vm2, %v1020_v51, -inf }
 0x603   : > { %1022 = vmax.xlane.f32.xlu0 %v1021_v52 }
 0x605   : > { %v1145_v53 = vpop.f32.mrb[20].mxu0 }
 0x606   : > { %v2091_v54 = vpop.f32.mrb[21].mxu0  ;;  %v1146_v29 = vadd.f32 %v1899_v27, %v1145_v53 }
 0x607   : > { %v1148_v55 = vpop.f32.mrb[22].mxu0 }
 0x608   : > { %v2092_v56 = vpop.f32.mrb[23].mxu0  ;;  %v1281_v31 = vpack.c.bf16 %v1146_v29, %v1146_v29 }
 0x60d   : > { %v1275_v59 = vpop.f32.mrb[24].mxu0 }
 0x60e   : > { %v1276_v60 = vadd.f32 %v1917_v58, %v1275_v59  ;;  %v2107_v61 = vpop.f32.mrb[25].mxu0 }
 0x60f   : > { %v1278_v62 = vpop.f32.mrb[26].mxu0 }
 0x610   : > { %v1343_v63 = vpack.c.bf16 %v1276_v60, %v1276_v60  ;;  %v2108_v0 = vpop.f32.mrb[27].mxu0 }
 0x612   : > { %v1348_v2 = vsel %vm731_vm3, %v1343_v63, 0  ;;  %v2200_v63 = vld [vmem:[%s2602_s6 + $0x30] sm:$0xff]  }
 0x613   : > { %2116 = vmatpush3.bf16.msra.mxu0 %v1348_v2  ;;  %v2201_v2 = vld [vmem:[%s2602_s6 + $0x38] sm:$0xff]  }
 0x614   : > { %2129 = vmatprep.subr.bf16.mxu0 %v2230_v10 }
 0x690   : > { %v1023_v3 = vpop.xlane.xlu0 %1022 }
 0x691   : > { %v1024_v4 = vsub.f32 %v1020_v51, %v1023_v3 }
 0x693   : > { %v1025_v5 = vmul.f32 1.442695, %v1024_v4 }
 0x695   : > { %2210 = vpow2.f32 %v1025_v5 }
 0x69f   : > { %v2211_v6 = vpop.eup %2210 }
 0x6a0   : > { %v1027_v7 = vsel %vm666_vm2, %v2211_v6, 0.0 }
 0x6a1   : > { %1028 = vadd.xlane.f32.xlu1 %v1027_v7  ;;  %v1937_v7 = vld [vmem:[%s2603_s7 + $0x3] ss:$0 sm:$0xff] }
 0x72e   : > { %v1029_v8 = vpop.xlane.xlu1 %1028 }
 0x72f   : > { %2212 = vrcp.f32 %v1029_v8 }
 0x739   : > { %v2213_v9 = vpop.eup %2212 }
 0x73a   : > { %v1031_v11 = vmul.f32 %v2213_v9, %v2211_v6 }
 0x73c   : > { %v1032_v13 = vpack.c.bf16 %v1031_v11, %v1031_v11 }
 0x73e   : > { %2082 = vmatmul.mubr.msk.bf16.vlgmr.msra.gmra.mrb[16].mxu1 %vm666_vm2, %v1032_v13 }
 0x73f   : > { %2094 = vmatpush3.bf16.msra.mxu1 %v2194_v12  ;;  %2097 = vmatprep.mubr.msk.bf16.mxu1 %vm2231_vm1, %v2230_v10 }
 0x740   : > { %2095 = vmatprep.subr.bf16.mxu1 %v2230_v10 }
 0x743   : > { %2096 = vmatpush3.bf16.msra.mxu1 %v2195_v14 }
 0x744   : > { %2109 = vmatprep.subr.bf16.mxu1 %v2230_v10 }
 0x746   : > { %2098 = vmatmul.mubr.msk.bf16.vlgmr.msra.gmra.mrb[20].mxu1 %vm428_vm0, %v2353_v23 }
 0x747   : > { %2111 = vmatprep.mubr.msk.bf16.mxu1 %vm2231_vm1, %v2230_v10 }
 0x811   : > { %v2501_v15 = vpop.f32.mrb[16].mxu1 }
 0x812   : > { %v2083_v16 = vpop.f32.mrb[17].mxu1 }
 0x813   : > { %v1077_v17 = vpop.f32.mrb[18].mxu1 }
 0x814   : > { %v2084_v18 = vpop.f32.mrb[19].mxu1 }
 0x819   : > { %v1210_v20 = vpop.f32.mrb[20].mxu1 }
 0x81a   : > { %v1211_v21 = vadd.f32 %v1908_v19, %v1210_v20  ;;  %v2099_v22 = vpop.f32.mrb[21].mxu1 }
 0x81b   : > { %v1213_v24 = vpop.f32.mrb[22].mxu1 }
 0x81c   : > { %v1282_v25 = vpack.c.bf16 %v1211_v21, %v1211_v21  ;;  %v2100_v26 = vpop.f32.mrb[23].mxu1 }
 0x81e   : > { %v1287_v28 = vsel %vm666_vm2, %v1282_v25, 0 }
 0x81f   : > { %2110 = vmatpush3.bf16.xpose.msra.mxu1 %v1287_v28 }
 0x820   : > { %2121 = vmatprep.subr.bf16.mxu1 %v2230_v10 }
 0x826   : > { %2112 = vmatmul.mubr.msk.bf16.vlgmr.msra.gmra.mrb[24].mxu1 %vm666_vm2, %v1281_v31 }
 0x827   : > { %2122 = vmatpush3.bf16.msra.mxu1 %v2196_v30  ;;  %2125 = vmatprep.mubr.msk.bf16.mxu1 %vm2231_vm1, %v2230_v10 }
 0x828   : > { %2123 = vmatprep.subr.bf16.mxu1 %v2230_v10 }
 0x82b   : > { %2124 = vmatpush3.bf16.msra.mxu1 %v2197_v32 }
 0x82c   : > { %2137 = vmatprep.subr.bf16.mxu1 %v2230_v10 }
 0x82e   : > { %2126 = vmatmul.mubr.msk.bf16.vlgmr.msra.gmra.mrb[28].mxu1 %vm428_vm0, %v2353_v23 }
 0x82f   : > { %2138 = vmatpush3.bf16.msra.mxu1 %v2198_v33  ;;  %2141 = vmatprep.mubr.msk.bf16.mxu1 %vm2231_vm1, %v2230_v10 }
 0x830   : > { %2139 = vmatprep.subr.bf16.mxu1 %v2230_v10 }
 0x833   : > { %2140 = vmatpush3.bf16.msra.mxu1 %v2199_v34 }
 0x834   : > { %2151 = vmatprep.subr.bf16.mxu1 %v2230_v10 }
 0x836   : > { %2142 = vmatmul.mubr.msk.bf16.vlgmr.msra.gmra.mrb[32].mxu1 %vm428_vm0, %v2353_v23 }
 0x837   : > { %2153 = vmatprep.mubr.msk.bf16.mxu1 %vm2231_vm1, %v2230_v10 }
 0x8f9   : > { %v1323_v35 = vpop.f32.mrb[24].mxu1 }
 0x8fa   : > { %v1329_v36 = vmul.f32 0.35355338, %v1323_v35  ;;  %v2113_v37 = vpop.f32.mrb[25].mxu1 }
 0x8fb   : > { %v1326_v38 = vpop.f32.mrb[26].mxu1  ;;  %v2203_v37 = vld [vmem:[%s2606_s10 + $0x8] sm:$0xff]  }
 0x8fc   : > { %v2114_v39 = vpop.f32.mrb[27].mxu1  ;;  %v1330_v40 = vadd.f32 %v1329_v36, %v2417_v57  ;;  %v2202_v36 = vld [vmem:[%s2606_s10] sm:$0xff]  }
 0x8fe   : > { %v1331_v41 = vsel %vm666_vm2, %v1330_v40, -inf }
 0x8ff   : > { %1332 = vmax.xlane.f32.xlu0 %v1331_v41 }
 0x901   : > { %v1455_v42 = vpop.f32.mrb[28].mxu1 }
 0x902   : > { %v2127_v43 = vpop.f32.mrb[29].mxu1 }
 0x903   : > { %v1458_v44 = vpop.f32.mrb[30].mxu1 }
 0x904   : > { %v2128_v45 = vpop.f32.mrb[31].mxu1 }
 0x909   : > { %v1585_v47 = vpop.f32.mrb[32].mxu1 }
 0x90a   : > { %v1586_v48 = vadd.f32 %v1946_v46, %v1585_v47  ;;  %v2143_v49 = vpop.f32.mrb[33].mxu1 }
 0x90b   : > { %v1588_v50 = vpop.f32.mrb[34].mxu1 }
 0x90c   : > { %v1653_v51 = vpack.c.bf16 %v1586_v48, %v1586_v48  ;;  %v2144_v52 = vpop.f32.mrb[35].mxu1 }
 0x90e   : > { %v1658_v53 = vsel %vm731_vm3, %v1653_v51, 0 }
 0x90f   : > { %2152 = vmatpush3.bf16.msra.mxu1 %v1658_v53 }
 0x98c   : > { %v1333_v54 = vpop.xlane.xlu0 %1332 }
 0x98d   : > { %v1334_v55 = vsub.f32 %v1330_v40, %v1333_v54 }
 0x98f   : > { %v1335_v56 = vmul.f32 1.442695, %v1334_v55 }
 0x991   : > { %2214 = vpow2.f32 %v1335_v56 }
 0x99b   : > { %v2215_v58 = vpop.eup %2214 }
 0x99c   : > { %v1337_v59 = vsel %vm666_vm2, %v2215_v58, 0.0 }
 0x99d   : > { %1338 = vadd.xlane.f32.xlu1 %v1337_v59 }
 0xa2a   : > { %v1339_v60 = vpop.xlane.xlu1 %1338 }
 0xa2b   : > { %2216 = vrcp.f32 %v1339_v60 }
 0xa35   : > { %v2217_v61 = vpop.eup %2216 }
 0xa36   : > { %v1341_v62 = vmul.f32 %v2217_v61, %v2215_v58 }
 0xa38   : > { %v1342_v0 = vpack.c.bf16 %v1341_v62, %v1341_v62 }
 0xa3a   : > { %2118 = vmatmul.mubr.msk.bf16.vlgmr.msra.gmra.mrb[28].mxu0 %vm666_vm2, %v1342_v0 }
 0xa3b   : > { %2130 = vmatpush3.bf16.msra.mxu0 %v2200_v63  ;;  %2133 = vmatprep.mubr.msk.bf16.mxu0 %vm2231_vm1, %v2230_v10 }
 0xa3c   : > { %2131 = vmatprep.subr.bf16.mxu0 %v2230_v10 }
 0xa3f   : > { %2132 = vmatpush3.bf16.msra.mxu0 %v2201_v2 }
 0xa40   : > { %2145 = vmatprep.subr.bf16.mxu0 %v2230_v10 }
 0xa42   : > { %2134 = vmatmul.mubr.msk.bf16.vlgmr.msra.gmra.mrb[32].mxu0 %vm428_vm0, %v2353_v23  ;;  %v1928_v23 = vld [vmem:[%s2601_s5 + $0x3] ss:$0 sm:$0xff] }
 0xa43   : > { %2147 = vmatprep.mubr.msk.bf16.mxu0 %vm2231_vm1, %v2230_v10  ;;  %v1456_v17 = vadd.f32 %v1928_v23, %v1455_v42 }
 0xa45   : > { %v1591_v18 = vpack.c.bf16 %v1456_v17, %v1456_v17 }
 0xb0d   : > { %v1384_v3 = vpop.f32.mrb[28].mxu0 }
 0xb0e   : > { %v2119_v4 = vpop.f32.mrb[29].mxu0 }
 0xb0f   : > { %v1387_v5 = vpop.f32.mrb[30].mxu0 }
 0xb10   : > { %v2120_v6 = vpop.f32.mrb[31].mxu0 }
 0xb15   : > { %v1520_v8 = vpop.f32.mrb[32].mxu0 }
 0xb16   : > { %v1521_v9 = vadd.f32 %v1937_v7, %v1520_v8  ;;  %v2135_v11 = vpop.f32.mrb[33].mxu0 }
 0xb17   : > { %v1523_v12 = vpop.f32.mrb[34].mxu0 }
 0xb18   : > { %v1592_v13 = vpack.c.bf16 %v1521_v9, %v1521_v9  ;;  %v2136_v14 = vpop.f32.mrb[35].mxu0 }
 0xb1a   : > { %v1597_v16 = vsel %vm666_vm2, %v1592_v13, 0 }
 0xb1b   : > { %2146 = vmatpush3.bf16.xpose.msra.mxu0 %v1597_v16 }
 0xb1c   : > { %2157 = vmatprep.subr.bf16.mxu0 %v2230_v10 }
 0xb22   : > { %2148 = vmatmul.mubr.msk.bf16.vlgmr.msra.gmra.mrb[36].mxu0 %vm666_vm2, %v1591_v18 }
 0xb23   : > { %2161 = vmatprep.mubr.msk.bf16.mxu0 %vm2231_vm1, %v2230_v10  ;;  %2158 = vmatpush3.bf16.msra.mxu0 %v2202_v36 }
 0xb24   : > { %2159 = vmatprep.subr.bf16.mxu0 %v2230_v10  ;;  %v1955_v10 = vld [vmem:[%s2607_s11] ss:$0 sm:$0xff] }
 0xb27   : > { %2160 = vmatpush3.bf16.msra.mxu0 %v2203_v37 }
 0xbf5   : > { %v1633_v19 = vpop.f32.mrb[36].mxu0 }
 0xbf6   : > { %v1639_v20 = vmul.f32 0.35355338, %v1633_v19  ;;  %v2149_v21 = vpop.f32.mrb[37].mxu0 }
 0xbf7   : > { %v1636_v22 = vpop.f32.mrb[38].mxu0 }
 0xbf8   : > { %v2150_v24 = vpop.f32.mrb[39].mxu0  ;;  %v1640_v25 = vadd.f32 %v1639_v20, %v2417_v57 }
 0xbfa   : > { %v1641_v26 = vsel %vm666_vm2, %v1640_v25, -inf }
 0xbfb   : > { %1642 = vmax.xlane.f32.xlu0 %v1641_v26 }
 0xc11   : > { %1081 = vrot.lane.b32.xlu0 %v2501_v15, %s2232_s13 }
 0xc88   : > { %v1643_v27 = vpop.xlane.xlu0 %1642 }
 0xc89   : > { %v1644_v28 = vsub.f32 %v1640_v25, %v1643_v27 }
 0xc8b   : > { %v1645_v29 = vmul.f32 1.442695, %v1644_v28 }
 0xc8c   : > { %v1082_v30 = vpop.permute.xlu0 %1081 }
 0xc8d   : > { %2218 = vpow2.f32 %v1645_v29  ;;  %1085 = vst.msk [vmem:[#allocation2] sm:$0xff] %vm1084_vm5, %v1082_v30 }
 0xc97   : > { %v2219_v31 = vpop.eup %2218 }
 0xc98   : > { %v1647_v32 = vsel %vm666_vm2, %v2219_v31, 0.0 }
 0xc99   : > { %1648 = vadd.xlane.f32.xlu1 %v1647_v32 }
 0xcaa   : > { %1391 = vrot.lane.b32.xlu1 %v1384_v3, %s2233_s14 }
 0xd26   : > { %v1649_v57 = vpop.xlane.xlu1 %1648 }
 0xd27   : > { %2220 = vrcp.f32 %v1649_v57 }
 0xd2a   : > { %v1392_v33 = vpop.permute.xlu1 %1391 }
 0xd2b   : > { %1395 = vst.msk [vmem:[#allocation2] sm:$0xff] %vm1394_vm6, %v1392_v33 }
 0xd31   : > { %v2221_v34 = vpop.eup %2220 }
 0xd32   : > { %v1651_v15 = vmul.f32 %v2221_v34, %v2219_v31 }
 0xd34   : > { %v1652_v35 = vpack.c.bf16 %v1651_v15, %v1651_v15 }
 0xd36   : > { %2154 = vmatmul.mubr.msk.bf16.vlgmr.msra.gmra.mrb[36].mxu1 %vm666_vm2, %v1652_v35 }
 0xe09   : > { %v1694_v38 = vpop.f32.mrb[36].mxu1 }
 0xe0a   : > { %1701 = vrot.lane.b32.xlu1 %v1694_v38, %s2234_s19  ;;  %v2155_v39 = vpop.f32.mrb[37].mxu1 }
 0xe0b   : > { %v1697_v40 = vpop.f32.mrb[38].mxu1 }
 0xe0c   : > { %v2156_v41 = vpop.f32.mrb[39].mxu1 }
 0xe7c   : > { %v1702_v42 = vpop.permute.xlu1 %1701 }
 0xe7d   : > { %1705 = vst.msk [vmem:[#allocation2] sm:$0xff] %vm1704_vm7, %v1702_v42 }
 0xe84   : > { %v1706_v43 = vld [vmem:[#allocation2] sm:$0xff] }
 0xe85   : > { %v1711_v44 = vpack.c.bf16 %v1706_v43, %v1706_v43 }
 0xe87   : > { %2162 = vmatmul.mubr.msk.bf16.vlgmr.msra.gmra.mrb[40].mxu0 %vm428_vm0, %v1711_v44 }
 0xf5a   : > { %v1761_v45 = vpop.f32.mrb[40].mxu0 }
 0xf5b   : > { %v1767_v46 = vadd.f32 %v1761_v45, %v2316_v1  ;;  %v2163_v47 = vpop.f32.mrb[41].mxu0 }
 0xf5c   : > { %v1764_v48 = vpop.f32.mrb[42].mxu0 }
 0xf5d   : > { %v1775_v49 = vadd.f32 %v1955_v10, %v1767_v46  ;;  %v2164_v50 = vpop.f32.mrb[43].mxu0 }
 0xf5f   : > { %v1776_v51 = vpack.c.bf16 %v1775_v49, %v1775_v49 }
 0xf61   : > { %1778 = vst.msk [vmem:[%s422_s27] sm:$0xf] %vm1777_vm8, %v1776_v51 }
 0xf62 PF: > { %s22_s21 = sadd.s32 1, %s2228_s21  }
 0xf63   : > { %p19_p4 = scmp.ge.s32.totalorder %s22_s21, 4  }
 0xf65   :  { %21 = sbr.rel (!%p19_p4) target bundleno = 1 (0x1), region = 119 }

// kernel: _lambda_.23
= control target key start
LH: loop header
LB: loop body
LE: loop exit
PB: predicated region body
PF: predicated region fallthrough
CT: control target
= control target key end

     0   :  { %vm29_vm0 = vcmask 261120   ;;  %s302_s0 = inlined_call_operand.vmem [shape: bf16[16,32], index: 0, kind: input, shape index: {}]   ;;  %s303_s1 = inlined_call_operand.vmem [shape: f32[1,32], index: 1, kind: input, shape index: {}]   ;;  %s304_s2 = inlined_call_operand.vmem [shape: f32[1,32], index: 2, kind: input, shape index: {}]   ;;  %s305_s3 = inlined_call_operand.vmem [shape: bf16[48,32], index: 3, kind: input, shape index: {}]   ;;  %s306_s4 = inlined_call_operand.hbm [shape: f32[16,48], index: 4, kind: output, shape index: {}]  }
   0x1   :  { %v179_v0 = vld [vmem:[%s302_s0] sm:$0xff]  }
   0x2   :  { %v180_v1 = vunpack.c.l.bf16 %v179_v0  ;;  %v181_v2 = vunpack.c.h.bf16 %v179_v0 }
   0x3   :  { %9 = vsyncpa [#allocation4], 0  ;;  %v201_v15 = vld [vmem:[%s305_s3] sm:$0xff]   ;;  %v232_v16 = vmov 0.0   ;;  %v202_v18 = vld [vmem:[%s305_s3 + $0x8] sm:$0xff]   ;;  %vm233_vm1 = vmmov 0  }
   0x4   :  { %v30_v3 = vsel %vm29_vm0, %v180_v1, 0.0  ;;  %v33_v4 = vsel %vm29_vm0, %v181_v2, 0.0  ;;  %186 = vmatprep.subr.bf16.mxu0 %v232_v16  ;;  %v104_v17 = vsel %vm29_vm0, %v201_v15, 0  ;;  %v107_v19 = vsel %vm29_vm0, %v202_v18, 0  ;;  %v203_v20 = vld [vmem:[%s305_s3 + $0x10] sm:$0xff]   ;;  %192 = vmatprep.mubr.msk.bf16.mxu0 %vm233_vm1, %v232_v16 }
   0x5   :  { %31 = vadd.xlane.f32.xlu0 %v30_v3  ;;  %187 = vmatpush3.bf16.xpose.msra.mxu0 %v104_v17  ;;  %v110_v21 = vsel %vm29_vm0, %v203_v20, 0  ;;  %v172_v29 = vld [vmem:[%s303_s1] ss:$0 sm:$0xff]  ;;  %s234_s1 = smov [#allocation3]   ;;  %vm153_vm2 = vcmask 392192  }
   0x6   :  { %188 = vmatprep.subr.bf16.mxu0 %v232_v16  ;;  %v173_v31 = vld [vmem:[%s304_s2] ss:$0 sm:$0xff]  ;;  %s161_s25 = sshll.u32 %s234_s1, 4  ;;  %s162_s25 = int_to_ptr.vmem [resolvable:$true] %s161_s25 }
   0x7   :  { %s208_s2 = scalar_lea.vmem %s162_s25, 256  ;;  %p213_p1 = scmp.lt.s32.totalorder %s162_s25, %s162_s25 }
   0x8   :  { %p209_p0 = scmp.ne.s32.totalorder %s162_s25, %s208_s2  ;;  %p214_p2 = scmp.lt.s32.totalorder %s208_s2, %s208_s2 }
   0x9   :  { %34 = vadd.xlane.f32.xlu0 %v33_v4 }
   0xa   :  { %p215_p3 = por %p214_p2, %p213_p1 }
   0xc   :  { %p216_p4 = pnand %p215_p3, %p209_p0 }
   0xd   :  { %189 = vmatpush3.bf16.xpose.msra.mxu0 %v107_v19 }
   0xe   :  { %190 = vmatprep.subr.bf16.mxu0 %v232_v16 }
  0x15   :  { %191 = vmatpush3.bf16.xpose.msra.mxu0 %v110_v21 }
  0x92   :  { %v32_v5 = vpop.xlane.xlu0 %31 }
  0x93   :  { %v37_v6 = vmul.f32 0.03125, %v32_v5 }
  0x95   :  { %v39_v7 = vsub.f32 %v180_v1, %v37_v6 }
  0x96   :  { %v35_v8 = vpop.xlane.xlu0 %34 }
  0x97   :  { %v38_v9 = vmul.f32 0.03125, %v35_v8  ;;  %v41_v10 = vmul.f32 %v39_v7, %v39_v7 }
  0x99   :  { %v40_v11 = vsub.f32 %v181_v2, %v38_v9  ;;  %v43_v12 = vsel %vm29_vm0, %v41_v10, 0.0 }
  0x9a   :  { %44 = vadd.xlane.f32.xlu1 %v43_v12 }
  0x9b   :  { %v42_v13 = vmul.f32 %v40_v11, %v40_v11 }
  0x9d   :  { %v46_v14 = vsel %vm29_vm0, %v42_v13, 0.0 }
  0x9e   :  { %47 = vadd.xlane.f32.xlu1 %v46_v14 }
 0x127   :  { %v45_v22 = vpop.xlane.xlu1 %44 }
 0x128   :  { %v49_v23 = vmul.f32 0.03125, %v45_v22 }
 0x12a   :  { %v51_v24 = vadd.f32 1e-05, %v49_v23 }
 0x12b   :  { %v48_v25 = vpop.xlane.xlu1 %47 }
 0x12c   :  { %204 = vrsqrt.f32 %v51_v24  ;;  %v50_v26 = vmul.f32 0.03125, %v48_v25 }
 0x12e   :  { %v52_v27 = vadd.f32 1e-05, %v50_v26 }
 0x130   :  { %206 = vrsqrt.f32 %v52_v27 }
 0x136   :  { %v205_v28 = vpop.eup %204 }
 0x137   :  { %v55_v30 = vmul.f32 %v205_v28, %v39_v7 }
 0x139   :  { %v63_v32 = vmul.f32 %v172_v29, %v55_v30 }
 0x13a   :  { %v207_v33 = vpop.eup %206 }
 0x13b   :  { %v71_v34 = vadd.f32 %v173_v31, %v63_v32  ;;  %v56_v35 = vmul.f32 %v207_v33, %v40_v11 }
 0x13d   :  { %73 = vst.msk [vmem:[#allocation2] sm:$0xff] %vm29_vm0, %v71_v34  ;;  %v64_v36 = vmul.f32 %v172_v29, %v56_v35 }
 0x13f   :  { %v72_v37 = vadd.f32 %v173_v31, %v64_v36 }
 0x141   :  { %74 = vst.msk [vmem:[#allocation2 + $0x8] sm:$0xff] %vm29_vm0, %v72_v37 }
 0x144   :  { %v75_v38 = vld [vmem:[#allocation2] sm:$0xff] }
 0x148   :  { %v76_v39 = vld [vmem:[#allocation2 + $0x8] sm:$0xff] }
 0x149   :  { %v83_v40 = vpack.c.bf16 %v76_v39, %v75_v38 }
 0x14b   :  { %193 = vmatmul.mubr.msk.bf16.vlgmr.msra.gmra.mrb[0].mxu0 %vm29_vm0, %v83_v40 }
 0x21e   :  { %v146_v41 = vpop.f32.mrb[0].mxu0 }
 0x21f   :  { %154 = vst.msk [vmem:[#allocation3] sm:$0xff] %vm153_vm2, %v146_v41  ;;  %v194_v42 = vpop.f32.mrb[1].mxu0 }
 0x220   :  { %v149_v43 = vpop.f32.mrb[2].mxu0 }
 0x221   :  { %155 = vst.msk [vmem:[#allocation3 + $0x8] sm:$0xff] %vm153_vm2, %v149_v43  ;;  %v195_v44 = vpop.f32.mrb[3].mxu0 }
 0x222   :  { %219 = shalt.err (!%p216_p4)
}
 0x223   :  { %s220_s28 = scalar_lea.hbm %s306_s4, 256 }
 0x224   :  { %p221_p5 = scmp.ne.s32.totalorder %s306_s4, %s220_s28  ;;  %p224_p6 = scmp.lt.u32.totalorder %s220_s28, %s306_s4 }
 0x226   :  { %p226_p7 = pnand %p224_p6, %p221_p5 }
 0x228   :  { %229 = shalt.err (!%p226_p7)
}
 0x229   :  { %s235_s7 = smov 128   ;;  %s236_s8 = smov 8  }
 0x22a   :  { %167 = dma.vmem_to_hbm [thread:$0]  %s162_s25, 256, %s306_s4, [#allocation4], %s235_s7, %s235_s7, %s236_s8  }
 0x22b   :  { %230 = dma.done.wait [#allocation4], 256  }
 0x22c   :  { %231 = vsyncadd [#allocation4], 4294967040 }
 0x22d   :  { %171 = vsyncpa [#allocation4], 1 }

</bundles_post_ra>
